<compile_context>
chip_gen: v7x
topology: tpu7x:2x2x1
jax: 0.10.0
libtpu: 0.0.40
codegen_flags: <defaults>
</compile_context>

<pallas_src>
import functools

import numpy as np
import jax
import jax.numpy as jnp
from jax.experimental import pallas as pl
from jax.experimental.pallas import tpu as pltpu


_PY_UNROLL_MAX_STEPS = 32   # fully unroll the SDE loop when T <= this, else fori_loop


# ----------------------------------------------------------------------------
# Single fused Generator kernel: initial MLP + reversible-Heun loop + readout
# ----------------------------------------------------------------------------
def _make_gen_kernel(T, H, N, L, py_unroll):
    n_init = 2 * (L + 1)      # initial MLP: (L+1) linears -> (W, b) pairs
    n_func = 2 * L + 3        # fused func MLP: wt, Wx, b0, (W,b)*(L-1), W_last, b_last

    def lipswish(x):
        return 0.909 * x * jax.nn.sigmoid(x)

    def kernel(ts_ref, noise_ref, dw_ref, *rest):
        init_refs = rest[:n_init]
        func_refs = rest[n_init:n_init + n_func]
        wr_ref = rest[n_init + n_func]          # (H, D)  bf16 readout weight
        br_ref = rest[n_init + n_func + 1]      # (1, D)  f32 readout bias
        ys_ref = rest[n_init + n_func + 2]      # ((T+1)*Bc, D) output
        x0_ref = rest[n_init + n_func + 3]      # (Bc, H) output
        st_ref = rest[n_init + n_func + 4]      # ((T+1)*Bc, H) state scratch (VMEM)

        Bc = noise_ref.shape[0]
        mdt = func_refs[1].dtype                # matmul operand dtype (bf16)

        # ------------------ initial MLP (bf16 MXU, f32 accumulation) ------------
        h = noise_ref[...]
        for li in range(L + 1):
            W = init_refs[2 * li][...]
            b = init_refs[2 * li + 1][...]
            h = jnp.dot(h.astype(mdt), W, preferred_element_type=jnp.float32) + b
            if li < L:
                h = lipswish(h)
        x0 = h
        x0_ref[...] = x0
        st_ref[0:Bc, :] = x0

        # -------- fused drift+diffusion MLP (weights loaded once; ~20 KiB) ------
        wt_ref = func_refs[0]                     # (Bc, 2M) f32, pre-broadcast
        Wx = func_refs[1][...]                    # (H, 2M)  bf16
        b0_ref = func_refs[2]                     # (Bc, 2M) f32, pre-broadcast
        hidden = [(func_refs[3 + 2 * j][...], func_refs[4 + 2 * j])
                  for j in range(L - 1)]          # (W bf16, pre-broadcast bias ref)
        WL = func_refs[2 * L + 1][...]            # (2M, H + N*H) bf16
        bL_ref = func_refs[2 * L + 2]             # (Bc, H + N*H) f32, pre-broadcast

        def f_and_g(t, x):
            # concat([t, x]) @ W0 == x @ Wx + t * wt  (first layer pre-split).
            # Biases were pre-broadcast to (Bc, width) in the wrapper, so the loop
            # body contains no broadcast_in_dim ops (JAX does not CSE them).
            hh = (jnp.dot(x.astype(mdt), Wx, preferred_element_type=jnp.float32)
                  + t * wt_ref[...] + b0_ref[...])
            hh = lipswish(hh)
            for (W, b_ref) in hidden:
                hh = lipswish(jnp.dot(hh.astype(mdt), W,
                                      preferred_element_type=jnp.float32) + b_ref[...])
            out = jnp.tanh(jnp.dot(hh.astype(mdt), WL,
                                   preferred_element_type=jnp.float32) + bL_ref[...])
            return out[:, :H], out[:, H:]         # drift (Bc,H), diffusion (Bc,N*H)

        def gprod(gflat, dwrow):
            # gflat noise-major: column n*H + h holds g[b, h, n].  dwrow is the raw
            # (Bc, N) Brownian increment; expansion happens on the fly via a cheap
            # (Bc,1)->(Bc,H) lane broadcast (no H x expanded HBM stream needed).
            acc = gflat[:, 0:H] * dwrow[:, 0:1]
            for n in range(1, N):
                acc = acc + gflat[:, n * H:(n + 1) * H] * dwrow[:, n:n + 1]
            return acc

        # ------------------ reversible Heun (Stratonovich) step -----------------
        def step(i, carry):
            y, z, f, g = carry
            t0 = ts_ref[i]
            t1 = ts_ref[i + 1]
            dt = t1 - t0
            dwrow = dw_ref[i]                     # (Bc, N), VMEM resident
            p0 = gprod(g, dwrow)
            z1 = 2.0 * y - z + f * dt + p0
            f1, g1 = f_and_g(t1, z1)
            # == y + (f0+f1)*0.5*dt + gprod(g0+g1, 0.5*dW), with gprod(g0,dW) reused
            y1 = y + (f + f1) * (0.5 * dt) + 0.5 * (p0 + gprod(g1, dwrow))
            st_ref[pl.ds((i + 1) * Bc, Bc), :] = y1
            return (y1, z1, f1, g1)

        f0, g0 = f_and_g(ts_ref[0], x0)
        carry = (x0, x0, f0, g0)
        if py_unroll:
            for i in range(T):
                carry = step(i, carry)
        else:
            # Long time series: bound vreg live ranges, keep LLO visibility.
            carry = jax.lax.fori_loop(0, T, step, carry, unroll=2)

        # -------- batched readout: ONE matmul over all (T+1)*Bc states ----------
        S = st_ref[...]
        ys_ref[...] = (jnp.dot(S.astype(mdt), wr_ref[...],
                               preferred_element_type=jnp.float32) + br_ref[...])

    return kernel


def sde_generate(ts, init_noise, dW, initial_params, func_params, readout_params,
                 *, H, N, L, batch_chunks=1, matmul_dtype=jnp.bfloat16):
    B, In = init_noise.shape
    T = ts.shape[0] - 1
    D = readout_params[0].shape[1]
    assert B % batch_chunks == 0, "batch_size must be divisible by batch_chunks"
    Bc = B // batch_chunks
    # (8,128) BlockSpec rule: a batch chunk must be the full batch or a multiple of
    # 8 sublanes.  Megacore sharding (batch_chunks=2 on v7x) only pays off when each
    # chunk is itself MXU-filling (Bc >= 128); keep batch_chunks=1 otherwise.
    assert batch_chunks == 1 or Bc % 8 == 0, "per-chunk batch must be a multiple of 8"

    # ---- weight prep: matmul operands -> bf16, per-step biases pre-broadcast ----
    init_w = [w.astype(matmul_dtype) if i % 2 == 0 else w
              for i, w in enumerate(initial_params)]
    func_w = []
    for i, w in enumerate(func_params):
        if i == 1 or (i >= 3 and i % 2 == 1):          # matmul operand
            func_w.append(w.astype(matmul_dtype))
        else:                                          # wt row / per-step bias
            func_w.append(jnp.broadcast_to(w, (Bc, w.shape[1])))
    Wr, br = readout_params
    weights = init_w + func_w + [Wr.astype(matmul_dtype), br]

    kernel = _make_gen_kernel(T, H, N, L, py_unroll=(T <= _PY_UNROLL_MAX_STEPS))

    def const_spec(w):
        return pl.BlockSpec(w.shape, lambda i, ts_ref, nd=w.ndim: (0,) * nd)

    grid_spec = pltpu.PrefetchScalarGridSpec(
        num_scalar_prefetch=1,   # ts lives in SMEM; scalar reads per step
        grid=(batch_chunks,),    # batch-parallel axis (size 1 by default)
        in_specs=[
            pl.BlockSpec((Bc, In), lambda i, ts_ref: (i, 0)),        # init noise
            pl.BlockSpec((T, Bc, N), lambda i, ts_ref: (0, i, 0)),   # raw dW (unexpanded)
        ] + [const_spec(w) for w in weights],
        out_specs=[
            pl.BlockSpec(((T + 1) * Bc, D), lambda i, ts_ref: (i, 0)),  # readout ys
            pl.BlockSpec((Bc, H), lambda i, ts_ref: (i, 0)),            # x0
        ],
        scratch_shapes=[pltpu.VMEM(((T + 1) * Bc, H), jnp.float32)],
    )

    # Rough per-core VMEM need (double-buffered I/O + state scratch); raise the
    # scoped limit explicitly (v5e default is only 16 MiB) with headroom.
    est = (2 * (Bc * In + T * Bc * N) * 4
           + 2 * sum(int(w.size) * w.dtype.itemsize for w in weights)
           + 2 * ((T + 1) * Bc * D + Bc * H) * 4
           + (T + 1) * Bc * H * 4)
    vmem_limit = int(min(max(2 * est, 32 * 1024 * 1024), 128 * 1024 * 1024))

    ys_flat, x0 = pl.pallas_call(
        kernel,
        grid_spec=grid_spec,
        out_shape=(jax.ShapeDtypeStruct(((T + 1) * B, D), jnp.float32),
                   jax.ShapeDtypeStruct((B, H), jnp.float32)),
        compiler_params=pltpu.CompilerParams(
            dimension_semantics=("parallel",),
            vmem_limit_bytes=vmem_limit),
    )(ts, init_noise, dW, *weights)

    # chunk-major -> (batch, time, data); tiny XLA reshape/transpose that fuses
    # with the downstream ts concat.
    ys = ys_flat.reshape(batch_chunks, T + 1, Bc, D)
    ys = jnp.transpose(ys, (0, 2, 1, 3)).reshape(B, T + 1, D)
    return ys, x0


# ----------------------------------------------------------------------------
# Deterministic parameter construction (PyTorch nn.Linear default init scheme)
# ----------------------------------------------------------------------------
def _linear_params(key, fan_in, fan_out):
    kw, kb = jax.random.split(key)
    bound = 1.0 / float(np.sqrt(fan_in))
    W = jax.random.uniform(kw, (fan_in, fan_out), jnp.float32, -bound, bound)
    b = jax.random.uniform(kb, (1, fan_out), jnp.float32, -bound, bound)
    return W, b


def _mlp_params(key, in_size, out_size, mlp_size, num_layers):
    sizes = [in_size] + [mlp_size] * num_layers + [out_size]
    keys = jax.random.split(key, len(sizes) - 1)
    flat = []
    for k, fi, fo in zip(keys, sizes[:-1], sizes[1:]):
        W, b = _linear_params(k, fi, fo)
        flat += [W, b]
    return flat


def _permute_last_layer_noise_major(flat, H, N):
    """Reorder diffusion last-layer columns so the flat g output is noise-major
    (column n*H + h == g[b, h, n]); values identical to torch's .view(B, H, N)."""
    Wl, bl = flat[-2], flat[-1]
    M = Wl.shape[0]
    Wl = Wl.reshape(M, H, N).transpose(0, 2, 1).reshape(M, N * H)
    bl = bl.reshape(1, H, N).transpose(0, 2, 1).reshape(1, N * H)
    return flat[:-2] + [Wl, bl]


def _block_diag(A, B):
    top = jnp.concatenate([A, jnp.zeros((A.shape[0], B.shape[1]), A.dtype)], axis=1)
    bot = jnp.concatenate([jnp.zeros((B.shape[0], A.shape[1]), B.dtype), B], axis=1)
    return jnp.concatenate([top, bot], axis=0)


def _fuse_func_params(drift_flat, diff_flat, num_layers):
    """Fuse drift/diffusion MLPs into one wide MLP.
    Returns [wt, Wx, b0] + [(block-diag W, concat b)] * num_layers."""
    L = num_layers
    W0 = jnp.concatenate([drift_flat[0], diff_flat[0]], axis=1)   # (1+H, 2M)
    b0 = jnp.concatenate([drift_flat[1], diff_flat[1]], axis=1)   # (1, 2M)
    fused = [W0[0:1, :], W0[1:, :], b0]                           # wt, Wx, b0
    for l in range(1, L + 1):
        Wd, bd = drift_flat[2 * l], drift_flat[2 * l + 1]
        Wg, bg = diff_flat[2 * l], diff_flat[2 * l + 1]
        fused.append(_block_diag(Wd, Wg))
        fused.append(jnp.concatenate([bd, bg], axis=1))
    return fused


# ----------------------------------------------------------------------------
# Jitted end-to-end forward (RNG + single Pallas kernel + tiny glue)
# ----------------------------------------------------------------------------
@functools.partial(jax.jit, static_argnames=("batch_size", "dims"))
def _generator_forward(params, ts, key, *, batch_size, dims):
    initial_params, func_params, readout_params = params
    initial_noise_size, noise_size, hidden_size, num_layers, batch_chunks = dims

    kn, kb = jax.random.split(key)
    ts = ts.astype(jnp.float32)
    T = ts.shape[0] - 1
    B = batch_size

    init_noise = jax.random.normal(kn, (B, initial_noise_size), jnp.float32)

    # Brownian increments: one reversible-Heun step per ts interval (dt == spacing).
    # Passed UNEXPANDED as (T, B, N); the kernel expands against g on the fly.
    dts = ts[1:] - ts[:-1]
    dW = (jax.random.normal(kb, (T, B, noise_size), jnp.float32)
          * jnp.sqrt(dts)[:, None, None])

    ys, x0 = sde_generate(ts, init_noise, dW, initial_params, func_params,
                          readout_params, H=hidden_size, N=noise_size,
                          L=num_layers, batch_chunks=batch_chunks)

    ts_b = jnp.broadcast_to(ts[None, :, None], (B, T + 1, 1))
    # torchcde.linear_interpolation_coeffs is the identity on NaN-free data.
    out = jnp.concatenate([ts_b, ys], axis=2)
    return out, x0


# ----------------------------------------------------------------------------
# Generator
# ----------------------------------------------------------------------------
class Generator:
    def __init__(self, data_size, initial_noise_size, noise_size, hidden_size,
                 mlp_size, num_layers, g_dt, key, batch_chunks=1):
        self.data_size = data_size
        self.initial_noise_size = initial_noise_size
        self.noise_size = noise_size
        self.hidden_size = hidden_size
        self.num_layers = num_layers
        self.dt = g_dt
        # Only set batch_chunks=2 (v7x megacore) when batch_size/2 >= 128 and is a
        # multiple of 8; for best MXU utilization use batch >= 128 (v5e) / 256 (v6e/v7x).
        self.batch_chunks = batch_chunks

        k1, k2, k3, k4 = jax.random.split(key, 4)
        self.initial_params = _mlp_params(k1, initial_noise_size, hidden_size,
                                          mlp_size, num_layers)
        drift_flat = _mlp_params(k2, 1 + hidden_size, hidden_size,
                                 mlp_size, num_layers)
        diff_flat = _mlp_params(k3, 1 + hidden_size, hidden_size * noise_size,
                                mlp_size, num_layers)
        diff_flat = _permute_last_layer_noise_major(diff_flat, hidden_size, noise_size)
        self.func_params = _fuse_func_params(drift_flat, diff_flat, num_layers)
        Wr, br = _linear_params(k4, hidden_size, data_size)
        self.readout_params = [Wr, br]
        self.x0 = None

    def __call__(self, ts, batch_size, key):
        dims = (self.initial_noise_size, self.noise_size, self.hidden_size,
                self.num_layers, self.batch_chunks)
        out, x0 = _generator_forward(
            (self.initial_params, self.func_params, self.readout_params),
            ts, key, batch_size=batch_size, dims=dims)
        self.x0 = x0
        return out


if __name__ == "__main__":
    key = jax.random.PRNGKey(0)
    k_params, k_fwd = jax.random.split(key)

    data_size = 4
    initial_noise_size = 8
    noise_size = 4
    hidden_size = 16
    mlp_size = 32
    num_layers = 2
    batch_size = 8

    ts = jnp.linspace(0.0, 1.0, 9, dtype=jnp.float32)   # 9 time points -> 8 SDE steps
    g_dt = float(ts[1] - ts[0])

    gen = Generator(data_size, initial_noise_size, noise_size, hidden_size,
                    mlp_size, num_layers, g_dt, k_params)
    out = gen(ts, batch_size, k_fwd)
    out = jax.block_until_ready(out)

    assert out.shape == (batch_size, ts.shape[0], 1 + data_size), out.shape
    assert gen.x0.shape == (batch_size, hidden_size), gen.x0.shape
    assert bool(jnp.all(jnp.isfinite(out)))
    print("KERNEL_OK")
</pallas_src>

<mosaic_0001>
module attributes {stable_mosaic.version = 11 : i64} {
  func.func @kernel(%arg0: i32, %arg1: memref<9xf32, #tpu.memory_space<smem>>, %arg2: memref<8x8xf32, #tpu.memory_space<vmem>>, %arg3: memref<8x8x4xf32, #tpu.memory_space<vmem>>, %arg4: memref<8x32xbf16, #tpu.memory_space<vmem>>, %arg5: memref<1x32xf32, #tpu.memory_space<vmem>>, %arg6: memref<32x32xbf16, #tpu.memory_space<vmem>>, %arg7: memref<1x32xf32, #tpu.memory_space<vmem>>, %arg8: memref<32x16xbf16, #tpu.memory_space<vmem>>, %arg9: memref<1x16xf32, #tpu.memory_space<vmem>>, %arg10: memref<8x64xf32, #tpu.memory_space<vmem>>, %arg11: memref<16x64xbf16, #tpu.memory_space<vmem>>, %arg12: memref<8x64xf32, #tpu.memory_space<vmem>>, %arg13: memref<64x64xbf16, #tpu.memory_space<vmem>>, %arg14: memref<8x64xf32, #tpu.memory_space<vmem>>, %arg15: memref<64x80xbf16, #tpu.memory_space<vmem>>, %arg16: memref<8x80xf32, #tpu.memory_space<vmem>>, %arg17: memref<16x4xbf16, #tpu.memory_space<vmem>>, %arg18: memref<1x4xf32, #tpu.memory_space<vmem>>, %arg19: memref<72x4xf32, #tpu.memory_space<vmem>>, %arg20: memref<8x16xf32, #tpu.memory_space<vmem>>, %arg21: memref<72x16xf32, #tpu.memory_space<vmem>>) attributes {dimension_semantics = [#tpu.dimension_semantics<parallel>], iteration_bounds = array<i64: 1>, scalar_prefetch = 1 : i64, scratch_operands = 1 : i64, tpu.core_type = #tpu.core_type<tc>, window_params = [{transform_indices = @transform_0, window_bounds = array<i64: 8, 8>}, {transform_indices = @transform_1, window_bounds = array<i64: 8, 8, 4>}, {pipeline_mode = #tpu.pipeline_mode<synchronous>, transform_indices = @transform_2, window_bounds = array<i64: 8, 32>}, {pipeline_mode = #tpu.pipeline_mode<synchronous>, transform_indices = @transform_3, window_bounds = array<i64: 1, 32>}, {pipeline_mode = #tpu.pipeline_mode<synchronous>, transform_indices = @transform_4, window_bounds = array<i64: 32, 32>}, {pipeline_mode = #tpu.pipeline_mode<synchronous>, transform_indices = @transform_5, window_bounds = array<i64: 1, 32>}, {pipeline_mode = #tpu.pipeline_mode<synchronous>, transform_indices = @transform_6, window_bounds = array<i64: 32, 16>}, {pipeline_mode = #tpu.pipeline_mode<synchronous>, transform_indices = @transform_7, window_bounds = array<i64: 1, 16>}, {pipeline_mode = #tpu.pipeline_mode<synchronous>, transform_indices = @transform_8, window_bounds = array<i64: 8, 64>}, {pipeline_mode = #tpu.pipeline_mode<synchronous>, transform_indices = @transform_9, window_bounds = array<i64: 16, 64>}, {pipeline_mode = #tpu.pipeline_mode<synchronous>, transform_indices = @transform_10, window_bounds = array<i64: 8, 64>}, {pipeline_mode = #tpu.pipeline_mode<synchronous>, transform_indices = @transform_11, window_bounds = array<i64: 64, 64>}, {pipeline_mode = #tpu.pipeline_mode<synchronous>, transform_indices = @transform_12, window_bounds = array<i64: 8, 64>}, {pipeline_mode = #tpu.pipeline_mode<synchronous>, transform_indices = @transform_13, window_bounds = array<i64: 64, 80>}, {pipeline_mode = #tpu.pipeline_mode<synchronous>, transform_indices = @transform_14, window_bounds = array<i64: 8, 80>}, {pipeline_mode = #tpu.pipeline_mode<synchronous>, transform_indices = @transform_15, window_bounds = array<i64: 16, 4>}, {pipeline_mode = #tpu.pipeline_mode<synchronous>, transform_indices = @transform_16, window_bounds = array<i64: 1, 4>}, {transform_indices = @transform_17, window_bounds = array<i64: 72, 4>}, {transform_indices = @transform_18, window_bounds = array<i64: 8, 16>}]} {
    %c0 = arith.constant 0 : index
    %c0_0 = arith.constant 0 : index
    %0 = vector.load %arg2[%c0, %c0_0] : memref<8x8xf32, #tpu.memory_space<vmem>>, vector<8x8xf32>
    %c0_1 = arith.constant 0 : index
    %c0_2 = arith.constant 0 : index
    %1 = vector.load %arg4[%c0_1, %c0_2] : memref<8x32xbf16, #tpu.memory_space<vmem>>, vector<8x32xbf16>
    %c0_3 = arith.constant 0 : index
    %c0_4 = arith.constant 0 : index
    %2 = vector.load %arg5[%c0_3, %c0_4] : memref<1x32xf32, #tpu.memory_space<vmem>>, vector<1x32xf32>
    %3 = arith.truncf %0 : vector<8x8xf32> to vector<8x8xbf16>
    %cst = arith.constant dense<0.000000e+00> : vector<8x32xf32>
    %4 = tpu.matmul %3, %1, %cst {dimension_numbers = #tpu.dot_dimension_numbers<[1], [0], [0], [1], [0, 0, 1, 1], [], []>} : vector<8x8xbf16>, vector<8x32xbf16>, vector<8x32xf32> -> vector<8x32xf32>
    %5 = vector.broadcast %2 : vector<1x32xf32> to vector<8x32xf32>
    %6 = arith.addf %4, %5 : vector<8x32xf32>
    %cst_5 = arith.constant 0.908999979 : f32
    %7 = vector.broadcast %cst_5 : f32 to vector<8x32xf32>
    %8 = arith.mulf %7, %6 : vector<8x32xf32>
    %9 = arith.negf %6 : vector<8x32xf32>
    %10 = math.exp %9 : vector<8x32xf32>
    %cst_6 = arith.constant 1.000000e+00 : f32
    %11 = vector.broadcast %cst_6 : f32 to vector<8x32xf32>
    %12 = arith.addf %11, %10 : vector<8x32xf32>
    %13 = arith.divf %11, %12 : vector<8x32xf32>
    %14 = arith.mulf %8, %13 : vector<8x32xf32>
    %c0_7 = arith.constant 0 : index
    %c0_8 = arith.constant 0 : index
    %15 = vector.load %arg6[%c0_7, %c0_8] : memref<32x32xbf16, #tpu.memory_space<vmem>>, vector<32x32xbf16>
    %c0_9 = arith.constant 0 : index
    %c0_10 = arith.constant 0 : index
    %16 = vector.load %arg7[%c0_9, %c0_10] : memref<1x32xf32, #tpu.memory_space<vmem>>, vector<1x32xf32>
    %17 = arith.truncf %14 : vector<8x32xf32> to vector<8x32xbf16>
    %cst_11 = arith.constant dense<0.000000e+00> : vector<8x32xf32>
    %18 = tpu.matmul %17, %15, %cst_11 {dimension_numbers = #tpu.dot_dimension_numbers<[1], [0], [0], [1], [0, 0, 1, 1], [], []>} : vector<8x32xbf16>, vector<32x32xbf16>, vector<8x32xf32> -> vector<8x32xf32>
    %19 = vector.broadcast %16 : vector<1x32xf32> to vector<8x32xf32>
    %20 = arith.addf %18, %19 : vector<8x32xf32>
    %cst_12 = arith.constant 0.908999979 : f32
    %21 = vector.broadcast %cst_12 : f32 to vector<8x32xf32>
    %22 = arith.mulf %21, %20 : vector<8x32xf32>
    %23 = arith.negf %20 : vector<8x32xf32>
    %24 = math.exp %23 : vector<8x32xf32>
    %cst_13 = arith.constant 1.000000e+00 : f32
    %25 = vector.broadcast %cst_13 : f32 to vector<8x32xf32>
    %26 = arith.addf %25, %24 : vector<8x32xf32>
    %27 = arith.divf %25, %26 : vector<8x32xf32>
    %28 = arith.mulf %22, %27 : vector<8x32xf32>
    %c0_14 = arith.constant 0 : index
    %c0_15 = arith.constant 0 : index
    %29 = vector.load %arg8[%c0_14, %c0_15] : memref<32x16xbf16, #tpu.memory_space<vmem>>, vector<32x16xbf16>
    %c0_16 = arith.constant 0 : index
    %c0_17 = arith.constant 0 : index
    %30 = vector.load %arg9[%c0_16, %c0_17] : memref<1x16xf32, #tpu.memory_space<vmem>>, vector<1x16xf32>
    %31 = arith.truncf %28 : vector<8x32xf32> to vector<8x32xbf16>
    %cst_18 = arith.constant dense<0.000000e+00> : vector<8x16xf32>
    %32 = tpu.matmul %31, %29, %cst_18 {dimension_numbers = #tpu.dot_dimension_numbers<[1], [0], [0], [1], [0, 0, 1, 1], [], []>} : vector<8x32xbf16>, vector<32x16xbf16>, vector<8x16xf32> -> vector<8x16xf32>
    %33 = vector.broadcast %30 : vector<1x16xf32> to vector<8x16xf32>
    %34 = arith.addf %32, %33 : vector<8x16xf32>
    %c0_19 = arith.constant 0 : index
    %c0_20 = arith.constant 0 : index
    %35 = vector.load %arg20[%c0_19, %c0_20] : memref<8x16xf32, #tpu.memory_space<vmem>>, vector<8x16xf32>
    tpu.vector_store %arg20[%c0_19, %c0_20], %34 {strides = array<i32>} : memref<8x16xf32, #tpu.memory_space<vmem>>, vector<8x16xf32>,
    %c0_21 = arith.constant 0 : index
    %c0_22 = arith.constant 0 : index
    %36 = vector.load %arg21[%c0_21, %c0_22] : memref<72x16xf32, #tpu.memory_space<vmem>>, vector<8x16xf32>
    tpu.vector_store %arg21[%c0_21, %c0_22], %34 {strides = array<i32>} : memref<72x16xf32, #tpu.memory_space<vmem>>, vector<8x16xf32>,
    %c0_23 = arith.constant 0 : index
    %c0_24 = arith.constant 0 : index
    %37 = vector.load %arg11[%c0_23, %c0_24] : memref<16x64xbf16, #tpu.memory_space<vmem>>, vector<16x64xbf16>
    %c0_25 = arith.constant 0 : index
    %c0_26 = arith.constant 0 : index
    %38 = vector.load %arg13[%c0_25, %c0_26] : memref<64x64xbf16, #tpu.memory_space<vmem>>, vector<64x64xbf16>
    %c0_27 = arith.constant 0 : index
    %c0_28 = arith.constant 0 : index
    %39 = vector.load %arg15[%c0_27, %c0_28] : memref<64x80xbf16, #tpu.memory_space<vmem>>, vector<64x80xbf16>
    %c0_29 = arith.constant 0 : index
    %40 = memref.load %arg1[%c0_29] : memref<9xf32, #tpu.memory_space<smem>>
    %41 = arith.truncf %34 : vector<8x16xf32> to vector<8x16xbf16>
    %cst_30 = arith.constant dense<0.000000e+00> : vector<8x64xf32>
    %42 = tpu.matmul %41, %37, %cst_30 {dimension_numbers = #tpu.dot_dimension_numbers<[1], [0], [0], [1], [0, 0, 1, 1], [], []>} : vector<8x16xbf16>, vector<16x64xbf16>, vector<8x64xf32> -> vector<8x64xf32>
    %c0_31 = arith.constant 0 : index
    %c0_32 = arith.constant 0 : index
    %43 = vector.load %arg10[%c0_31, %c0_32] : memref<8x64xf32, #tpu.memory_space<vmem>>, vector<8x64xf32>
    %44 = vector.broadcast %40 : f32 to vector<8x64xf32>
    %45 = arith.mulf %44, %43 : vector<8x64xf32>
    %46 = arith.addf %42, %45 : vector<8x64xf32>
    %c0_33 = arith.constant 0 : index
    %c0_34 = arith.constant 0 : index
    %47 = vector.load %arg12[%c0_33, %c0_34] : memref<8x64xf32, #tpu.memory_space<vmem>>, vector<8x64xf32>
    %48 = arith.addf %46, %47 : vector<8x64xf32>
    %cst_35 = arith.constant 0.908999979 : f32
    %49 = vector.broadcast %cst_35 : f32 to vector<8x64xf32>
    %50 = arith.mulf %49, %48 : vector<8x64xf32>
    %51 = arith.negf %48 : vector<8x64xf32>
    %52 = math.exp %51 : vector<8x64xf32>
    %cst_36 = arith.constant 1.000000e+00 : f32
    %53 = vector.broadcast %cst_36 : f32 to vector<8x64xf32>
    %54 = arith.addf %53, %52 : vector<8x64xf32>
    %55 = arith.divf %53, %54 : vector<8x64xf32>
    %56 = arith.mulf %50, %55 : vector<8x64xf32>
    %57 = arith.truncf %56 : vector<8x64xf32> to vector<8x64xbf16>
    %cst_37 = arith.constant dense<0.000000e+00> : vector<8x64xf32>
    %58 = tpu.matmul %57, %38, %cst_37 {dimension_numbers = #tpu.dot_dimension_numbers<[1], [0], [0], [1], [0, 0, 1, 1], [], []>} : vector<8x64xbf16>, vector<64x64xbf16>, vector<8x64xf32> -> vector<8x64xf32>
    %c0_38 = arith.constant 0 : index
    %c0_39 = arith.constant 0 : index
    %59 = vector.load %arg14[%c0_38, %c0_39] : memref<8x64xf32, #tpu.memory_space<vmem>>, vector<8x64xf32>
    %60 = arith.addf %58, %59 : vector<8x64xf32>
    %cst_40 = arith.constant 0.908999979 : f32
    %61 = vector.broadcast %cst_40 : f32 to vector<8x64xf32>
    %62 = arith.mulf %61, %60 : vector<8x64xf32>
    %63 = arith.negf %60 : vector<8x64xf32>
    %64 = math.exp %63 : vector<8x64xf32>
    %cst_41 = arith.constant 1.000000e+00 : f32
    %65 = vector.broadcast %cst_41 : f32 to vector<8x64xf32>
    %66 = arith.addf %65, %64 : vector<8x64xf32>
    %67 = arith.divf %65, %66 : vector<8x64xf32>
    %68 = arith.mulf %62, %67 : vector<8x64xf32>
    %69 = arith.truncf %68 : vector<8x64xf32> to vector<8x64xbf16>
    %cst_42 = arith.constant dense<0.000000e+00> : vector<8x80xf32>
    %70 = tpu.matmul %69, %39, %cst_42 {dimension_numbers = #tpu.dot_dimension_numbers<[1], [0], [0], [1], [0, 0, 1, 1], [], []>} : vector<8x64xbf16>, vector<64x80xbf16>, vector<8x80xf32> -> vector<8x80xf32>
    %c0_43 = arith.constant 0 : index
    %c0_44 = arith.constant 0 : index
    %71 = vector.load %arg16[%c0_43, %c0_44] : memref<8x80xf32, #tpu.memory_space<vmem>>, vector<8x80xf32>
    %72 = arith.addf %70, %71 : vector<8x80xf32>
    %73 = math.tanh %72 : vector<8x80xf32>
    %74 = vector.extract_strided_slice %73 {offsets = [0, 0], sizes = [8, 16], strides = [1, 1]} : vector<8x80xf32> to vector<8x16xf32>
    %75 = vector.extract_strided_slice %73 {offsets = [0, 16], sizes = [8, 64], strides = [1, 1]} : vector<8x80xf32> to vector<8x64xf32>
    %c0_45 = arith.constant 0 : index
    %76 = memref.load %arg1[%c0_45] : memref<9xf32, #tpu.memory_space<smem>>
    %c1 = arith.constant 1 : index
    %77 = memref.load %arg1[%c1] : memref<9xf32, #tpu.memory_space<smem>>
    %78 = arith.subf %77, %76 : f32
    %c0_46 = arith.constant 0 : index
    %c0_47 = arith.constant 0 : index
    %c0_48 = arith.constant 0 : index
    %79 = vector.load %arg3[%c0_46, %c0_47, %c0_48] : memref<8x8x4xf32, #tpu.memory_space<vmem>>, vector<1x8x4xf32>
    %80 = vector.shape_cast %79 : vector<1x8x4xf32> to vector<8x4xf32>
    %81 = vector.extract_strided_slice %75 {offsets = [0, 0], sizes = [8, 16], strides = [1, 1]} : vector<8x64xf32> to vector<8x16xf32>
    %82 = vector.extract_strided_slice %80 {offsets = [0, 0], sizes = [8, 1], strides = [1, 1]} : vector<8x4xf32> to vector<8x1xf32>
    %83 = vector.broadcast %82 : vector<8x1xf32> to vector<8x16xf32>
    %84 = arith.mulf %81, %83 : vector<8x16xf32>
    %85 = vector.extract_strided_slice %75 {offsets = [0, 16], sizes = [8, 16], strides = [1, 1]} : vector<8x64xf32> to vector<8x16xf32>
    %86 = vector.extract_strided_slice %80 {offsets = [0, 1], sizes = [8, 1], strides = [1, 1]} : vector<8x4xf32> to vector<8x1xf32>
    %87 = vector.broadcast %86 : vector<8x1xf32> to vector<8x16xf32>
    %88 = arith.mulf %85, %87 : vector<8x16xf32>
    %89 = arith.addf %84, %88 : vector<8x16xf32>
    %90 = vector.extract_strided_slice %75 {offsets = [0, 32], sizes = [8, 16], strides = [1, 1]} : vector<8x64xf32> to vector<8x16xf32>
    %91 = vector.extract_strided_slice %80 {offsets = [0, 2], sizes = [8, 1], strides = [1, 1]} : vector<8x4xf32> to vector<8x1xf32>
    %92 = vector.broadcast %91 : vector<8x1xf32> to vector<8x16xf32>
    %93 = arith.mulf %90, %92 : vector<8x16xf32>
    %94 = arith.addf %89, %93 : vector<8x16xf32>
    %95 = vector.extract_strided_slice %75 {offsets = [0, 48], sizes = [8, 16], strides = [1, 1]} : vector<8x64xf32> to vector<8x16xf32>
    %96 = vector.extract_strided_slice %80 {offsets = [0, 3], sizes = [8, 1], strides = [1, 1]} : vector<8x4xf32> to vector<8x1xf32>
    %97 = vector.broadcast %96 : vector<8x1xf32> to vector<8x16xf32>
    %98 = arith.mulf %95, %97 : vector<8x16xf32>
    %99 = arith.addf %94, %98 : vector<8x16xf32>
    %cst_49 = arith.constant 2.000000e+00 : f32
    %100 = vector.broadcast %cst_49 : f32 to vector<8x16xf32>
    %101 = arith.mulf %100, %34 : vector<8x16xf32>
    %102 = arith.subf %101, %34 : vector<8x16xf32>
    %103 = vector.broadcast %78 : f32 to vector<8x16xf32>
    %104 = arith.mulf %74, %103 : vector<8x16xf32>
    %105 = arith.addf %102, %104 : vector<8x16xf32>
    %106 = arith.addf %105, %99 : vector<8x16xf32>
    %107 = arith.truncf %106 : vector<8x16xf32> to vector<8x16xbf16>
    %cst_50 = arith.constant dense<0.000000e+00> : vector<8x64xf32>
    %108 = tpu.matmul %107, %37, %cst_50 {dimension_numbers = #tpu.dot_dimension_numbers<[1], [0], [0], [1], [0, 0, 1, 1], [], []>} : vector<8x16xbf16>, vector<16x64xbf16>, vector<8x64xf32> -> vector<8x64xf32>
    %c0_51 = arith.constant 0 : index
    %c0_52 = arith.constant 0 : index
    %109 = vector.load %arg10[%c0_51, %c0_52] : memref<8x64xf32, #tpu.memory_space<vmem>>, vector<8x64xf32>
    %110 = vector.broadcast %77 : f32 to vector<8x64xf32>
    %111 = arith.mulf %110, %109 : vector<8x64xf32>
    %112 = arith.addf %108, %111 : vector<8x64xf32>
    %c0_53 = arith.constant 0 : index
    %c0_54 = arith.constant 0 : index
    %113 = vector.load %arg12[%c0_53, %c0_54] : memref<8x64xf32, #tpu.memory_space<vmem>>, vector<8x64xf32>
    %114 = arith.addf %112, %113 : vector<8x64xf32>
    %cst_55 = arith.constant 0.908999979 : f32
    %115 = vector.broadcast %cst_55 : f32 to vector<8x64xf32>
    %116 = arith.mulf %115, %114 : vector<8x64xf32>
    %117 = arith.negf %114 : vector<8x64xf32>
    %118 = math.exp %117 : vector<8x64xf32>
    %cst_56 = arith.constant 1.000000e+00 : f32
    %119 = vector.broadcast %cst_56 : f32 to vector<8x64xf32>
    %120 = arith.addf %119, %118 : vector<8x64xf32>
    %121 = arith.divf %119, %120 : vector<8x64xf32>
    %122 = arith.mulf %116, %121 : vector<8x64xf32>
    %123 = arith.truncf %122 : vector<8x64xf32> to vector<8x64xbf16>
    %cst_57 = arith.constant dense<0.000000e+00> : vector<8x64xf32>
    %124 = tpu.matmul %123, %38, %cst_57 {dimension_numbers = #tpu.dot_dimension_numbers<[1], [0], [0], [1], [0, 0, 1, 1], [], []>} : vector<8x64xbf16>, vector<64x64xbf16>, vector<8x64xf32> -> vector<8x64xf32>
    %c0_58 = arith.constant 0 : index
    %c0_59 = arith.constant 0 : index
    %125 = vector.load %arg14[%c0_58, %c0_59] : memref<8x64xf32, #tpu.memory_space<vmem>>, vector<8x64xf32>
    %126 = arith.addf %124, %125 : vector<8x64xf32>
    %cst_60 = arith.constant 0.908999979 : f32
    %127 = vector.broadcast %cst_60 : f32 to vector<8x64xf32>
    %128 = arith.mulf %127, %126 : vector<8x64xf32>
    %129 = arith.negf %126 : vector<8x64xf32>
    %130 = math.exp %129 : vector<8x64xf32>
    %cst_61 = arith.constant 1.000000e+00 : f32
    %131 = vector.broadcast %cst_61 : f32 to vector<8x64xf32>
    %132 = arith.addf %131, %130 : vector<8x64xf32>
    %133 = arith.divf %131, %132 : vector<8x64xf32>
    %134 = arith.mulf %128, %133 : vector<8x64xf32>
    %135 = arith.truncf %134 : vector<8x64xf32> to vector<8x64xbf16>
    %cst_62 = arith.constant dense<0.000000e+00> : vector<8x80xf32>
    %136 = tpu.matmul %135, %39, %cst_62 {dimension_numbers = #tpu.dot_dimension_numbers<[1], [0], [0], [1], [0, 0, 1, 1], [], []>} : vector<8x64xbf16>, vector<64x80xbf16>, vector<8x80xf32> -> vector<8x80xf32>
    %c0_63 = arith.constant 0 : index
    %c0_64 = arith.constant 0 : index
    %137 = vector.load %arg16[%c0_63, %c0_64] : memref<8x80xf32, #tpu.memory_space<vmem>>, vector<8x80xf32>
    %138 = arith.addf %136, %137 : vector<8x80xf32>
    %139 = math.tanh %138 : vector<8x80xf32>
    %140 = vector.extract_strided_slice %139 {offsets = [0, 0], sizes = [8, 16], strides = [1, 1]} : vector<8x80xf32> to vector<8x16xf32>
    %141 = vector.extract_strided_slice %139 {offsets = [0, 16], sizes = [8, 64], strides = [1, 1]} : vector<8x80xf32> to vector<8x64xf32>
    %142 = arith.addf %74, %140 : vector<8x16xf32>
    %cst_65 = arith.constant 5.000000e-01 : f32
    %143 = arith.mulf %cst_65, %78 : f32
    %144 = vector.broadcast %143 : f32 to vector<8x16xf32>
    %145 = arith.mulf %142, %144 : vector<8x16xf32>
    %146 = arith.addf %34, %145 : vector<8x16xf32>
    %147 = vector.extract_strided_slice %141 {offsets = [0, 0], sizes = [8, 16], strides = [1, 1]} : vector<8x64xf32> to vector<8x16xf32>
    %148 = vector.extract_strided_slice %80 {offsets = [0, 0], sizes = [8, 1], strides = [1, 1]} : vector<8x4xf32> to vector<8x1xf32>
    %149 = vector.broadcast %148 : vector<8x1xf32> to vector<8x16xf32>
    %150 = arith.mulf %147, %149 : vector<8x16xf32>
    %151 = vector.extract_strided_slice %141 {offsets = [0, 16], sizes = [8, 16], strides = [1, 1]} : vector<8x64xf32> to vector<8x16xf32>
    %152 = vector.extract_strided_slice %80 {offsets = [0, 1], sizes = [8, 1], strides = [1, 1]} : vector<8x4xf32> to vector<8x1xf32>
    %153 = vector.broadcast %152 : vector<8x1xf32> to vector<8x16xf32>
    %154 = arith.mulf %151, %153 : vector<8x16xf32>
    %155 = arith.addf %150, %154 : vector<8x16xf32>
    %156 = vector.extract_strided_slice %141 {offsets = [0, 32], sizes = [8, 16], strides = [1, 1]} : vector<8x64xf32> to vector<8x16xf32>
    %157 = vector.extract_strided_slice %80 {offsets = [0, 2], sizes = [8, 1], strides = [1, 1]} : vector<8x4xf32> to vector<8x1xf32>
    %158 = vector.broadcast %157 : vector<8x1xf32> to vector<8x16xf32>
    %159 = arith.mulf %156, %158 : vector<8x16xf32>
    %160 = arith.addf %155, %159 : vector<8x16xf32>
    %161 = vector.extract_strided_slice %141 {offsets = [0, 48], sizes = [8, 16], strides = [1, 1]} : vector<8x64xf32> to vector<8x16xf32>
    %162 = vector.extract_strided_slice %80 {offsets = [0, 3], sizes = [8, 1], strides = [1, 1]} : vector<8x4xf32> to vector<8x1xf32>
    %163 = vector.broadcast %162 : vector<8x1xf32> to vector<8x16xf32>
    %164 = arith.mulf %161, %163 : vector<8x16xf32>
    %165 = arith.addf %160, %164 : vector<8x16xf32>
    %166 = arith.addf %99, %165 : vector<8x16xf32>
    %cst_66 = arith.constant 5.000000e-01 : f32
    %167 = vector.broadcast %cst_66 : f32 to vector<8x16xf32>
    %168 = arith.mulf %167, %166 : vector<8x16xf32>
    %169 = arith.addf %146, %168 : vector<8x16xf32>
    %c8 = arith.constant 8 : index
    %c0_67 = arith.constant 0 : index
    %170 = vector.load %arg21[%c8, %c0_67] : memref<72x16xf32, #tpu.memory_space<vmem>>, vector<8x16xf32>
    tpu.vector_store %arg21[%c8, %c0_67], %169 {strides = array<i32>} : memref<72x16xf32, #tpu.memory_space<vmem>>, vector<8x16xf32>,
    %c1_68 = arith.constant 1 : index
    %171 = memref.load %arg1[%c1_68] : memref<9xf32, #tpu.memory_space<smem>>
    %c2 = arith.constant 2 : index
    %172 = memref.load %arg1[%c2] : memref<9xf32, #tpu.memory_space<smem>>
    %173 = arith.subf %172, %171 : f32
    %c1_69 = arith.constant 1 : index
    %c0_70 = arith.constant 0 : index
    %c0_71 = arith.constant 0 : index
    %174 = vector.load %arg3[%c1_69, %c0_70, %c0_71] : memref<8x8x4xf32, #tpu.memory_space<vmem>>, vector<1x8x4xf32>
    %175 = vector.shape_cast %174 : vector<1x8x4xf32> to vector<8x4xf32>
    %176 = vector.extract_strided_slice %141 {offsets = [0, 0], sizes = [8, 16], strides = [1, 1]} : vector<8x64xf32> to vector<8x16xf32>
    %177 = vector.extract_strided_slice %175 {offsets = [0, 0], sizes = [8, 1], strides = [1, 1]} : vector<8x4xf32> to vector<8x1xf32>
    %178 = vector.broadcast %177 : vector<8x1xf32> to vector<8x16xf32>
    %179 = arith.mulf %176, %178 : vector<8x16xf32>
    %180 = vector.extract_strided_slice %141 {offsets = [0, 16], sizes = [8, 16], strides = [1, 1]} : vector<8x64xf32> to vector<8x16xf32>
    %181 = vector.extract_strided_slice %175 {offsets = [0, 1], sizes = [8, 1], strides = [1, 1]} : vector<8x4xf32> to vector<8x1xf32>
    %182 = vector.broadcast %181 : vector<8x1xf32> to vector<8x16xf32>
    %183 = arith.mulf %180, %182 : vector<8x16xf32>
    %184 = arith.addf %179, %183 : vector<8x16xf32>
    %185 = vector.extract_strided_slice %141 {offsets = [0, 32], sizes = [8, 16], strides = [1, 1]} : vector<8x64xf32> to vector<8x16xf32>
    %186 = vector.extract_strided_slice %175 {offsets = [0, 2], sizes = [8, 1], strides = [1, 1]} : vector<8x4xf32> to vector<8x1xf32>
    %187 = vector.broadcast %186 : vector<8x1xf32> to vector<8x16xf32>
    %188 = arith.mulf %185, %187 : vector<8x16xf32>
    %189 = arith.addf %184, %188 : vector<8x16xf32>
    %190 = vector.extract_strided_slice %141 {offsets = [0, 48], sizes = [8, 16], strides = [1, 1]} : vector<8x64xf32> to vector<8x16xf32>
    %191 = vector.extract_strided_slice %175 {offsets = [0, 3], sizes = [8, 1], strides = [1, 1]} : vector<8x4xf32> to vector<8x1xf32>
    %192 = vector.broadcast %191 : vector<8x1xf32> to vector<8x16xf32>
    %193 = arith.mulf %190, %192 : vector<8x16xf32>
    %194 = arith.addf %189, %193 : vector<8x16xf32>
    %cst_72 = arith.constant 2.000000e+00 : f32
    %195 = vector.broadcast %cst_72 : f32 to vector<8x16xf32>
    %196 = arith.mulf %195, %169 : vector<8x16xf32>
    %197 = arith.subf %196, %106 : vector<8x16xf32>
    %198 = vector.broadcast %173 : f32 to vector<8x16xf32>
    %199 = arith.mulf %140, %198 : vector<8x16xf32>
    %200 = arith.addf %197, %199 : vector<8x16xf32>
    %201 = arith.addf %200, %194 : vector<8x16xf32>
    %202 = arith.truncf %201 : vector<8x16xf32> to vector<8x16xbf16>
    %cst_73 = arith.constant dense<0.000000e+00> : vector<8x64xf32>
    %203 = tpu.matmul %202, %37, %cst_73 {dimension_numbers = #tpu.dot_dimension_numbers<[1], [0], [0], [1], [0, 0, 1, 1], [], []>} : vector<8x16xbf16>, vector<16x64xbf16>, vector<8x64xf32> -> vector<8x64xf32>
    %c0_74 = arith.constant 0 : index
    %c0_75 = arith.constant 0 : index
    %204 = vector.load %arg10[%c0_74, %c0_75] : memref<8x64xf32, #tpu.memory_space<vmem>>, vector<8x64xf32>
    %205 = vector.broadcast %172 : f32 to vector<8x64xf32>
    %206 = arith.mulf %205, %204 : vector<8x64xf32>
    %207 = arith.addf %203, %206 : vector<8x64xf32>
    %c0_76 = arith.constant 0 : index
    %c0_77 = arith.constant 0 : index
    %208 = vector.load %arg12[%c0_76, %c0_77] : memref<8x64xf32, #tpu.memory_space<vmem>>, vector<8x64xf32>
    %209 = arith.addf %207, %208 : vector<8x64xf32>
    %cst_78 = arith.constant 0.908999979 : f32
    %210 = vector.broadcast %cst_78 : f32 to vector<8x64xf32>
    %211 = arith.mulf %210, %209 : vector<8x64xf32>
    %212 = arith.negf %209 : vector<8x64xf32>
    %213 = math.exp %212 : vector<8x64xf32>
    %cst_79 = arith.constant 1.000000e+00 : f32
    %214 = vector.broadcast %cst_79 : f32 to vector<8x64xf32>
    %215 = arith.addf %214, %213 : vector<8x64xf32>
    %216 = arith.divf %214, %215 : vector<8x64xf32>
    %217 = arith.mulf %211, %216 : vector<8x64xf32>
    %218 = arith.truncf %217 : vector<8x64xf32> to vector<8x64xbf16>
    %cst_80 = arith.constant dense<0.000000e+00> : vector<8x64xf32>
    %219 = tpu.matmul %218, %38, %cst_80 {dimension_numbers = #tpu.dot_dimension_numbers<[1], [0], [0], [1], [0, 0, 1, 1], [], []>} : vector<8x64xbf16>, vector<64x64xbf16>, vector<8x64xf32> -> vector<8x64xf32>
    %c0_81 = arith.constant 0 : index
    %c0_82 = arith.constant 0 : index
    %220 = vector.load %arg14[%c0_81, %c0_82] : memref<8x64xf32, #tpu.memory_space<vmem>>, vector<8x64xf32>
    %221 = arith.addf %219, %220 : vector<8x64xf32>
    %cst_83 = arith.constant 0.908999979 : f32
    %222 = vector.broadcast %cst_83 : f32 to vector<8x64xf32>
    %223 = arith.mulf %222, %221 : vector<8x64xf32>
    %224 = arith.negf %221 : vector<8x64xf32>
    %225 = math.exp %224 : vector<8x64xf32>
    %cst_84 = arith.constant 1.000000e+00 : f32
    %226 = vector.broadcast %cst_84 : f32 to vector<8x64xf32>
    %227 = arith.addf %226, %225 : vector<8x64xf32>
    %228 = arith.divf %226, %227 : vector<8x64xf32>
    %229 = arith.mulf %223, %228 : vector<8x64xf32>
    %230 = arith.truncf %229 : vector<8x64xf32> to vector<8x64xbf16>
    %cst_85 = arith.constant dense<0.000000e+00> : vector<8x80xf32>
    %231 = tpu.matmul %230, %39, %cst_85 {dimension_numbers = #tpu.dot_dimension_numbers<[1], [0], [0], [1], [0, 0, 1, 1], [], []>} : vector<8x64xbf16>, vector<64x80xbf16>, vector<8x80xf32> -> vector<8x80xf32>
    %c0_86 = arith.constant 0 : index
    %c0_87 = arith.constant 0 : index
    %232 = vector.load %arg16[%c0_86, %c0_87] : memref<8x80xf32, #tpu.memory_space<vmem>>, vector<8x80xf32>
    %233 = arith.addf %231, %232 : vector<8x80xf32>
    %234 = math.tanh %233 : vector<8x80xf32>
    %235 = vector.extract_strided_slice %234 {offsets = [0, 0], sizes = [8, 16], strides = [1, 1]} : vector<8x80xf32> to vector<8x16xf32>
    %236 = vector.extract_strided_slice %234 {offsets = [0, 16], sizes = [8, 64], strides = [1, 1]} : vector<8x80xf32> to vector<8x64xf32>
    %237 = arith.addf %140, %235 : vector<8x16xf32>
    %cst_88 = arith.constant 5.000000e-01 : f32
    %238 = arith.mulf %cst_88, %173 : f32
    %239 = vector.broadcast %238 : f32 to vector<8x16xf32>
    %240 = arith.mulf %237, %239 : vector<8x16xf32>
    %241 = arith.addf %169, %240 : vector<8x16xf32>
    %242 = vector.extract_strided_slice %236 {offsets = [0, 0], sizes = [8, 16], strides = [1, 1]} : vector<8x64xf32> to vector<8x16xf32>
    %243 = vector.extract_strided_slice %175 {offsets = [0, 0], sizes = [8, 1], strides = [1, 1]} : vector<8x4xf32> to vector<8x1xf32>
    %244 = vector.broadcast %243 : vector<8x1xf32> to vector<8x16xf32>
    %245 = arith.mulf %242, %244 : vector<8x16xf32>
    %246 = vector.extract_strided_slice %236 {offsets = [0, 16], sizes = [8, 16], strides = [1, 1]} : vector<8x64xf32> to vector<8x16xf32>
    %247 = vector.extract_strided_slice %175 {offsets = [0, 1], sizes = [8, 1], strides = [1, 1]} : vector<8x4xf32> to vector<8x1xf32>
    %248 = vector.broadcast %247 : vector<8x1xf32> to vector<8x16xf32>
    %249 = arith.mulf %246, %248 : vector<8x16xf32>
    %250 = arith.addf %245, %249 : vector<8x16xf32>
    %251 = vector.extract_strided_slice %236 {offsets = [0, 32], sizes = [8, 16], strides = [1, 1]} : vector<8x64xf32> to vector<8x16xf32>
    %252 = vector.extract_strided_slice %175 {offsets = [0, 2], sizes = [8, 1], strides = [1, 1]} : vector<8x4xf32> to vector<8x1xf32>
    %253 = vector.broadcast %252 : vector<8x1xf32> to vector<8x16xf32>
    %254 = arith.mulf %251, %253 : vector<8x16xf32>
    %255 = arith.addf %250, %254 : vector<8x16xf32>
    %256 = vector.extract_strided_slice %236 {offsets = [0, 48], sizes = [8, 16], strides = [1, 1]} : vector<8x64xf32> to vector<8x16xf32>
    %257 = vector.extract_strided_slice %175 {offsets = [0, 3], sizes = [8, 1], strides = [1, 1]} : vector<8x4xf32> to vector<8x1xf32>
    %258 = vector.broadcast %257 : vector<8x1xf32> to vector<8x16xf32>
    %259 = arith.mulf %256, %258 : vector<8x16xf32>
    %260 = arith.addf %255, %259 : vector<8x16xf32>
    %261 = arith.addf %194, %260 : vector<8x16xf32>
    %cst_89 = arith.constant 5.000000e-01 : f32
    %262 = vector.broadcast %cst_89 : f32 to vector<8x16xf32>
    %263 = arith.mulf %262, %261 : vector<8x16xf32>
    %264 = arith.addf %241, %263 : vector<8x16xf32>
    %c16 = arith.constant 16 : index
    %c0_90 = arith.constant 0 : index
    %265 = vector.load %arg21[%c16, %c0_90] : memref<72x16xf32, #tpu.memory_space<vmem>>, vector<8x16xf32>
    tpu.vector_store %arg21[%c16, %c0_90], %264 {strides = array<i32>} : memref<72x16xf32, #tpu.memory_space<vmem>>, vector<8x16xf32>,
    %c2_91 = arith.constant 2 : index
    %266 = memref.load %arg1[%c2_91] : memref<9xf32, #tpu.memory_space<smem>>
    %c3 = arith.constant 3 : index
    %267 = memref.load %arg1[%c3] : memref<9xf32, #tpu.memory_space<smem>>
    %268 = arith.subf %267, %266 : f32
    %c2_92 = arith.constant 2 : index
    %c0_93 = arith.constant 0 : index
    %c0_94 = arith.constant 0 : index
    %269 = vector.load %arg3[%c2_92, %c0_93, %c0_94] : memref<8x8x4xf32, #tpu.memory_space<vmem>>, vector<1x8x4xf32>
    %270 = vector.shape_cast %269 : vector<1x8x4xf32> to vector<8x4xf32>
    %271 = vector.extract_strided_slice %236 {offsets = [0, 0], sizes = [8, 16], strides = [1, 1]} : vector<8x64xf32> to vector<8x16xf32>
    %272 = vector.extract_strided_slice %270 {offsets = [0, 0], sizes = [8, 1], strides = [1, 1]} : vector<8x4xf32> to vector<8x1xf32>
    %273 = vector.broadcast %272 : vector<8x1xf32> to vector<8x16xf32>
    %274 = arith.mulf %271, %273 : vector<8x16xf32>
    %275 = vector.extract_strided_slice %236 {offsets = [0, 16], sizes = [8, 16], strides = [1, 1]} : vector<8x64xf32> to vector<8x16xf32>
    %276 = vector.extract_strided_slice %270 {offsets = [0, 1], sizes = [8, 1], strides = [1, 1]} : vector<8x4xf32> to vector<8x1xf32>
    %277 = vector.broadcast %276 : vector<8x1xf32> to vector<8x16xf32>
    %278 = arith.mulf %275, %277 : vector<8x16xf32>
    %279 = arith.addf %274, %278 : vector<8x16xf32>
    %280 = vector.extract_strided_slice %236 {offsets = [0, 32], sizes = [8, 16], strides = [1, 1]} : vector<8x64xf32> to vector<8x16xf32>
    %281 = vector.extract_strided_slice %270 {offsets = [0, 2], sizes = [8, 1], strides = [1, 1]} : vector<8x4xf32> to vector<8x1xf32>
    %282 = vector.broadcast %281 : vector<8x1xf32> to vector<8x16xf32>
    %283 = arith.mulf %280, %282 : vector<8x16xf32>
    %284 = arith.addf %279, %283 : vector<8x16xf32>
    %285 = vector.extract_strided_slice %236 {offsets = [0, 48], sizes = [8, 16], strides = [1, 1]} : vector<8x64xf32> to vector<8x16xf32>
    %286 = vector.extract_strided_slice %270 {offsets = [0, 3], sizes = [8, 1], strides = [1, 1]} : vector<8x4xf32> to vector<8x1xf32>
    %287 = vector.broadcast %286 : vector<8x1xf32> to vector<8x16xf32>
    %288 = arith.mulf %285, %287 : vector<8x16xf32>
    %289 = arith.addf %284, %288 : vector<8x16xf32>
    %cst_95 = arith.constant 2.000000e+00 : f32
    %290 = vector.broadcast %cst_95 : f32 to vector<8x16xf32>
    %291 = arith.mulf %290, %264 : vector<8x16xf32>
    %292 = arith.subf %291, %201 : vector<8x16xf32>
    %293 = vector.broadcast %268 : f32 to vector<8x16xf32>
    %294 = arith.mulf %235, %293 : vector<8x16xf32>
    %295 = arith.addf %292, %294 : vector<8x16xf32>
    %296 = arith.addf %295, %289 : vector<8x16xf32>
    %297 = arith.truncf %296 : vector<8x16xf32> to vector<8x16xbf16>
    %cst_96 = arith.constant dense<0.000000e+00> : vector<8x64xf32>
    %298 = tpu.matmul %297, %37, %cst_96 {dimension_numbers = #tpu.dot_dimension_numbers<[1], [0], [0], [1], [0, 0, 1, 1], [], []>} : vector<8x16xbf16>, vector<16x64xbf16>, vector<8x64xf32> -> vector<8x64xf32>
    %c0_97 = arith.constant 0 : index
    %c0_98 = arith.constant 0 : index
    %299 = vector.load %arg10[%c0_97, %c0_98] : memref<8x64xf32, #tpu.memory_space<vmem>>, vector<8x64xf32>
    %300 = vector.broadcast %267 : f32 to vector<8x64xf32>
    %301 = arith.mulf %300, %299 : vector<8x64xf32>
    %302 = arith.addf %298, %301 : vector<8x64xf32>
    %c0_99 = arith.constant 0 : index
    %c0_100 = arith.constant 0 : index
    %303 = vector.load %arg12[%c0_99, %c0_100] : memref<8x64xf32, #tpu.memory_space<vmem>>, vector<8x64xf32>
    %304 = arith.addf %302, %303 : vector<8x64xf32>
    %cst_101 = arith.constant 0.908999979 : f32
    %305 = vector.broadcast %cst_101 : f32 to vector<8x64xf32>
    %306 = arith.mulf %305, %304 : vector<8x64xf32>
    %307 = arith.negf %304 : vector<8x64xf32>
    %308 = math.exp %307 : vector<8x64xf32>
    %cst_102 = arith.constant 1.000000e+00 : f32
    %309 = vector.broadcast %cst_102 : f32 to vector<8x64xf32>
    %310 = arith.addf %309, %308 : vector<8x64xf32>
    %311 = arith.divf %309, %310 : vector<8x64xf32>
    %312 = arith.mulf %306, %311 : vector<8x64xf32>
    %313 = arith.truncf %312 : vector<8x64xf32> to vector<8x64xbf16>
    %cst_103 = arith.constant dense<0.000000e+00> : vector<8x64xf32>
    %314 = tpu.matmul %313, %38, %cst_103 {dimension_numbers = #tpu.dot_dimension_numbers<[1], [0], [0], [1], [0, 0, 1, 1], [], []>} : vector<8x64xbf16>, vector<64x64xbf16>, vector<8x64xf32> -> vector<8x64xf32>
    %c0_104 = arith.constant 0 : index
    %c0_105 = arith.constant 0 : index
    %315 = vector.load %arg14[%c0_104, %c0_105] : memref<8x64xf32, #tpu.memory_space<vmem>>, vector<8x64xf32>
    %316 = arith.addf %314, %315 : vector<8x64xf32>
    %cst_106 = arith.constant 0.908999979 : f32
    %317 = vector.broadcast %cst_106 : f32 to vector<8x64xf32>
    %318 = arith.mulf %317, %316 : vector<8x64xf32>
    %319 = arith.negf %316 : vector<8x64xf32>
    %320 = math.exp %319 : vector<8x64xf32>
    %cst_107 = arith.constant 1.000000e+00 : f32
    %321 = vector.broadcast %cst_107 : f32 to vector<8x64xf32>
    %322 = arith.addf %321, %320 : vector<8x64xf32>
    %323 = arith.divf %321, %322 : vector<8x64xf32>
    %324 = arith.mulf %318, %323 : vector<8x64xf32>
    %325 = arith.truncf %324 : vector<8x64xf32> to vector<8x64xbf16>
    %cst_108 = arith.constant dense<0.000000e+00> : vector<8x80xf32>
    %326 = tpu.matmul %325, %39, %cst_108 {dimension_numbers = #tpu.dot_dimension_numbers<[1], [0], [0], [1], [0, 0, 1, 1], [], []>} : vector<8x64xbf16>, vector<64x80xbf16>, vector<8x80xf32> -> vector<8x80xf32>
    %c0_109 = arith.constant 0 : index
    %c0_110 = arith.constant 0 : index
    %327 = vector.load %arg16[%c0_109, %c0_110] : memref<8x80xf32, #tpu.memory_space<vmem>>, vector<8x80xf32>
    %328 = arith.addf %326, %327 : vector<8x80xf32>
    %329 = math.tanh %328 : vector<8x80xf32>
    %330 = vector.extract_strided_slice %329 {offsets = [0, 0], sizes = [8, 16], strides = [1, 1]} : vector<8x80xf32> to vector<8x16xf32>
    %331 = vector.extract_strided_slice %329 {offsets = [0, 16], sizes = [8, 64], strides = [1, 1]} : vector<8x80xf32> to vector<8x64xf32>
    %332 = arith.addf %235, %330 : vector<8x16xf32>
    %cst_111 = arith.constant 5.000000e-01 : f32
    %333 = arith.mulf %cst_111, %268 : f32
    %334 = vector.broadcast %333 : f32 to vector<8x16xf32>
    %335 = arith.mulf %332, %334 : vector<8x16xf32>
    %336 = arith.addf %264, %335 : vector<8x16xf32>
    %337 = vector.extract_strided_slice %331 {offsets = [0, 0], sizes = [8, 16], strides = [1, 1]} : vector<8x64xf32> to vector<8x16xf32>
    %338 = vector.extract_strided_slice %270 {offsets = [0, 0], sizes = [8, 1], strides = [1, 1]} : vector<8x4xf32> to vector<8x1xf32>
    %339 = vector.broadcast %338 : vector<8x1xf32> to vector<8x16xf32>
    %340 = arith.mulf %337, %339 : vector<8x16xf32>
    %341 = vector.extract_strided_slice %331 {offsets = [0, 16], sizes = [8, 16], strides = [1, 1]} : vector<8x64xf32> to vector<8x16xf32>
    %342 = vector.extract_strided_slice %270 {offsets = [0, 1], sizes = [8, 1], strides = [1, 1]} : vector<8x4xf32> to vector<8x1xf32>
    %343 = vector.broadcast %342 : vector<8x1xf32> to vector<8x16xf32>
    %344 = arith.mulf %341, %343 : vector<8x16xf32>
    %345 = arith.addf %340, %344 : vector<8x16xf32>
    %346 = vector.extract_strided_slice %331 {offsets = [0, 32], sizes = [8, 16], strides = [1, 1]} : vector<8x64xf32> to vector<8x16xf32>
    %347 = vector.extract_strided_slice %270 {offsets = [0, 2], sizes = [8, 1], strides = [1, 1]} : vector<8x4xf32> to vector<8x1xf32>
    %348 = vector.broadcast %347 : vector<8x1xf32> to vector<8x16xf32>
    %349 = arith.mulf %346, %348 : vector<8x16xf32>
    %350 = arith.addf %345, %349 : vector<8x16xf32>
    %351 = vector.extract_strided_slice %331 {offsets = [0, 48], sizes = [8, 16], strides = [1, 1]} : vector<8x64xf32> to vector<8x16xf32>
    %352 = vector.extract_strided_slice %270 {offsets = [0, 3], sizes = [8, 1], strides = [1, 1]} : vector<8x4xf32> to vector<8x1xf32>
    %353 = vector.broadcast %352 : vector<8x1xf32> to vector<8x16xf32>
    %354 = arith.mulf %351, %353 : vector<8x16xf32>
    %355 = arith.addf %350, %354 : vector<8x16xf32>
    %356 = arith.addf %289, %355 : vector<8x16xf32>
    %cst_112 = arith.constant 5.000000e-01 : f32
    %357 = vector.broadcast %cst_112 : f32 to vector<8x16xf32>
    %358 = arith.mulf %357, %356 : vector<8x16xf32>
    %359 = arith.addf %336, %358 : vector<8x16xf32>
    %c24 = arith.constant 24 : index
    %c0_113 = arith.constant 0 : index
    %360 = vector.load %arg21[%c24, %c0_113] : memref<72x16xf32, #tpu.memory_space<vmem>>, vector<8x16xf32>
    tpu.vector_store %arg21[%c24, %c0_113], %359 {strides = array<i32>} : memref<72x16xf32, #tpu.memory_space<vmem>>, vector<8x16xf32>,
    %c3_114 = arith.constant 3 : index
    %361 = memref.load %arg1[%c3_114] : memref<9xf32, #tpu.memory_space<smem>>
    %c4 = arith.constant 4 : index
    %362 = memref.load %arg1[%c4] : memref<9xf32, #tpu.memory_space<smem>>
    %363 = arith.subf %362, %361 : f32
    %c3_115 = arith.constant 3 : index
    %c0_116 = arith.constant 0 : index
    %c0_117 = arith.constant 0 : index
    %364 = vector.load %arg3[%c3_115, %c0_116, %c0_117] : memref<8x8x4xf32, #tpu.memory_space<vmem>>, vector<1x8x4xf32>
    %365 = vector.shape_cast %364 : vector<1x8x4xf32> to vector<8x4xf32>
    %366 = vector.extract_strided_slice %331 {offsets = [0, 0], sizes = [8, 16], strides = [1, 1]} : vector<8x64xf32> to vector<8x16xf32>
    %367 = vector.extract_strided_slice %365 {offsets = [0, 0], sizes = [8, 1], strides = [1, 1]} : vector<8x4xf32> to vector<8x1xf32>
    %368 = vector.broadcast %367 : vector<8x1xf32> to vector<8x16xf32>
    %369 = arith.mulf %366, %368 : vector<8x16xf32>
    %370 = vector.extract_strided_slice %331 {offsets = [0, 16], sizes = [8, 16], strides = [1, 1]} : vector<8x64xf32> to vector<8x16xf32>
    %371 = vector.extract_strided_slice %365 {offsets = [0, 1], sizes = [8, 1], strides = [1, 1]} : vector<8x4xf32> to vector<8x1xf32>
    %372 = vector.broadcast %371 : vector<8x1xf32> to vector<8x16xf32>
    %373 = arith.mulf %370, %372 : vector<8x16xf32>
    %374 = arith.addf %369, %373 : vector<8x16xf32>
    %375 = vector.extract_strided_slice %331 {offsets = [0, 32], sizes = [8, 16], strides = [1, 1]} : vector<8x64xf32> to vector<8x16xf32>
    %376 = vector.extract_strided_slice %365 {offsets = [0, 2], sizes = [8, 1], strides = [1, 1]} : vector<8x4xf32> to vector<8x1xf32>
    %377 = vector.broadcast %376 : vector<8x1xf32> to vector<8x16xf32>
    %378 = arith.mulf %375, %377 : vector<8x16xf32>
    %379 = arith.addf %374, %378 : vector<8x16xf32>
    %380 = vector.extract_strided_slice %331 {offsets = [0, 48], sizes = [8, 16], strides = [1, 1]} : vector<8x64xf32> to vector<8x16xf32>
    %381 = vector.extract_strided_slice %365 {offsets = [0, 3], sizes = [8, 1], strides = [1, 1]} : vector<8x4xf32> to vector<8x1xf32>
    %382 = vector.broadcast %381 : vector<8x1xf32> to vector<8x16xf32>
    %383 = arith.mulf %380, %382 : vector<8x16xf32>
    %384 = arith.addf %379, %383 : vector<8x16xf32>
    %cst_118 = arith.constant 2.000000e+00 : f32
    %385 = vector.broadcast %cst_118 : f32 to vector<8x16xf32>
    %386 = arith.mulf %385, %359 : vector<8x16xf32>
    %387 = arith.subf %386, %296 : vector<8x16xf32>
    %388 = vector.broadcast %363 : f32 to vector<8x16xf32>
    %389 = arith.mulf %330, %388 : vector<8x16xf32>
    %390 = arith.addf %387, %389 : vector<8x16xf32>
    %391 = arith.addf %390, %384 : vector<8x16xf32>
    %392 = arith.truncf %391 : vector<8x16xf32> to vector<8x16xbf16>
    %cst_119 = arith.constant dense<0.000000e+00> : vector<8x64xf32>
    %393 = tpu.matmul %392, %37, %cst_119 {dimension_numbers = #tpu.dot_dimension_numbers<[1], [0], [0], [1], [0, 0, 1, 1], [], []>} : vector<8x16xbf16>, vector<16x64xbf16>, vector<8x64xf32> -> vector<8x64xf32>
    %c0_120 = arith.constant 0 : index
    %c0_121 = arith.constant 0 : index
    %394 = vector.load %arg10[%c0_120, %c0_121] : memref<8x64xf32, #tpu.memory_space<vmem>>, vector<8x64xf32>
    %395 = vector.broadcast %362 : f32 to vector<8x64xf32>
    %396 = arith.mulf %395, %394 : vector<8x64xf32>
    %397 = arith.addf %393, %396 : vector<8x64xf32>
    %c0_122 = arith.constant 0 : index
    %c0_123 = arith.constant 0 : index
    %398 = vector.load %arg12[%c0_122, %c0_123] : memref<8x64xf32, #tpu.memory_space<vmem>>, vector<8x64xf32>
    %399 = arith.addf %397, %398 : vector<8x64xf32>
    %cst_124 = arith.constant 0.908999979 : f32
    %400 = vector.broadcast %cst_124 : f32 to vector<8x64xf32>
    %401 = arith.mulf %400, %399 : vector<8x64xf32>
    %402 = arith.negf %399 : vector<8x64xf32>
    %403 = math.exp %402 : vector<8x64xf32>
    %cst_125 = arith.constant 1.000000e+00 : f32
    %404 = vector.broadcast %cst_125 : f32 to vector<8x64xf32>
    %405 = arith.addf %404, %403 : vector<8x64xf32>
    %406 = arith.divf %404, %405 : vector<8x64xf32>
    %407 = arith.mulf %401, %406 : vector<8x64xf32>
    %408 = arith.truncf %407 : vector<8x64xf32> to vector<8x64xbf16>
    %cst_126 = arith.constant dense<0.000000e+00> : vector<8x64xf32>
    %409 = tpu.matmul %408, %38, %cst_126 {dimension_numbers = #tpu.dot_dimension_numbers<[1], [0], [0], [1], [0, 0, 1, 1], [], []>} : vector<8x64xbf16>, vector<64x64xbf16>, vector<8x64xf32> -> vector<8x64xf32>
    %c0_127 = arith.constant 0 : index
    %c0_128 = arith.constant 0 : index
    %410 = vector.load %arg14[%c0_127, %c0_128] : memref<8x64xf32, #tpu.memory_space<vmem>>, vector<8x64xf32>
    %411 = arith.addf %409, %410 : vector<8x64xf32>
    %cst_129 = arith.constant 0.908999979 : f32
    %412 = vector.broadcast %cst_129 : f32 to vector<8x64xf32>
    %413 = arith.mulf %412, %411 : vector<8x64xf32>
    %414 = arith.negf %411 : vector<8x64xf32>
    %415 = math.exp %414 : vector<8x64xf32>
    %cst_130 = arith.constant 1.000000e+00 : f32
    %416 = vector.broadcast %cst_130 : f32 to vector<8x64xf32>
    %417 = arith.addf %416, %415 : vector<8x64xf32>
    %418 = arith.divf %416, %417 : vector<8x64xf32>
    %419 = arith.mulf %413, %418 : vector<8x64xf32>
    %420 = arith.truncf %419 : vector<8x64xf32> to vector<8x64xbf16>
    %cst_131 = arith.constant dense<0.000000e+00> : vector<8x80xf32>
    %421 = tpu.matmul %420, %39, %cst_131 {dimension_numbers = #tpu.dot_dimension_numbers<[1], [0], [0], [1], [0, 0, 1, 1], [], []>} : vector<8x64xbf16>, vector<64x80xbf16>, vector<8x80xf32> -> vector<8x80xf32>
    %c0_132 = arith.constant 0 : index
    %c0_133 = arith.constant 0 : index
    %422 = vector.load %arg16[%c0_132, %c0_133] : memref<8x80xf32, #tpu.memory_space<vmem>>, vector<8x80xf32>
    %423 = arith.addf %421, %422 : vector<8x80xf32>
    %424 = math.tanh %423 : vector<8x80xf32>
    %425 = vector.extract_strided_slice %424 {offsets = [0, 0], sizes = [8, 16], strides = [1, 1]} : vector<8x80xf32> to vector<8x16xf32>
    %426 = vector.extract_strided_slice %424 {offsets = [0, 16], sizes = [8, 64], strides = [1, 1]} : vector<8x80xf32> to vector<8x64xf32>
    %427 = arith.addf %330, %425 : vector<8x16xf32>
    %cst_134 = arith.constant 5.000000e-01 : f32
    %428 = arith.mulf %cst_134, %363 : f32
    %429 = vector.broadcast %428 : f32 to vector<8x16xf32>
    %430 = arith.mulf %427, %429 : vector<8x16xf32>
    %431 = arith.addf %359, %430 : vector<8x16xf32>
    %432 = vector.extract_strided_slice %426 {offsets = [0, 0], sizes = [8, 16], strides = [1, 1]} : vector<8x64xf32> to vector<8x16xf32>
    %433 = vector.extract_strided_slice %365 {offsets = [0, 0], sizes = [8, 1], strides = [1, 1]} : vector<8x4xf32> to vector<8x1xf32>
    %434 = vector.broadcast %433 : vector<8x1xf32> to vector<8x16xf32>
    %435 = arith.mulf %432, %434 : vector<8x16xf32>
    %436 = vector.extract_strided_slice %426 {offsets = [0, 16], sizes = [8, 16], strides = [1, 1]} : vector<8x64xf32> to vector<8x16xf32>
    %437 = vector.extract_strided_slice %365 {offsets = [0, 1], sizes = [8, 1], strides = [1, 1]} : vector<8x4xf32> to vector<8x1xf32>
    %438 = vector.broadcast %437 : vector<8x1xf32> to vector<8x16xf32>
    %439 = arith.mulf %436, %438 : vector<8x16xf32>
    %440 = arith.addf %435, %439 : vector<8x16xf32>
    %441 = vector.extract_strided_slice %426 {offsets = [0, 32], sizes = [8, 16], strides = [1, 1]} : vector<8x64xf32> to vector<8x16xf32>
    %442 = vector.extract_strided_slice %365 {offsets = [0, 2], sizes = [8, 1], strides = [1, 1]} : vector<8x4xf32> to vector<8x1xf32>
    %443 = vector.broadcast %442 : vector<8x1xf32> to vector<8x16xf32>
    %444 = arith.mulf %441, %443 : vector<8x16xf32>
    %445 = arith.addf %440, %444 : vector<8x16xf32>
    %446 = vector.extract_strided_slice %426 {offsets = [0, 48], sizes = [8, 16], strides = [1, 1]} : vector<8x64xf32> to vector<8x16xf32>
    %447 = vector.extract_strided_slice %365 {offsets = [0, 3], sizes = [8, 1], strides = [1, 1]} : vector<8x4xf32> to vector<8x1xf32>
    %448 = vector.broadcast %447 : vector<8x1xf32> to vector<8x16xf32>
    %449 = arith.mulf %446, %448 : vector<8x16xf32>
    %450 = arith.addf %445, %449 : vector<8x16xf32>
    %451 = arith.addf %384, %450 : vector<8x16xf32>
    %cst_135 = arith.constant 5.000000e-01 : f32
    %452 = vector.broadcast %cst_135 : f32 to vector<8x16xf32>
    %453 = arith.mulf %452, %451 : vector<8x16xf32>
    %454 = arith.addf %431, %453 : vector<8x16xf32>
    %c32 = arith.constant 32 : index
    %c0_136 = arith.constant 0 : index
    %455 = vector.load %arg21[%c32, %c0_136] : memref<72x16xf32, #tpu.memory_space<vmem>>, vector<8x16xf32>
    tpu.vector_store %arg21[%c32, %c0_136], %454 {strides = array<i32>} : memref<72x16xf32, #tpu.memory_space<vmem>>, vector<8x16xf32>,
    %c4_137 = arith.constant 4 : index
    %456 = memref.load %arg1[%c4_137] : memref<9xf32, #tpu.memory_space<smem>>
    %c5 = arith.constant 5 : index
    %457 = memref.load %arg1[%c5] : memref<9xf32, #tpu.memory_space<smem>>
    %458 = arith.subf %457, %456 : f32
    %c4_138 = arith.constant 4 : index
    %c0_139 = arith.constant 0 : index
    %c0_140 = arith.constant 0 : index
    %459 = vector.load %arg3[%c4_138, %c0_139, %c0_140] : memref<8x8x4xf32, #tpu.memory_space<vmem>>, vector<1x8x4xf32>
    %460 = vector.shape_cast %459 : vector<1x8x4xf32> to vector<8x4xf32>
    %461 = vector.extract_strided_slice %426 {offsets = [0, 0], sizes = [8, 16], strides = [1, 1]} : vector<8x64xf32> to vector<8x16xf32>
    %462 = vector.extract_strided_slice %460 {offsets = [0, 0], sizes = [8, 1], strides = [1, 1]} : vector<8x4xf32> to vector<8x1xf32>
    %463 = vector.broadcast %462 : vector<8x1xf32> to vector<8x16xf32>
    %464 = arith.mulf %461, %463 : vector<8x16xf32>
    %465 = vector.extract_strided_slice %426 {offsets = [0, 16], sizes = [8, 16], strides = [1, 1]} : vector<8x64xf32> to vector<8x16xf32>
    %466 = vector.extract_strided_slice %460 {offsets = [0, 1], sizes = [8, 1], strides = [1, 1]} : vector<8x4xf32> to vector<8x1xf32>
    %467 = vector.broadcast %466 : vector<8x1xf32> to vector<8x16xf32>
    %468 = arith.mulf %465, %467 : vector<8x16xf32>
    %469 = arith.addf %464, %468 : vector<8x16xf32>
    %470 = vector.extract_strided_slice %426 {offsets = [0, 32], sizes = [8, 16], strides = [1, 1]} : vector<8x64xf32> to vector<8x16xf32>
    %471 = vector.extract_strided_slice %460 {offsets = [0, 2], sizes = [8, 1], strides = [1, 1]} : vector<8x4xf32> to vector<8x1xf32>
    %472 = vector.broadcast %471 : vector<8x1xf32> to vector<8x16xf32>
    %473 = arith.mulf %470, %472 : vector<8x16xf32>
    %474 = arith.addf %469, %473 : vector<8x16xf32>
    %475 = vector.extract_strided_slice %426 {offsets = [0, 48], sizes = [8, 16], strides = [1, 1]} : vector<8x64xf32> to vector<8x16xf32>
    %476 = vector.extract_strided_slice %460 {offsets = [0, 3], sizes = [8, 1], strides = [1, 1]} : vector<8x4xf32> to vector<8x1xf32>
    %477 = vector.broadcast %476 : vector<8x1xf32> to vector<8x16xf32>
    %478 = arith.mulf %475, %477 : vector<8x16xf32>
    %479 = arith.addf %474, %478 : vector<8x16xf32>
    %cst_141 = arith.constant 2.000000e+00 : f32
    %480 = vector.broadcast %cst_141 : f32 to vector<8x16xf32>
    %481 = arith.mulf %480, %454 : vector<8x16xf32>
    %482 = arith.subf %481, %391 : vector<8x16xf32>
    %483 = vector.broadcast %458 : f32 to vector<8x16xf32>
    %484 = arith.mulf %425, %483 : vector<8x16xf32>
    %485 = arith.addf %482, %484 : vector<8x16xf32>
    %486 = arith.addf %485, %479 : vector<8x16xf32>
    %487 = arith.truncf %486 : vector<8x16xf32> to vector<8x16xbf16>
    %cst_142 = arith.constant dense<0.000000e+00> : vector<8x64xf32>
    %488 = tpu.matmul %487, %37, %cst_142 {dimension_numbers = #tpu.dot_dimension_numbers<[1], [0], [0], [1], [0, 0, 1, 1], [], []>} : vector<8x16xbf16>, vector<16x64xbf16>, vector<8x64xf32> -> vector<8x64xf32>
    %c0_143 = arith.constant 0 : index
    %c0_144 = arith.constant 0 : index
    %489 = vector.load %arg10[%c0_143, %c0_144] : memref<8x64xf32, #tpu.memory_space<vmem>>, vector<8x64xf32>
    %490 = vector.broadcast %457 : f32 to vector<8x64xf32>
    %491 = arith.mulf %490, %489 : vector<8x64xf32>
    %492 = arith.addf %488, %491 : vector<8x64xf32>
    %c0_145 = arith.constant 0 : index
    %c0_146 = arith.constant 0 : index
    %493 = vector.load %arg12[%c0_145, %c0_146] : memref<8x64xf32, #tpu.memory_space<vmem>>, vector<8x64xf32>
    %494 = arith.addf %492, %493 : vector<8x64xf32>
    %cst_147 = arith.constant 0.908999979 : f32
    %495 = vector.broadcast %cst_147 : f32 to vector<8x64xf32>
    %496 = arith.mulf %495, %494 : vector<8x64xf32>
    %497 = arith.negf %494 : vector<8x64xf32>
    %498 = math.exp %497 : vector<8x64xf32>
    %cst_148 = arith.constant 1.000000e+00 : f32
    %499 = vector.broadcast %cst_148 : f32 to vector<8x64xf32>
    %500 = arith.addf %499, %498 : vector<8x64xf32>
    %501 = arith.divf %499, %500 : vector<8x64xf32>
    %502 = arith.mulf %496, %501 : vector<8x64xf32>
    %503 = arith.truncf %502 : vector<8x64xf32> to vector<8x64xbf16>
    %cst_149 = arith.constant dense<0.000000e+00> : vector<8x64xf32>
    %504 = tpu.matmul %503, %38, %cst_149 {dimension_numbers = #tpu.dot_dimension_numbers<[1], [0], [0], [1], [0, 0, 1, 1], [], []>} : vector<8x64xbf16>, vector<64x64xbf16>, vector<8x64xf32> -> vector<8x64xf32>
    %c0_150 = arith.constant 0 : index
    %c0_151 = arith.constant 0 : index
    %505 = vector.load %arg14[%c0_150, %c0_151] : memref<8x64xf32, #tpu.memory_space<vmem>>, vector<8x64xf32>
    %506 = arith.addf %504, %505 : vector<8x64xf32>
    %cst_152 = arith.constant 0.908999979 : f32
    %507 = vector.broadcast %cst_152 : f32 to vector<8x64xf32>
    %508 = arith.mulf %507, %506 : vector<8x64xf32>
    %509 = arith.negf %506 : vector<8x64xf32>
    %510 = math.exp %509 : vector<8x64xf32>
    %cst_153 = arith.constant 1.000000e+00 : f32
    %511 = vector.broadcast %cst_153 : f32 to vector<8x64xf32>
    %512 = arith.addf %511, %510 : vector<8x64xf32>
    %513 = arith.divf %511, %512 : vector<8x64xf32>
    %514 = arith.mulf %508, %513 : vector<8x64xf32>
    %515 = arith.truncf %514 : vector<8x64xf32> to vector<8x64xbf16>
    %cst_154 = arith.constant dense<0.000000e+00> : vector<8x80xf32>
    %516 = tpu.matmul %515, %39, %cst_154 {dimension_numbers = #tpu.dot_dimension_numbers<[1], [0], [0], [1], [0, 0, 1, 1], [], []>} : vector<8x64xbf16>, vector<64x80xbf16>, vector<8x80xf32> -> vector<8x80xf32>
    %c0_155 = arith.constant 0 : index
    %c0_156 = arith.constant 0 : index
    %517 = vector.load %arg16[%c0_155, %c0_156] : memref<8x80xf32, #tpu.memory_space<vmem>>, vector<8x80xf32>
    %518 = arith.addf %516, %517 : vector<8x80xf32>
    %519 = math.tanh %518 : vector<8x80xf32>
    %520 = vector.extract_strided_slice %519 {offsets = [0, 0], sizes = [8, 16], strides = [1, 1]} : vector<8x80xf32> to vector<8x16xf32>
    %521 = vector.extract_strided_slice %519 {offsets = [0, 16], sizes = [8, 64], strides = [1, 1]} : vector<8x80xf32> to vector<8x64xf32>
    %522 = arith.addf %425, %520 : vector<8x16xf32>
    %cst_157 = arith.constant 5.000000e-01 : f32
    %523 = arith.mulf %cst_157, %458 : f32
    %524 = vector.broadcast %523 : f32 to vector<8x16xf32>
    %525 = arith.mulf %522, %524 : vector<8x16xf32>
    %526 = arith.addf %454, %525 : vector<8x16xf32>
    %527 = vector.extract_strided_slice %521 {offsets = [0, 0], sizes = [8, 16], strides = [1, 1]} : vector<8x64xf32> to vector<8x16xf32>
    %528 = vector.extract_strided_slice %460 {offsets = [0, 0], sizes = [8, 1], strides = [1, 1]} : vector<8x4xf32> to vector<8x1xf32>
    %529 = vector.broadcast %528 : vector<8x1xf32> to vector<8x16xf32>
    %530 = arith.mulf %527, %529 : vector<8x16xf32>
    %531 = vector.extract_strided_slice %521 {offsets = [0, 16], sizes = [8, 16], strides = [1, 1]} : vector<8x64xf32> to vector<8x16xf32>
    %532 = vector.extract_strided_slice %460 {offsets = [0, 1], sizes = [8, 1], strides = [1, 1]} : vector<8x4xf32> to vector<8x1xf32>
    %533 = vector.broadcast %532 : vector<8x1xf32> to vector<8x16xf32>
    %534 = arith.mulf %531, %533 : vector<8x16xf32>
    %535 = arith.addf %530, %534 : vector<8x16xf32>
    %536 = vector.extract_strided_slice %521 {offsets = [0, 32], sizes = [8, 16], strides = [1, 1]} : vector<8x64xf32> to vector<8x16xf32>
    %537 = vector.extract_strided_slice %460 {offsets = [0, 2], sizes = [8, 1], strides = [1, 1]} : vector<8x4xf32> to vector<8x1xf32>
    %538 = vector.broadcast %537 : vector<8x1xf32> to vector<8x16xf32>
    %539 = arith.mulf %536, %538 : vector<8x16xf32>
    %540 = arith.addf %535, %539 : vector<8x16xf32>
    %541 = vector.extract_strided_slice %521 {offsets = [0, 48], sizes = [8, 16], strides = [1, 1]} : vector<8x64xf32> to vector<8x16xf32>
    %542 = vector.extract_strided_slice %460 {offsets = [0, 3], sizes = [8, 1], strides = [1, 1]} : vector<8x4xf32> to vector<8x1xf32>
    %543 = vector.broadcast %542 : vector<8x1xf32> to vector<8x16xf32>
    %544 = arith.mulf %541, %543 : vector<8x16xf32>
    %545 = arith.addf %540, %544 : vector<8x16xf32>
    %546 = arith.addf %479, %545 : vector<8x16xf32>
    %cst_158 = arith.constant 5.000000e-01 : f32
    %547 = vector.broadcast %cst_158 : f32 to vector<8x16xf32>
    %548 = arith.mulf %547, %546 : vector<8x16xf32>
    %549 = arith.addf %526, %548 : vector<8x16xf32>
    %c40 = arith.constant 40 : index
    %c0_159 = arith.constant 0 : index
    %550 = vector.load %arg21[%c40, %c0_159] : memref<72x16xf32, #tpu.memory_space<vmem>>, vector<8x16xf32>
    tpu.vector_store %arg21[%c40, %c0_159], %549 {strides = array<i32>} : memref<72x16xf32, #tpu.memory_space<vmem>>, vector<8x16xf32>,
    %c5_160 = arith.constant 5 : index
    %551 = memref.load %arg1[%c5_160] : memref<9xf32, #tpu.memory_space<smem>>
    %c6 = arith.constant 6 : index
    %552 = memref.load %arg1[%c6] : memref<9xf32, #tpu.memory_space<smem>>
    %553 = arith.subf %552, %551 : f32
    %c5_161 = arith.constant 5 : index
    %c0_162 = arith.constant 0 : index
    %c0_163 = arith.constant 0 : index
    %554 = vector.load %arg3[%c5_161, %c0_162, %c0_163] : memref<8x8x4xf32, #tpu.memory_space<vmem>>, vector<1x8x4xf32>
    %555 = vector.shape_cast %554 : vector<1x8x4xf32> to vector<8x4xf32>
    %556 = vector.extract_strided_slice %521 {offsets = [0, 0], sizes = [8, 16], strides = [1, 1]} : vector<8x64xf32> to vector<8x16xf32>
    %557 = vector.extract_strided_slice %555 {offsets = [0, 0], sizes = [8, 1], strides = [1, 1]} : vector<8x4xf32> to vector<8x1xf32>
    %558 = vector.broadcast %557 : vector<8x1xf32> to vector<8x16xf32>
    %559 = arith.mulf %556, %558 : vector<8x16xf32>
    %560 = vector.extract_strided_slice %521 {offsets = [0, 16], sizes = [8, 16], strides = [1, 1]} : vector<8x64xf32> to vector<8x16xf32>
    %561 = vector.extract_strided_slice %555 {offsets = [0, 1], sizes = [8, 1], strides = [1, 1]} : vector<8x4xf32> to vector<8x1xf32>
    %562 = vector.broadcast %561 : vector<8x1xf32> to vector<8x16xf32>
    %563 = arith.mulf %560, %562 : vector<8x16xf32>
    %564 = arith.addf %559, %563 : vector<8x16xf32>
    %565 = vector.extract_strided_slice %521 {offsets = [0, 32], sizes = [8, 16], strides = [1, 1]} : vector<8x64xf32> to vector<8x16xf32>
    %566 = vector.extract_strided_slice %555 {offsets = [0, 2], sizes = [8, 1], strides = [1, 1]} : vector<8x4xf32> to vector<8x1xf32>
    %567 = vector.broadcast %566 : vector<8x1xf32> to vector<8x16xf32>
    %568 = arith.mulf %565, %567 : vector<8x16xf32>
    %569 = arith.addf %564, %568 : vector<8x16xf32>
    %570 = vector.extract_strided_slice %521 {offsets = [0, 48], sizes = [8, 16], strides = [1, 1]} : vector<8x64xf32> to vector<8x16xf32>
    %571 = vector.extract_strided_slice %555 {offsets = [0, 3], sizes = [8, 1], strides = [1, 1]} : vector<8x4xf32> to vector<8x1xf32>
    %572 = vector.broadcast %571 : vector<8x1xf32> to vector<8x16xf32>
    %573 = arith.mulf %570, %572 : vector<8x16xf32>
    %574 = arith.addf %569, %573 : vector<8x16xf32>
    %cst_164 = arith.constant 2.000000e+00 : f32
    %575 = vector.broadcast %cst_164 : f32 to vector<8x16xf32>
    %576 = arith.mulf %575, %549 : vector<8x16xf32>
    %577 = arith.subf %576, %486 : vector<8x16xf32>
    %578 = vector.broadcast %553 : f32 to vector<8x16xf32>
    %579 = arith.mulf %520, %578 : vector<8x16xf32>
    %580 = arith.addf %577, %579 : vector<8x16xf32>
    %581 = arith.addf %580, %574 : vector<8x16xf32>
    %582 = arith.truncf %581 : vector<8x16xf32> to vector<8x16xbf16>
    %cst_165 = arith.constant dense<0.000000e+00> : vector<8x64xf32>
    %583 = tpu.matmul %582, %37, %cst_165 {dimension_numbers = #tpu.dot_dimension_numbers<[1], [0], [0], [1], [0, 0, 1, 1], [], []>} : vector<8x16xbf16>, vector<16x64xbf16>, vector<8x64xf32> -> vector<8x64xf32>
    %c0_166 = arith.constant 0 : index
    %c0_167 = arith.constant 0 : index
    %584 = vector.load %arg10[%c0_166, %c0_167] : memref<8x64xf32, #tpu.memory_space<vmem>>, vector<8x64xf32>
    %585 = vector.broadcast %552 : f32 to vector<8x64xf32>
    %586 = arith.mulf %585, %584 : vector<8x64xf32>
    %587 = arith.addf %583, %586 : vector<8x64xf32>
    %c0_168 = arith.constant 0 : index
    %c0_169 = arith.constant 0 : index
    %588 = vector.load %arg12[%c0_168, %c0_169] : memref<8x64xf32, #tpu.memory_space<vmem>>, vector<8x64xf32>
    %589 = arith.addf %587, %588 : vector<8x64xf32>
    %cst_170 = arith.constant 0.908999979 : f32
    %590 = vector.broadcast %cst_170 : f32 to vector<8x64xf32>
    %591 = arith.mulf %590, %589 : vector<8x64xf32>
    %592 = arith.negf %589 : vector<8x64xf32>
    %593 = math.exp %592 : vector<8x64xf32>
    %cst_171 = arith.constant 1.000000e+00 : f32
    %594 = vector.broadcast %cst_171 : f32 to vector<8x64xf32>
    %595 = arith.addf %594, %593 : vector<8x64xf32>
    %596 = arith.divf %594, %595 : vector<8x64xf32>
    %597 = arith.mulf %591, %596 : vector<8x64xf32>
    %598 = arith.truncf %597 : vector<8x64xf32> to vector<8x64xbf16>
    %cst_172 = arith.constant dense<0.000000e+00> : vector<8x64xf32>
    %599 = tpu.matmul %598, %38, %cst_172 {dimension_numbers = #tpu.dot_dimension_numbers<[1], [0], [0], [1], [0, 0, 1, 1], [], []>} : vector<8x64xbf16>, vector<64x64xbf16>, vector<8x64xf32> -> vector<8x64xf32>
    %c0_173 = arith.constant 0 : index
    %c0_174 = arith.constant 0 : index
    %600 = vector.load %arg14[%c0_173, %c0_174] : memref<8x64xf32, #tpu.memory_space<vmem>>, vector<8x64xf32>
    %601 = arith.addf %599, %600 : vector<8x64xf32>
    %cst_175 = arith.constant 0.908999979 : f32
    %602 = vector.broadcast %cst_175 : f32 to vector<8x64xf32>
    %603 = arith.mulf %602, %601 : vector<8x64xf32>
    %604 = arith.negf %601 : vector<8x64xf32>
    %605 = math.exp %604 : vector<8x64xf32>
    %cst_176 = arith.constant 1.000000e+00 : f32
    %606 = vector.broadcast %cst_176 : f32 to vector<8x64xf32>
    %607 = arith.addf %606, %605 : vector<8x64xf32>
    %608 = arith.divf %606, %607 : vector<8x64xf32>
    %609 = arith.mulf %603, %608 : vector<8x64xf32>
    %610 = arith.truncf %609 : vector<8x64xf32> to vector<8x64xbf16>
    %cst_177 = arith.constant dense<0.000000e+00> : vector<8x80xf32>
    %611 = tpu.matmul %610, %39, %cst_177 {dimension_numbers = #tpu.dot_dimension_numbers<[1], [0], [0], [1], [0, 0, 1, 1], [], []>} : vector<8x64xbf16>, vector<64x80xbf16>, vector<8x80xf32> -> vector<8x80xf32>
    %c0_178 = arith.constant 0 : index
    %c0_179 = arith.constant 0 : index
    %612 = vector.load %arg16[%c0_178, %c0_179] : memref<8x80xf32, #tpu.memory_space<vmem>>, vector<8x80xf32>
    %613 = arith.addf %611, %612 : vector<8x80xf32>
    %614 = math.tanh %613 : vector<8x80xf32>
    %615 = vector.extract_strided_slice %614 {offsets = [0, 0], sizes = [8, 16], strides = [1, 1]} : vector<8x80xf32> to vector<8x16xf32>
    %616 = vector.extract_strided_slice %614 {offsets = [0, 16], sizes = [8, 64], strides = [1, 1]} : vector<8x80xf32> to vector<8x64xf32>
    %617 = arith.addf %520, %615 : vector<8x16xf32>
    %cst_180 = arith.constant 5.000000e-01 : f32
    %618 = arith.mulf %cst_180, %553 : f32
    %619 = vector.broadcast %618 : f32 to vector<8x16xf32>
    %620 = arith.mulf %617, %619 : vector<8x16xf32>
    %621 = arith.addf %549, %620 : vector<8x16xf32>
    %622 = vector.extract_strided_slice %616 {offsets = [0, 0], sizes = [8, 16], strides = [1, 1]} : vector<8x64xf32> to vector<8x16xf32>
    %623 = vector.extract_strided_slice %555 {offsets = [0, 0], sizes = [8, 1], strides = [1, 1]} : vector<8x4xf32> to vector<8x1xf32>
    %624 = vector.broadcast %623 : vector<8x1xf32> to vector<8x16xf32>
    %625 = arith.mulf %622, %624 : vector<8x16xf32>
    %626 = vector.extract_strided_slice %616 {offsets = [0, 16], sizes = [8, 16], strides = [1, 1]} : vector<8x64xf32> to vector<8x16xf32>
    %627 = vector.extract_strided_slice %555 {offsets = [0, 1], sizes = [8, 1], strides = [1, 1]} : vector<8x4xf32> to vector<8x1xf32>
    %628 = vector.broadcast %627 : vector<8x1xf32> to vector<8x16xf32>
    %629 = arith.mulf %626, %628 : vector<8x16xf32>
    %630 = arith.addf %625, %629 : vector<8x16xf32>
    %631 = vector.extract_strided_slice %616 {offsets = [0, 32], sizes = [8, 16], strides = [1, 1]} : vector<8x64xf32> to vector<8x16xf32>
    %632 = vector.extract_strided_slice %555 {offsets = [0, 2], sizes = [8, 1], strides = [1, 1]} : vector<8x4xf32> to vector<8x1xf32>
    %633 = vector.broadcast %632 : vector<8x1xf32> to vector<8x16xf32>
    %634 = arith.mulf %631, %633 : vector<8x16xf32>
    %635 = arith.addf %630, %634 : vector<8x16xf32>
    %636 = vector.extract_strided_slice %616 {offsets = [0, 48], sizes = [8, 16], strides = [1, 1]} : vector<8x64xf32> to vector<8x16xf32>
    %637 = vector.extract_strided_slice %555 {offsets = [0, 3], sizes = [8, 1], strides = [1, 1]} : vector<8x4xf32> to vector<8x1xf32>
    %638 = vector.broadcast %637 : vector<8x1xf32> to vector<8x16xf32>
    %639 = arith.mulf %636, %638 : vector<8x16xf32>
    %640 = arith.addf %635, %639 : vector<8x16xf32>
    %641 = arith.addf %574, %640 : vector<8x16xf32>
    %cst_181 = arith.constant 5.000000e-01 : f32
    %642 = vector.broadcast %cst_181 : f32 to vector<8x16xf32>
    %643 = arith.mulf %642, %641 : vector<8x16xf32>
    %644 = arith.addf %621, %643 : vector<8x16xf32>
    %c48 = arith.constant 48 : index
    %c0_182 = arith.constant 0 : index
    %645 = vector.load %arg21[%c48, %c0_182] : memref<72x16xf32, #tpu.memory_space<vmem>>, vector<8x16xf32>
    tpu.vector_store %arg21[%c48, %c0_182], %644 {strides = array<i32>} : memref<72x16xf32, #tpu.memory_space<vmem>>, vector<8x16xf32>,
    %c6_183 = arith.constant 6 : index
    %646 = memref.load %arg1[%c6_183] : memref<9xf32, #tpu.memory_space<smem>>
    %c7 = arith.constant 7 : index
    %647 = memref.load %arg1[%c7] : memref<9xf32, #tpu.memory_space<smem>>
    %648 = arith.subf %647, %646 : f32
    %c6_184 = arith.constant 6 : index
    %c0_185 = arith.constant 0 : index
    %c0_186 = arith.constant 0 : index
    %649 = vector.load %arg3[%c6_184, %c0_185, %c0_186] : memref<8x8x4xf32, #tpu.memory_space<vmem>>, vector<1x8x4xf32>
    %650 = vector.shape_cast %649 : vector<1x8x4xf32> to vector<8x4xf32>
    %651 = vector.extract_strided_slice %616 {offsets = [0, 0], sizes = [8, 16], strides = [1, 1]} : vector<8x64xf32> to vector<8x16xf32>
    %652 = vector.extract_strided_slice %650 {offsets = [0, 0], sizes = [8, 1], strides = [1, 1]} : vector<8x4xf32> to vector<8x1xf32>
    %653 = vector.broadcast %652 : vector<8x1xf32> to vector<8x16xf32>
    %654 = arith.mulf %651, %653 : vector<8x16xf32>
    %655 = vector.extract_strided_slice %616 {offsets = [0, 16], sizes = [8, 16], strides = [1, 1]} : vector<8x64xf32> to vector<8x16xf32>
    %656 = vector.extract_strided_slice %650 {offsets = [0, 1], sizes = [8, 1], strides = [1, 1]} : vector<8x4xf32> to vector<8x1xf32>
    %657 = vector.broadcast %656 : vector<8x1xf32> to vector<8x16xf32>
    %658 = arith.mulf %655, %657 : vector<8x16xf32>
    %659 = arith.addf %654, %658 : vector<8x16xf32>
    %660 = vector.extract_strided_slice %616 {offsets = [0, 32], sizes = [8, 16], strides = [1, 1]} : vector<8x64xf32> to vector<8x16xf32>
    %661 = vector.extract_strided_slice %650 {offsets = [0, 2], sizes = [8, 1], strides = [1, 1]} : vector<8x4xf32> to vector<8x1xf32>
    %662 = vector.broadcast %661 : vector<8x1xf32> to vector<8x16xf32>
    %663 = arith.mulf %660, %662 : vector<8x16xf32>
    %664 = arith.addf %659, %663 : vector<8x16xf32>
    %665 = vector.extract_strided_slice %616 {offsets = [0, 48], sizes = [8, 16], strides = [1, 1]} : vector<8x64xf32> to vector<8x16xf32>
    %666 = vector.extract_strided_slice %650 {offsets = [0, 3], sizes = [8, 1], strides = [1, 1]} : vector<8x4xf32> to vector<8x1xf32>
    %667 = vector.broadcast %666 : vector<8x1xf32> to vector<8x16xf32>
    %668 = arith.mulf %665, %667 : vector<8x16xf32>
    %669 = arith.addf %664, %668 : vector<8x16xf32>
    %cst_187 = arith.constant 2.000000e+00 : f32
    %670 = vector.broadcast %cst_187 : f32 to vector<8x16xf32>
    %671 = arith.mulf %670, %644 : vector<8x16xf32>
    %672 = arith.subf %671, %581 : vector<8x16xf32>
    %673 = vector.broadcast %648 : f32 to vector<8x16xf32>
    %674 = arith.mulf %615, %673 : vector<8x16xf32>
    %675 = arith.addf %672, %674 : vector<8x16xf32>
    %676 = arith.addf %675, %669 : vector<8x16xf32>
    %677 = arith.truncf %676 : vector<8x16xf32> to vector<8x16xbf16>
    %cst_188 = arith.constant dense<0.000000e+00> : vector<8x64xf32>
    %678 = tpu.matmul %677, %37, %cst_188 {dimension_numbers = #tpu.dot_dimension_numbers<[1], [0], [0], [1], [0, 0, 1, 1], [], []>} : vector<8x16xbf16>, vector<16x64xbf16>, vector<8x64xf32> -> vector<8x64xf32>
    %c0_189 = arith.constant 0 : index
    %c0_190 = arith.constant 0 : index
    %679 = vector.load %arg10[%c0_189, %c0_190] : memref<8x64xf32, #tpu.memory_space<vmem>>, vector<8x64xf32>
    %680 = vector.broadcast %647 : f32 to vector<8x64xf32>
    %681 = arith.mulf %680, %679 : vector<8x64xf32>
    %682 = arith.addf %678, %681 : vector<8x64xf32>
    %c0_191 = arith.constant 0 : index
    %c0_192 = arith.constant 0 : index
    %683 = vector.load %arg12[%c0_191, %c0_192] : memref<8x64xf32, #tpu.memory_space<vmem>>, vector<8x64xf32>
    %684 = arith.addf %682, %683 : vector<8x64xf32>
    %cst_193 = arith.constant 0.908999979 : f32
    %685 = vector.broadcast %cst_193 : f32 to vector<8x64xf32>
    %686 = arith.mulf %685, %684 : vector<8x64xf32>
    %687 = arith.negf %684 : vector<8x64xf32>
    %688 = math.exp %687 : vector<8x64xf32>
    %cst_194 = arith.constant 1.000000e+00 : f32
    %689 = vector.broadcast %cst_194 : f32 to vector<8x64xf32>
    %690 = arith.addf %689, %688 : vector<8x64xf32>
    %691 = arith.divf %689, %690 : vector<8x64xf32>
    %692 = arith.mulf %686, %691 : vector<8x64xf32>
    %693 = arith.truncf %692 : vector<8x64xf32> to vector<8x64xbf16>
    %cst_195 = arith.constant dense<0.000000e+00> : vector<8x64xf32>
    %694 = tpu.matmul %693, %38, %cst_195 {dimension_numbers = #tpu.dot_dimension_numbers<[1], [0], [0], [1], [0, 0, 1, 1], [], []>} : vector<8x64xbf16>, vector<64x64xbf16>, vector<8x64xf32> -> vector<8x64xf32>
    %c0_196 = arith.constant 0 : index
    %c0_197 = arith.constant 0 : index
    %695 = vector.load %arg14[%c0_196, %c0_197] : memref<8x64xf32, #tpu.memory_space<vmem>>, vector<8x64xf32>
    %696 = arith.addf %694, %695 : vector<8x64xf32>
    %cst_198 = arith.constant 0.908999979 : f32
    %697 = vector.broadcast %cst_198 : f32 to vector<8x64xf32>
    %698 = arith.mulf %697, %696 : vector<8x64xf32>
    %699 = arith.negf %696 : vector<8x64xf32>
    %700 = math.exp %699 : vector<8x64xf32>
    %cst_199 = arith.constant 1.000000e+00 : f32
    %701 = vector.broadcast %cst_199 : f32 to vector<8x64xf32>
    %702 = arith.addf %701, %700 : vector<8x64xf32>
    %703 = arith.divf %701, %702 : vector<8x64xf32>
    %704 = arith.mulf %698, %703 : vector<8x64xf32>
    %705 = arith.truncf %704 : vector<8x64xf32> to vector<8x64xbf16>
    %cst_200 = arith.constant dense<0.000000e+00> : vector<8x80xf32>
    %706 = tpu.matmul %705, %39, %cst_200 {dimension_numbers = #tpu.dot_dimension_numbers<[1], [0], [0], [1], [0, 0, 1, 1], [], []>} : vector<8x64xbf16>, vector<64x80xbf16>, vector<8x80xf32> -> vector<8x80xf32>
    %c0_201 = arith.constant 0 : index
    %c0_202 = arith.constant 0 : index
    %707 = vector.load %arg16[%c0_201, %c0_202] : memref<8x80xf32, #tpu.memory_space<vmem>>, vector<8x80xf32>
    %708 = arith.addf %706, %707 : vector<8x80xf32>
    %709 = math.tanh %708 : vector<8x80xf32>
    %710 = vector.extract_strided_slice %709 {offsets = [0, 0], sizes = [8, 16], strides = [1, 1]} : vector<8x80xf32> to vector<8x16xf32>
    %711 = vector.extract_strided_slice %709 {offsets = [0, 16], sizes = [8, 64], strides = [1, 1]} : vector<8x80xf32> to vector<8x64xf32>
    %712 = arith.addf %615, %710 : vector<8x16xf32>
    %cst_203 = arith.constant 5.000000e-01 : f32
    %713 = arith.mulf %cst_203, %648 : f32
    %714 = vector.broadcast %713 : f32 to vector<8x16xf32>
    %715 = arith.mulf %712, %714 : vector<8x16xf32>
    %716 = arith.addf %644, %715 : vector<8x16xf32>
    %717 = vector.extract_strided_slice %711 {offsets = [0, 0], sizes = [8, 16], strides = [1, 1]} : vector<8x64xf32> to vector<8x16xf32>
    %718 = vector.extract_strided_slice %650 {offsets = [0, 0], sizes = [8, 1], strides = [1, 1]} : vector<8x4xf32> to vector<8x1xf32>
    %719 = vector.broadcast %718 : vector<8x1xf32> to vector<8x16xf32>
    %720 = arith.mulf %717, %719 : vector<8x16xf32>
    %721 = vector.extract_strided_slice %711 {offsets = [0, 16], sizes = [8, 16], strides = [1, 1]} : vector<8x64xf32> to vector<8x16xf32>
    %722 = vector.extract_strided_slice %650 {offsets = [0, 1], sizes = [8, 1], strides = [1, 1]} : vector<8x4xf32> to vector<8x1xf32>
    %723 = vector.broadcast %722 : vector<8x1xf32> to vector<8x16xf32>
    %724 = arith.mulf %721, %723 : vector<8x16xf32>
    %725 = arith.addf %720, %724 : vector<8x16xf32>
    %726 = vector.extract_strided_slice %711 {offsets = [0, 32], sizes = [8, 16], strides = [1, 1]} : vector<8x64xf32> to vector<8x16xf32>
    %727 = vector.extract_strided_slice %650 {offsets = [0, 2], sizes = [8, 1], strides = [1, 1]} : vector<8x4xf32> to vector<8x1xf32>
    %728 = vector.broadcast %727 : vector<8x1xf32> to vector<8x16xf32>
    %729 = arith.mulf %726, %728 : vector<8x16xf32>
    %730 = arith.addf %725, %729 : vector<8x16xf32>
    %731 = vector.extract_strided_slice %711 {offsets = [0, 48], sizes = [8, 16], strides = [1, 1]} : vector<8x64xf32> to vector<8x16xf32>
    %732 = vector.extract_strided_slice %650 {offsets = [0, 3], sizes = [8, 1], strides = [1, 1]} : vector<8x4xf32> to vector<8x1xf32>
    %733 = vector.broadcast %732 : vector<8x1xf32> to vector<8x16xf32>
    %734 = arith.mulf %731, %733 : vector<8x16xf32>
    %735 = arith.addf %730, %734 : vector<8x16xf32>
    %736 = arith.addf %669, %735 : vector<8x16xf32>
    %cst_204 = arith.constant 5.000000e-01 : f32
    %737 = vector.broadcast %cst_204 : f32 to vector<8x16xf32>
    %738 = arith.mulf %737, %736 : vector<8x16xf32>
    %739 = arith.addf %716, %738 : vector<8x16xf32>
    %c56 = arith.constant 56 : index
    %c0_205 = arith.constant 0 : index
    %740 = vector.load %arg21[%c56, %c0_205] : memref<72x16xf32, #tpu.memory_space<vmem>>, vector<8x16xf32>
    tpu.vector_store %arg21[%c56, %c0_205], %739 {strides = array<i32>} : memref<72x16xf32, #tpu.memory_space<vmem>>, vector<8x16xf32>,
    %c7_206 = arith.constant 7 : index
    %741 = memref.load %arg1[%c7_206] : memref<9xf32, #tpu.memory_space<smem>>
    %c8_207 = arith.constant 8 : index
    %742 = memref.load %arg1[%c8_207] : memref<9xf32, #tpu.memory_space<smem>>
    %743 = arith.subf %742, %741 : f32
    %c7_208 = arith.constant 7 : index
    %c0_209 = arith.constant 0 : index
    %c0_210 = arith.constant 0 : index
    %744 = vector.load %arg3[%c7_208, %c0_209, %c0_210] : memref<8x8x4xf32, #tpu.memory_space<vmem>>, vector<1x8x4xf32>
    %745 = vector.shape_cast %744 : vector<1x8x4xf32> to vector<8x4xf32>
    %746 = vector.extract_strided_slice %711 {offsets = [0, 0], sizes = [8, 16], strides = [1, 1]} : vector<8x64xf32> to vector<8x16xf32>
    %747 = vector.extract_strided_slice %745 {offsets = [0, 0], sizes = [8, 1], strides = [1, 1]} : vector<8x4xf32> to vector<8x1xf32>
    %748 = vector.broadcast %747 : vector<8x1xf32> to vector<8x16xf32>
    %749 = arith.mulf %746, %748 : vector<8x16xf32>
    %750 = vector.extract_strided_slice %711 {offsets = [0, 16], sizes = [8, 16], strides = [1, 1]} : vector<8x64xf32> to vector<8x16xf32>
    %751 = vector.extract_strided_slice %745 {offsets = [0, 1], sizes = [8, 1], strides = [1, 1]} : vector<8x4xf32> to vector<8x1xf32>
    %752 = vector.broadcast %751 : vector<8x1xf32> to vector<8x16xf32>
    %753 = arith.mulf %750, %752 : vector<8x16xf32>
    %754 = arith.addf %749, %753 : vector<8x16xf32>
    %755 = vector.extract_strided_slice %711 {offsets = [0, 32], sizes = [8, 16], strides = [1, 1]} : vector<8x64xf32> to vector<8x16xf32>
    %756 = vector.extract_strided_slice %745 {offsets = [0, 2], sizes = [8, 1], strides = [1, 1]} : vector<8x4xf32> to vector<8x1xf32>
    %757 = vector.broadcast %756 : vector<8x1xf32> to vector<8x16xf32>
    %758 = arith.mulf %755, %757 : vector<8x16xf32>
    %759 = arith.addf %754, %758 : vector<8x16xf32>
    %760 = vector.extract_strided_slice %711 {offsets = [0, 48], sizes = [8, 16], strides = [1, 1]} : vector<8x64xf32> to vector<8x16xf32>
    %761 = vector.extract_strided_slice %745 {offsets = [0, 3], sizes = [8, 1], strides = [1, 1]} : vector<8x4xf32> to vector<8x1xf32>
    %762 = vector.broadcast %761 : vector<8x1xf32> to vector<8x16xf32>
    %763 = arith.mulf %760, %762 : vector<8x16xf32>
    %764 = arith.addf %759, %763 : vector<8x16xf32>
    %cst_211 = arith.constant 2.000000e+00 : f32
    %765 = vector.broadcast %cst_211 : f32 to vector<8x16xf32>
    %766 = arith.mulf %765, %739 : vector<8x16xf32>
    %767 = arith.subf %766, %676 : vector<8x16xf32>
    %768 = vector.broadcast %743 : f32 to vector<8x16xf32>
    %769 = arith.mulf %710, %768 : vector<8x16xf32>
    %770 = arith.addf %767, %769 : vector<8x16xf32>
    %771 = arith.addf %770, %764 : vector<8x16xf32>
    %772 = arith.truncf %771 : vector<8x16xf32> to vector<8x16xbf16>
    %cst_212 = arith.constant dense<0.000000e+00> : vector<8x64xf32>
    %773 = tpu.matmul %772, %37, %cst_212 {dimension_numbers = #tpu.dot_dimension_numbers<[1], [0], [0], [1], [0, 0, 1, 1], [], []>} : vector<8x16xbf16>, vector<16x64xbf16>, vector<8x64xf32> -> vector<8x64xf32>
    %c0_213 = arith.constant 0 : index
    %c0_214 = arith.constant 0 : index
    %774 = vector.load %arg10[%c0_213, %c0_214] : memref<8x64xf32, #tpu.memory_space<vmem>>, vector<8x64xf32>
    %775 = vector.broadcast %742 : f32 to vector<8x64xf32>
    %776 = arith.mulf %775, %774 : vector<8x64xf32>
    %777 = arith.addf %773, %776 : vector<8x64xf32>
    %c0_215 = arith.constant 0 : index
    %c0_216 = arith.constant 0 : index
    %778 = vector.load %arg12[%c0_215, %c0_216] : memref<8x64xf32, #tpu.memory_space<vmem>>, vector<8x64xf32>
    %779 = arith.addf %777, %778 : vector<8x64xf32>
    %cst_217 = arith.constant 0.908999979 : f32
    %780 = vector.broadcast %cst_217 : f32 to vector<8x64xf32>
    %781 = arith.mulf %780, %779 : vector<8x64xf32>
    %782 = arith.negf %779 : vector<8x64xf32>
    %783 = math.exp %782 : vector<8x64xf32>
    %cst_218 = arith.constant 1.000000e+00 : f32
    %784 = vector.broadcast %cst_218 : f32 to vector<8x64xf32>
    %785 = arith.addf %784, %783 : vector<8x64xf32>
    %786 = arith.divf %784, %785 : vector<8x64xf32>
    %787 = arith.mulf %781, %786 : vector<8x64xf32>
    %788 = arith.truncf %787 : vector<8x64xf32> to vector<8x64xbf16>
    %cst_219 = arith.constant dense<0.000000e+00> : vector<8x64xf32>
    %789 = tpu.matmul %788, %38, %cst_219 {dimension_numbers = #tpu.dot_dimension_numbers<[1], [0], [0], [1], [0, 0, 1, 1], [], []>} : vector<8x64xbf16>, vector<64x64xbf16>, vector<8x64xf32> -> vector<8x64xf32>
    %c0_220 = arith.constant 0 : index
    %c0_221 = arith.constant 0 : index
    %790 = vector.load %arg14[%c0_220, %c0_221] : memref<8x64xf32, #tpu.memory_space<vmem>>, vector<8x64xf32>
    %791 = arith.addf %789, %790 : vector<8x64xf32>
    %cst_222 = arith.constant 0.908999979 : f32
    %792 = vector.broadcast %cst_222 : f32 to vector<8x64xf32>
    %793 = arith.mulf %792, %791 : vector<8x64xf32>
    %794 = arith.negf %791 : vector<8x64xf32>
    %795 = math.exp %794 : vector<8x64xf32>
    %cst_223 = arith.constant 1.000000e+00 : f32
    %796 = vector.broadcast %cst_223 : f32 to vector<8x64xf32>
    %797 = arith.addf %796, %795 : vector<8x64xf32>
    %798 = arith.divf %796, %797 : vector<8x64xf32>
    %799 = arith.mulf %793, %798 : vector<8x64xf32>
    %800 = arith.truncf %799 : vector<8x64xf32> to vector<8x64xbf16>
    %cst_224 = arith.constant dense<0.000000e+00> : vector<8x80xf32>
    %801 = tpu.matmul %800, %39, %cst_224 {dimension_numbers = #tpu.dot_dimension_numbers<[1], [0], [0], [1], [0, 0, 1, 1], [], []>} : vector<8x64xbf16>, vector<64x80xbf16>, vector<8x80xf32> -> vector<8x80xf32>
    %c0_225 = arith.constant 0 : index
    %c0_226 = arith.constant 0 : index
    %802 = vector.load %arg16[%c0_225, %c0_226] : memref<8x80xf32, #tpu.memory_space<vmem>>, vector<8x80xf32>
    %803 = arith.addf %801, %802 : vector<8x80xf32>
    %804 = math.tanh %803 : vector<8x80xf32>
    %805 = vector.extract_strided_slice %804 {offsets = [0, 0], sizes = [8, 16], strides = [1, 1]} : vector<8x80xf32> to vector<8x16xf32>
    %806 = vector.extract_strided_slice %804 {offsets = [0, 16], sizes = [8, 64], strides = [1, 1]} : vector<8x80xf32> to vector<8x64xf32>
    %807 = arith.addf %710, %805 : vector<8x16xf32>
    %cst_227 = arith.constant 5.000000e-01 : f32
    %808 = arith.mulf %cst_227, %743 : f32
    %809 = vector.broadcast %808 : f32 to vector<8x16xf32>
    %810 = arith.mulf %807, %809 : vector<8x16xf32>
    %811 = arith.addf %739, %810 : vector<8x16xf32>
    %812 = vector.extract_strided_slice %806 {offsets = [0, 0], sizes = [8, 16], strides = [1, 1]} : vector<8x64xf32> to vector<8x16xf32>
    %813 = vector.extract_strided_slice %745 {offsets = [0, 0], sizes = [8, 1], strides = [1, 1]} : vector<8x4xf32> to vector<8x1xf32>
    %814 = vector.broadcast %813 : vector<8x1xf32> to vector<8x16xf32>
    %815 = arith.mulf %812, %814 : vector<8x16xf32>
    %816 = vector.extract_strided_slice %806 {offsets = [0, 16], sizes = [8, 16], strides = [1, 1]} : vector<8x64xf32> to vector<8x16xf32>
    %817 = vector.extract_strided_slice %745 {offsets = [0, 1], sizes = [8, 1], strides = [1, 1]} : vector<8x4xf32> to vector<8x1xf32>
    %818 = vector.broadcast %817 : vector<8x1xf32> to vector<8x16xf32>
    %819 = arith.mulf %816, %818 : vector<8x16xf32>
    %820 = arith.addf %815, %819 : vector<8x16xf32>
    %821 = vector.extract_strided_slice %806 {offsets = [0, 32], sizes = [8, 16], strides = [1, 1]} : vector<8x64xf32> to vector<8x16xf32>
    %822 = vector.extract_strided_slice %745 {offsets = [0, 2], sizes = [8, 1], strides = [1, 1]} : vector<8x4xf32> to vector<8x1xf32>
    %823 = vector.broadcast %822 : vector<8x1xf32> to vector<8x16xf32>
    %824 = arith.mulf %821, %823 : vector<8x16xf32>
    %825 = arith.addf %820, %824 : vector<8x16xf32>
    %826 = vector.extract_strided_slice %806 {offsets = [0, 48], sizes = [8, 16], strides = [1, 1]} : vector<8x64xf32> to vector<8x16xf32>
    %827 = vector.extract_strided_slice %745 {offsets = [0, 3], sizes = [8, 1], strides = [1, 1]} : vector<8x4xf32> to vector<8x1xf32>
    %828 = vector.broadcast %827 : vector<8x1xf32> to vector<8x16xf32>
    %829 = arith.mulf %826, %828 : vector<8x16xf32>
    %830 = arith.addf %825, %829 : vector<8x16xf32>
    %831 = arith.addf %764, %830 : vector<8x16xf32>
    %cst_228 = arith.constant 5.000000e-01 : f32
    %832 = vector.broadcast %cst_228 : f32 to vector<8x16xf32>
    %833 = arith.mulf %832, %831 : vector<8x16xf32>
    %834 = arith.addf %811, %833 : vector<8x16xf32>
    %c64 = arith.constant 64 : index
    %c0_229 = arith.constant 0 : index
    %835 = vector.load %arg21[%c64, %c0_229] : memref<72x16xf32, #tpu.memory_space<vmem>>, vector<8x16xf32>
    tpu.vector_store %arg21[%c64, %c0_229], %834 {strides = array<i32>} : memref<72x16xf32, #tpu.memory_space<vmem>>, vector<8x16xf32>,
    %c0_230 = arith.constant 0 : index
    %c0_231 = arith.constant 0 : index
    %836 = vector.load %arg21[%c0_230, %c0_231] : memref<72x16xf32, #tpu.memory_space<vmem>>, vector<72x16xf32>
    %837 = arith.truncf %836 : vector<72x16xf32> to vector<72x16xbf16>
    %c0_232 = arith.constant 0 : index
    %c0_233 = arith.constant 0 : index
    %838 = vector.load %arg17[%c0_232, %c0_233] : memref<16x4xbf16, #tpu.memory_space<vmem>>, vector<16x4xbf16>
    %cst_234 = arith.constant dense<0.000000e+00> : vector<72x4xf32>
    %839 = tpu.matmul %837, %838, %cst_234 {dimension_numbers = #tpu.dot_dimension_numbers<[1], [0], [0], [1], [0, 0, 1, 1], [], []>} : vector<72x16xbf16>, vector<16x4xbf16>, vector<72x4xf32> -> vector<72x4xf32>
    %c0_235 = arith.constant 0 : index
    %c0_236 = arith.constant 0 : index
    %840 = vector.load %arg18[%c0_235, %c0_236] : memref<1x4xf32, #tpu.memory_space<vmem>>, vector<1x4xf32>
    %841 = vector.broadcast %840 : vector<1x4xf32> to vector<72x4xf32>
    %842 = arith.addf %839, %841 : vector<72x4xf32>
    %c0_237 = arith.constant 0 : index
    %c0_238 = arith.constant 0 : index
    %843 = vector.load %arg19[%c0_237, %c0_238] : memref<72x4xf32, #tpu.memory_space<vmem>>, vector<72x4xf32>
    tpu.vector_store %arg19[%c0_237, %c0_238], %842 {strides = array<i32>} : memref<72x4xf32, #tpu.memory_space<vmem>>, vector<72x4xf32>,
    return
  }
  func.func @transform_0(%arg0: i32, %arg1: memref<9xf32, #tpu.memory_space<smem>>) -> (i32, i32) {
    %c0_i32 = arith.constant 0 : i32
    %c0_i32_0 = arith.constant 0 : i32
    return %arg0, %c0_i32 : i32, i32
  }
  func.func @transform_1(%arg0: i32, %arg1: memref<9xf32, #tpu.memory_space<smem>>) -> (i32, i32, i32) {
    %c0_i32 = arith.constant 0 : i32
    %c0_i32_0 = arith.constant 0 : i32
    %c0_i32_1 = arith.constant 0 : i32
    return %c0_i32, %arg0, %c0_i32_0 : i32, i32, i32
  }
  func.func @transform_2(%arg0: i32, %arg1: memref<9xf32, #tpu.memory_space<smem>>) -> (i32, i32) {
    %c0_i32 = arith.constant 0 : i32
    %c0_i32_0 = arith.constant 0 : i32
    %c0_i32_1 = arith.constant 0 : i32
    return %c0_i32, %c0_i32_0 : i32, i32
  }
  func.func @transform_3(%arg0: i32, %arg1: memref<9xf32, #tpu.memory_space<smem>>) -> (i32, i32) {
    %c0_i32 = arith.constant 0 : i32
    %c0_i32_0 = arith.constant 0 : i32
    %c0_i32_1 = arith.constant 0 : i32
    return %c0_i32, %c0_i32_0 : i32, i32
  }
  func.func @transform_4(%arg0: i32, %arg1: memref<9xf32, #tpu.memory_space<smem>>) -> (i32, i32) {
    %c0_i32 = arith.constant 0 : i32
    %c0_i32_0 = arith.constant 0 : i32
    %c0_i32_1 = arith.constant 0 : i32
    return %c0_i32, %c0_i32_0 : i32, i32
  }
  func.func @transform_5(%arg0: i32, %arg1: memref<9xf32, #tpu.memory_space<smem>>) -> (i32, i32) {
    %c0_i32 = arith.constant 0 : i32
    %c0_i32_0 = arith.constant 0 : i32
    %c0_i32_1 = arith.constant 0 : i32
    return %c0_i32, %c0_i32_0 : i32, i32
  }
  func.func @transform_6(%arg0: i32, %arg1: memref<9xf32, #tpu.memory_space<smem>>) -> (i32, i32) {
    %c0_i32 = arith.constant 0 : i32
    %c0_i32_0 = arith.constant 0 : i32
    %c0_i32_1 = arith.constant 0 : i32
    return %c0_i32, %c0_i32_0 : i32, i32
  }
  func.func @transform_7(%arg0: i32, %arg1: memref<9xf32, #tpu.memory_space<smem>>) -> (i32, i32) {
    %c0_i32 = arith.constant 0 : i32
    %c0_i32_0 = arith.constant 0 : i32
    %c0_i32_1 = arith.constant 0 : i32
    return %c0_i32, %c0_i32_0 : i32, i32
  }
  func.func @transform_8(%arg0: i32, %arg1: memref<9xf32, #tpu.memory_space<smem>>) -> (i32, i32) {
    %c0_i32 = arith.constant 0 : i32
    %c0_i32_0 = arith.constant 0 : i32
    %c0_i32_1 = arith.constant 0 : i32
    return %c0_i32, %c0_i32_0 : i32, i32
  }
  func.func @transform_9(%arg0: i32, %arg1: memref<9xf32, #tpu.memory_space<smem>>) -> (i32, i32) {
    %c0_i32 = arith.constant 0 : i32
    %c0_i32_0 = arith.constant 0 : i32
    %c0_i32_1 = arith.constant 0 : i32
    return %c0_i32, %c0_i32_0 : i32, i32
  }
  func.func @transform_10(%arg0: i32, %arg1: memref<9xf32, #tpu.memory_space<smem>>) -> (i32, i32) {
    %c0_i32 = arith.constant 0 : i32
    %c0_i32_0 = arith.constant 0 : i32
    %c0_i32_1 = arith.constant 0 : i32
    return %c0_i32, %c0_i32_0 : i32, i32
  }
  func.func @transform_11(%arg0: i32, %arg1: memref<9xf32, #tpu.memory_space<smem>>) -> (i32, i32) {
    %c0_i32 = arith.constant 0 : i32
    %c0_i32_0 = arith.constant 0 : i32
    %c0_i32_1 = arith.constant 0 : i32
    return %c0_i32, %c0_i32_0 : i32, i32
  }
  func.func @transform_12(%arg0: i32, %arg1: memref<9xf32, #tpu.memory_space<smem>>) -> (i32, i32) {
    %c0_i32 = arith.constant 0 : i32
    %c0_i32_0 = arith.constant 0 : i32
    %c0_i32_1 = arith.constant 0 : i32
    return %c0_i32, %c0_i32_0 : i32, i32
  }
  func.func @transform_13(%arg0: i32, %arg1: memref<9xf32, #tpu.memory_space<smem>>) -> (i32, i32) {
    %c0_i32 = arith.constant 0 : i32
    %c0_i32_0 = arith.constant 0 : i32
    %c0_i32_1 = arith.constant 0 : i32
    return %c0_i32, %c0_i32_0 : i32, i32
  }
  func.func @transform_14(%arg0: i32, %arg1: memref<9xf32, #tpu.memory_space<smem>>) -> (i32, i32) {
    %c0_i32 = arith.constant 0 : i32
    %c0_i32_0 = arith.constant 0 : i32
    %c0_i32_1 = arith.constant 0 : i32
    return %c0_i32, %c0_i32_0 : i32, i32
  }
  func.func @transform_15(%arg0: i32, %arg1: memref<9xf32, #tpu.memory_space<smem>>) -> (i32, i32) {
    %c0_i32 = arith.constant 0 : i32
    %c0_i32_0 = arith.constant 0 : i32
    %c0_i32_1 = arith.constant 0 : i32
    return %c0_i32, %c0_i32_0 : i32, i32
  }
  func.func @transform_16(%arg0: i32, %arg1: memref<9xf32, #tpu.memory_space<smem>>) -> (i32, i32) {
    %c0_i32 = arith.constant 0 : i32
    %c0_i32_0 = arith.constant 0 : i32
    %c0_i32_1 = arith.constant 0 : i32
    return %c0_i32, %c0_i32_0 : i32, i32
  }
  func.func @transform_17(%arg0: i32, %arg1: memref<9xf32, #tpu.memory_space<smem>>) -> (i32, i32) {
    %c0_i32 = arith.constant 0 : i32
    %c0_i32_0 = arith.constant 0 : i32
    return %arg0, %c0_i32 : i32, i32
  }
  func.func @transform_18(%arg0: i32, %arg1: memref<9xf32, #tpu.memory_space<smem>>) -> (i32, i32) {
    %c0_i32 = arith.constant 0 : i32
    %c0_i32_0 = arith.constant 0 : i32
    return %arg0, %c0_i32 : i32, i32
  }
}

</mosaic_0001>

<bundles_post_ra>
// kernel: _generator_forward.3
= control target key start
LH: loop header
LB: loop body
LE: loop exit
PB: predicated region body
PF: predicated region fallthrough
CT: control target
= control target key end

     0   :  { %s4481_s0 = inlined_call_operand.vmem [shape: f32[9], index: 0, kind: input, shape index: {}]   ;;  %s4482_s1 = inlined_call_operand.vmem [shape: f32[8,8], index: 1, kind: input, shape index: {}]   ;;  %s4483_s2 = inlined_call_operand.vmem [shape: f32[8,8,4], index: 2, kind: input, shape index: {}]   ;;  %s4484_s3 = inlined_call_operand.vmem [shape: bf16[8,32], index: 3, kind: input, shape index: {}]   ;;  %s4485_s4 = inlined_call_operand.vmem [shape: f32[1,32], index: 4, kind: input, shape index: {}]   ;;  %s4486_s5 = inlined_call_operand.vmem [shape: bf16[32,32], index: 5, kind: input, shape index: {}]   ;;  %s4487_s6 = inlined_call_operand.vmem [shape: f32[1,32], index: 6, kind: input, shape index: {}]   ;;  %s4488_s7 = inlined_call_operand.vmem [shape: bf16[32,16], index: 7, kind: input, shape index: {}]   ;;  %s4489_s8 = inlined_call_operand.vmem [shape: f32[1,16], index: 8, kind: input, shape index: {}]   ;;  %s4490_s9 = inlined_call_operand.vmem [shape: f32[8,64], index: 9, kind: input, shape index: {}]   ;;  %s4491_s10 = inlined_call_operand.vmem [shape: bf16[16,64], index: 10, kind: input, shape index: {}]   ;;  %s4492_s11 = inlined_call_operand.vmem [shape: f32[8,64], index: 11, kind: input, shape index: {}]   ;;  %s4493_s12 = inlined_call_operand.vmem [shape: bf16[64,64], index: 12, kind: input, shape index: {}]   ;;  %s4494_s13 = inlined_call_operand.vmem [shape: f32[8,64], index: 13, kind: input, shape index: {}]   ;;  %s4495_s14 = inlined_call_operand.vmem [shape: bf16[64,80], index: 14, kind: input, shape index: {}]   ;;  %s4496_s15 = inlined_call_operand.vmem [shape: f32[8,80], index: 15, kind: input, shape index: {}]   ;;  %s4497_s16 = inlined_call_operand.vmem [shape: bf16[16,4], index: 16, kind: input, shape index: {}]   ;;  %s4498_s17 = inlined_call_operand.vmem [shape: f32[1,4], index: 17, kind: input, shape index: {}]   ;;  %s4499_s18 = inlined_call_operand.vmem [shape: f32[72,4], index: 18, kind: output, shape index: {0}]   ;;  %s4500_s19 = inlined_call_operand.hbm [shape: f32[8,16], index: 19, kind: output, shape index: {1}]  }
   0x1   :  { %4503 = sst [smem:[#allocation9_spill]] %s4481_s0 }
   0x2   :  { %4504 = sst [smem:[#allocation10_spill]] %s4482_s1  ;;  %s4508_s20 = sld [smem:[#allocation9_spill]] }
   0x3   :  { %4505 = sst [smem:[#allocation11_spill]] %s4483_s2 }
   0x4   :  { %4506 = sst [smem:[#allocation12_spill]] %s4484_s3 }
   0x5   :  { %4507 = sst [smem:[#allocation13_spill]] %s4494_s13 }
   0x8   :  { %s25_s13 = sshll.u32 %s4508_s20, 4  ;;  %s26_s13 = int_to_ptr.vmem [resolvable:$true] %s25_s13 }
   0x9   :  { %s3254_s21 = scalar_lea.vmem %s26_s13, 16  ;;  %p3259_p1 = scmp.lt.s32.totalorder %s26_s13, %s26_s13 }
   0xa   :  { %p3255_p0 = scmp.ne.s32.totalorder %s26_s13, %s3254_s21  ;;  %p3260_p2 = scmp.lt.s32.totalorder %s3254_s21, %s3254_s21 }
   0xc   :  { %p3261_p3 = por %p3260_p2, %p3259_p1 }
   0xe   :  { %p3262_p4 = pnand %p3261_p3, %p3255_p0 }
  0x10   :  { %3265 = shalt.err (!%p3262_p4)  }
  0x11   :  { %s3292_s1 = smov [#allocation4]  }
  0x12   :  { %28 = dma.vmem_to_smem %s26_s13, 16, %s3292_s1, [#allocation3] }
  0x13   :  { %3288 = dma.done.wait [#allocation3], 16 }
  0x14   :  { %3289 = vsyncadd [#allocation3], 4294967280 }
  0x15   :  { %30 = sfence }
  0x16   :  { %s4509_s23 = sld [smem:[#allocation12_spill]]  ;;  %vm81_vm0 = vcmask 1043456   ;;  %s4510_s3 = sld [smem:[#allocation10_spill]]  ;;  %v3293_v2 = vmov 0.0   ;;  %vm3294_vm1 = vmmov 0   ;;  %vm77_vm2 = vcmask 64512  }
  0x17   :  { %2776 = vmatprep.subr.bf16.mxu0 %v3293_v2  ;;  %2778 = vmatprep.mubr.msk.bf16.mxu0 %vm3294_vm1, %v3293_v2 }
  0x18   :  { %2782 = vmatprep.subr.bf16.mxu1 %v3293_v2  ;;  %2786 = vmatprep.mubr.msk.bf16.mxu1 %vm3294_vm1, %v3293_v2 }
  0x1c   :  { %v68_v0 = vld [vmem:[%s4509_s23] sm:$0xf] }
  0x1d   :  { %v67_v1 = vld [vmem:[%s4510_s3] sm:$0xff]  ;;  %v83_v3 = vsel %vm81_vm0, %v68_v0, 0 }
  0x1e   :  { %v70_v4 = vpack.c.bf16 %v67_v1, %v67_v1  ;;  %2777 = vmatpush3.bf16.msra.mxu0 %v83_v3 }
  0x1f   :  { %2790 = vmatprep.subr.bf16.mxu0 %v3293_v2 }
  0x21   :  { %2779 = vmatmul.mubr.msk.bf16.vlgmr.msra.gmra.mrb[0].mxu0 %vm77_vm2, %v70_v4 }
  0x22   :  { %2794 = vmatprep.mubr.msk.bf16.mxu0 %vm3294_vm1, %v3293_v2 }
  0x23   :  { %31 = vsyncpa [#allocation6], 0  ;;  %v3133_v5 = vld [vmem:[%s4486_s5] sm:$0xff]   ;;  %v3134_v6 = vld [vmem:[%s4486_s5 + $0x8] sm:$0xff]   ;;  %vm157_vm3 = vcmask 261120   ;;  %vm276_vm4 = vcmask 130048  }
  0x24   :  { %2783 = vmatpush3.bf16.msra.mxu1 %v3133_v5  ;;  %v2559_v7 = vld [vmem:[%s4485_s4] ss:$0 sm:$0xff]  ;;  %v3136_v21 = vld [vmem:[%s4488_s7 + $0x8] sm:$0xff]   ;;  %v3489_v45 = vld [vmem:[%s4493_s12 + $0x10] sm:$0xff]   ;;  %s3500_s28 = sld [smem:[#allocation4]]  ;;  %vm387_vm5 = vcmask 523264  }
  0x25   :  { %2784 = vmatprep.subr.bf16.mxu1 %v3293_v2  ;;  %v3135_v20 = vld [vmem:[%s4488_s7] sm:$0xff]   ;;  %v3482_v44 = vld [vmem:[%s4493_s12 + $0x8] sm:$0xff]   ;;  %v3496_v46 = vld [vmem:[%s4493_s12 + $0x18] sm:$0xff]   ;;  %s4511_s24 = sld [smem:[#allocation11_spill]]  ;;  %s4512_s13 = sld [smem:[#allocation13_spill]]  ;;  %vm2531_vm6 = vcmask 31744  }
  0x26   :  { %2791 = vmatpush3.bf16.msra.mxu0 %v3135_v20  ;;  %v3446_v22 = vld [vmem:[%s4491_s10] sm:$0xff]   ;;  %v3528_v1 = vld [vmem:[%s4495_s14 + $0x8] sm:$0xff]   ;;  %v3535_v3 = vld [vmem:[%s4495_s14 + $0x10] sm:$0xff]   ;;  %s3299_s29 = smov 96   ;;  %s3300_s0 = smov 112  }
  0x27   :  { %2792 = vmatprep.subr.bf16.mxu0 %v3293_v2  ;;  %v2562_v23 = vld [vmem:[%s4487_s6] ss:$0 sm:$0xff]  ;;  %v3542_v4 = vld [vmem:[%s4495_s14 + $0x18] sm:$0xff]   ;;  %s3301_s4 = smov 80   ;;  %s3613_s20 = sld [smem:[#allocation4 + $0x1]] }
  0x28   :  { %2785 = vmatpush3.bf16.msra.mxu1 %v3134_v6  ;;  %v2567_v36 = vld [vmem:[%s4489_s8] ss:$0 sm:$0xff]  ;;  %v3295_v6 = vmov 3   ;;  %s3702_s1 = sld [smem:[#allocation4 + $0x2]]  ;;  %s3801_s8 = sld [smem:[#allocation4 + $0x3]] }
  0x29   :  { %2798 = vmatprep.subr.bf16.mxu1 %v3293_v2  ;;  %v3475_v43 = vld [vmem:[%s4493_s12] sm:$0xff]   ;;  %3103 = vset.pattern.permute.xlu1 %v3295_v6  ;;  %s3900_s27 = sld [smem:[#allocation4 + $0x4]]  ;;  %s4024_s25 = sld [smem:[#allocation4 + $0x5]] }
  0x2a   :  { %2793 = vmatpush3.bf16.msra.mxu0 %v3136_v21  ;;  %v3505_v47 = vld [vmem:[%s4490_s9] sm:$0xff]  ;;  %v300_v48 = vstv %s3500_s28 }
  0x2b   :  { %2828 = vmatprep.subr.bf16.mxu0 %v3293_v2  ;;  %v301_v49 = vmul.f32 %v300_v48, %v3505_v47  ;;  %v3512_v51 = vld [vmem:[%s4492_s11] sm:$0xff] }
  0x2c   :  { %v3521_v0 = vld [vmem:[%s4495_s14] sm:$0xff]  }
  0x2d   :  { %v511_v5 = vld [vmem:[%s4511_s24] sm:$0xff]  ;;  %s3617_s21 = ssub.f32 %s3613_s20, %s3500_s28 }
  0x2e   :  { %539 = vperm.xlu1 %3103, %v511_v5   ;;  %s3711_s22 = ssub.f32 %s3702_s1, %s3613_s20 }
  0x2f   :  { %s711_s28 = smul.f32 0.5, %s3617_s21  ;;  %s3810_s23 = ssub.f32 %s3801_s8, %s3702_s1 }
  0x30   :  { %s950_s7 = smul.f32 0.5, %s3711_s22  ;;  %s3909_s5 = ssub.f32 %s3900_s27, %s3801_s8 }
  0x31   :  { %s1189_s26 = smul.f32 0.5, %s3810_s23  ;;  %s4033_s3 = ssub.f32 %s4024_s25, %s3900_s27 }
  0xf4   :  { %v119_v8 = vpop.f32.mrb[0].mxu0 }
  0xf5   :  { %v120_v9 = vadd.f32 %v2559_v7, %v119_v8  ;;  %v2780_v10 = vpop.f32.mrb[1].mxu0  ;;  %v3296_v7 = vmov 1   ;;  %v3297_v8 = vmov 0  }
  0xf6   :  { %v122_v11 = vpop.f32.mrb[2].mxu0  ;;  %3101 = vset.pattern.permute.xlu0 %v3296_v7  ;;  %3104 = vset.pattern.permute.xlu1 %v3297_v8  ;;  %v3557_v10 = vld [vmem:[%s4512_s13] sm:$0xff] }
  0xf7   :  { %v2561_v12 = vmul.f32 -1.442695, %v120_v9  ;;  %v2781_v13 = vpop.f32.mrb[3].mxu0  ;;  %v125_v16 = vmul.f32 0.909, %v120_v9  ;;  %519 = vperm.xlu0 %3101, %v511_v5   ;;  %v3298_v9 = vmov 2   ;;  %514 = vperm.xlu1 %3104, %v511_v5  }
  0xf9   :  { %3147 = vpow2.f32 %v2561_v12 }
  0xfb   :  { %3102 = vset.pattern.permute.xlu0 %v3298_v9  ;;  %3105 = vset.pattern.permute.xlu1 %v3296_v7 }
  0xfc   :  { %529 = vperm.xlu0 %3102, %v511_v5  }
 0x103   :  { %v3148_v14 = vpop.eup %3147 }
 0x104   :  { %v129_v15 = vadd.f32 1.0, %v3148_v14 }
 0x106   :  { %3149 = vrcp.f32 %v129_v15 }
 0x110   :  { %v3150_v17 = vpop.eup %3149 }
 0x111   :  { %v132_v18 = vmul.f32 %v3150_v17, %v125_v16 }
 0x113   :  { %v138_v19 = vpack.c.bf16 %v132_v18, %v132_v18 }
 0x115   :  { %2787 = vmatmul.mubr.msk.bf16.vlgmr.msra.gmra.mrb[0].mxu1 %vm157_vm3, %v138_v19 }
 0x116   :  { %2800 = vmatprep.mubr.msk.bf16.mxu1 %vm3294_vm1, %v3293_v2  ;;  %2799 = vmatpush3.bf16.msra.mxu1 %v3446_v22 }
 0x117   :  { %2804 = vmatprep.subr.bf16.mxu1 %v3293_v2 }
 0x1e8   :  { %v195_v24 = vpop.f32.mrb[0].mxu1 }
 0x1e9   :  { %v196_v25 = vadd.f32 %v2562_v23, %v195_v24  ;;  %v2788_v26 = vpop.f32.mrb[1].mxu1  ;;  %v3574_v24 = vld [vmem:[%s4496_s15] sm:$0xff] }
 0x1ea   :  { %v198_v27 = vpop.f32.mrb[2].mxu1 }
 0x1eb   :  { %v2566_v28 = vmul.f32 -1.442695, %v196_v25  ;;  %v2789_v29 = vpop.f32.mrb[3].mxu1  ;;  %v201_v32 = vmul.f32 0.909, %v196_v25 }
 0x1ed   :  { %3151 = vpow2.f32 %v2566_v28 }
 0x1f7   :  { %v3152_v30 = vpop.eup %3151 }
 0x1f8   :  { %v205_v31 = vadd.f32 1.0, %v3152_v30  ;;  %v3577_v30 = vpop.permute.xlu0 %519 }
 0x1fa   :  { %3153 = vrcp.f32 %v205_v31 }
 0x1fc   :  { %v3579_v31 = vpop.permute.xlu0 %529 }
 0x204   :  { %v3154_v33 = vpop.eup %3153 }
 0x205   :  { %v208_v34 = vmul.f32 %v3154_v33, %v201_v32 }
 0x207   :  { %v214_v35 = vpack.c.bf16 %v208_v34, %v208_v34 }
 0x209   :  { %2795 = vmatmul.mubr.msk.bf16.vlgmr.msra.gmra.mrb[4].mxu0 %vm157_vm3, %v214_v35  ;;  %v3589_v35 = vpop.permute.xlu1 %539 }
 0x20a   :  { %2829 = vmatpush3.bf16.msra.mxu0 %v3446_v22  ;;  %2830 = vmatprep.mubr.msk.bf16.mxu0 %vm3294_vm1, %v3293_v2 }
 0x20b   :  { %2846 = vmatprep.subr.bf16.mxu0 %v3293_v2 }
 0x2dc   :  { %v270_v37 = vpop.f32.mrb[4].mxu0 }
 0x2dd   :  { %v3461_v38 = vadd.f32 %v2567_v36, %v270_v37  ;;  %v2796_v39 = vpop.f32.mrb[5].mxu0  ;;  %v3597_v37 = vld [vmem:[%s4511_s24 + $0x8] sm:$0xff] }
 0x2de   :  { %v273_v40 = vpop.f32.mrb[6].mxu0  ;;  %v3603_v39 = vpop.permute.xlu1 %514 }
 0x2df   :  { %278 = vst.msk [vmem:[#allocation2] sm:$0xff] %vm276_vm4, %v3461_v38  ;;  %277 = vst.msk [vmem:[#allocation5] sm:$0xff] %vm276_vm4, %v3461_v38  ;;  %v2797_v41 = vpop.f32.mrb[7].mxu0  ;;  %v298_v42 = vpack.c.bf16 %v3461_v38, %v3461_v38 }
 0x2e1   :  { %2801 = vmatmul.mubr.msk.bf16.vlgmr.msra.gmra.mrb[4].mxu1 %vm276_vm4, %v298_v42 }
 0x2e2   :  { %2812 = vmatprep.mubr.msk.bf16.mxu1 %vm3294_vm1, %v3293_v2  ;;  %2805 = vmatpush3.bf16.msra.mxu1 %v3475_v43 }
 0x2e3   :  { %2806 = vmatprep.subr.bf16.mxu1 %v3293_v2 }
 0x2e6   :  { %2807 = vmatpush3.bf16.msra.mxu1 %v3482_v44 }
 0x2e7   :  { %2808 = vmatprep.subr.bf16.mxu1 %v3293_v2 }
 0x2ea   :  { %2809 = vmatpush3.bf16.msra.mxu1 %v3489_v45 }
 0x2eb   :  { %2810 = vmatprep.subr.bf16.mxu1 %v3293_v2 }
 0x2ee   :  { %2811 = vmatpush3.bf16.msra.mxu1 %v3496_v46 }
 0x2ef   :  { %2816 = vmatprep.subr.bf16.mxu1 %v3293_v2 }
 0x3b4   :  { %v345_v50 = vpop.f32.mrb[4].mxu1 }
 0x3b5   :  { %v346_v52 = vadd.f32 %v345_v50, %v301_v49  ;;  %v2802_v53 = vpop.f32.mrb[5].mxu1 }
 0x3b6   :  { %v348_v54 = vpop.f32.mrb[6].mxu1  ;;  %v550_v53 = vstv %s3617_s21  ;;  %s2640_s21 = sld [smem:[#allocation4 + $0x8]] }
 0x3b7   :  { %v352_v55 = vadd.f32 %v3512_v51, %v346_v52  ;;  %v2803_v56 = vpop.f32.mrb[7].mxu1  ;;  %v548_v54 = vmul.f32 2.0, %v3461_v38 }
 0x3b9   :  { %v2573_v57 = vmul.f32 -1.442695, %v352_v55  ;;  %v353_v60 = vmul.f32 0.909, %v352_v55  ;;  %v549_v56 = vsub.f32 %v548_v54, %v3461_v38 }
 0x3bb   :  { %3155 = vpow2.f32 %v2573_v57 }
 0x3c5   :  { %v3156_v58 = vpop.eup %3155 }
 0x3c6   :  { %v357_v59 = vadd.f32 1.0, %v3156_v58 }
 0x3c8   :  { %3157 = vrcp.f32 %v357_v59 }
 0x3d2   :  { %v3158_v61 = vpop.eup %3157 }
 0x3d3   :  { %v360_v62 = vmul.f32 %v3158_v61, %v353_v60  ;;  %v559_v61 = vstv %s3613_s20 }
 0x3d5   :  { %v361_v63 = vpack.c.bf16 %v360_v62, %v360_v62  ;;  %v560_v62 = vmul.f32 %v559_v61, %v3505_v47 }
 0x3d7   :  { %2813 = vmatmul.mubr.msk.bf16.vlgmr.msra.gmra.mrb[8].mxu1 %vm387_vm5, %v361_v63 }
 0x3d8   :  { %2824 = vmatprep.mubr.msk.bf16.mxu1 %vm3294_vm1, %v3293_v2  ;;  %2817 = vmatpush3.bf16.msra.mxu1 %v3521_v0 }
 0x3d9   :  { %2818 = vmatprep.subr.bf16.mxu1 %v3293_v2 }
 0x3dc   :  { %2819 = vmatpush3.bf16.msra.mxu1 %v3528_v1 }
 0x3dd   :  { %2820 = vmatprep.subr.bf16.mxu1 %v3293_v2 }
 0x3e0   :  { %2821 = vmatpush3.bf16.msra.mxu1 %v3535_v3 }
 0x3e1   :  { %2822 = vmatprep.subr.bf16.mxu1 %v3293_v2 }
 0x3e4   :  { %2823 = vmatpush3.bf16.msra.mxu1 %v3542_v4 }
 0x3e5   :  { %2834 = vmatprep.subr.bf16.mxu1 %v3293_v2 }
 0x4aa   :  { %v425_v11 = vpop.f32.mrb[8].mxu1 }
 0x4ab   :  { %v426_v12 = vadd.f32 %v425_v11, %v3557_v10  ;;  %v2814_v13 = vpop.f32.mrb[9].mxu1 }
 0x4ac   :  { %v428_v14 = vpop.f32.mrb[10].mxu1 }
 0x4ad   :  { %v2579_v15 = vmul.f32 -1.442695, %v426_v12  ;;  %v2815_v16 = vpop.f32.mrb[11].mxu1  ;;  %v431_v19 = vmul.f32 0.909, %v426_v12 }
 0x4af   :  { %3159 = vpow2.f32 %v2579_v15 }
 0x4b9   :  { %v3160_v17 = vpop.eup %3159 }
 0x4ba   :  { %v435_v18 = vadd.f32 1.0, %v3160_v17 }
 0x4bc   :  { %3161 = vrcp.f32 %v435_v18 }
 0x4c6   :  { %v3162_v20 = vpop.eup %3161 }
 0x4c7   :  { %v438_v21 = vmul.f32 %v3162_v20, %v431_v19 }
 0x4c9   :  { %v439_v23 = vpack.c.bf16 %v438_v21, %v438_v21 }
 0x4cb   :  { %2825 = vmatmul.mubr.msk.bf16.vlgmr.msra.gmra.mrb[12].mxu1 %vm387_vm5, %v439_v23 }
 0x4cc   :  { %2835 = vmatpush3.bf16.msra.mxu1 %v3475_v43  ;;  %2842 = vmatprep.mubr.msk.bf16.mxu1 %vm3294_vm1, %v3293_v2 }
 0x4cd   :  { %2836 = vmatprep.subr.bf16.mxu1 %v3293_v2 }
 0x4d0   :  { %2837 = vmatpush3.bf16.msra.mxu1 %v3482_v44 }
 0x4d1   :  { %2838 = vmatprep.subr.bf16.mxu1 %v3293_v2 }
 0x4d4   :  { %2839 = vmatpush3.bf16.msra.mxu1 %v3489_v45 }
 0x4d5   :  { %2840 = vmatprep.subr.bf16.mxu1 %v3293_v2 }
 0x4d8   :  { %2841 = vmatpush3.bf16.msra.mxu1 %v3496_v46 }
 0x4d9   :  { %2858 = vmatprep.subr.bf16.mxu1 %v3293_v2 }
 0x59e   :  { %v502_v25 = vpop.f32.mrb[12].mxu1 }
 0x59f   :  { %v503_v26 = vadd.f32 %v502_v25, %v3574_v24  ;;  %v2826_v27 = vpop.f32.mrb[13].mxu1 }
 0x5a0   :  { %v505_v28 = vpop.f32.mrb[14].mxu1 }
 0x5a1   :  { %3163 = vtanh.f32 %v503_v26  ;;  %v2827_v29 = vpop.f32.mrb[15].mxu1 }
 0x5ab   :  { %v3581_v32 = vpop.eup %3163 }
 0x5ac   :  { %v522_v33 = vmul.f32 %v3581_v32, %v3577_v30  ;;  %v532_v34 = vmul.f32 %v3581_v32, %v3579_v31  ;;  %v542_v36 = vmul.f32 %v3581_v32, %v3589_v35  ;;  %v517_v40 = vmul.f32 %v3581_v32, %v3603_v39 }
 0x5ad   :  { %v551_v55 = vmul.f32 %v3581_v32, %v550_v53 }
 0x5ae   :  { %534 = vrot.lane.b32.xlu0 %v532_v34, %s3299_s29  ;;  %524 = vrot.lane.b32.xlu1 %v522_v33, %s3300_s0 }
 0x5af   :  { %v552_v57 = vadd.f32 %v551_v55, %v549_v56 }
 0x5b2   :  { %544 = vrot.lane.b32.xlu1 %v542_v36, %s3301_s4 }
 0x5b6   :  { %754 = vperm.xlu1 %3105, %v3597_v37  }
 0x5ba   :  { %3106 = vset.pattern.permute.xlu1 %v3295_v6 }
 0x5bb   :  { %774 = vperm.xlu1 %3106, %v3597_v37  }
 0x5bf   :  { %3109 = vset.pattern.permute.xlu1 %v3298_v9 }
 0x620   :  { %v525_v41 = vpop.permute.xlu1 %524  ;;  %v535_v48 = vpop.permute.xlu0 %534 }
 0x621   :  { %v527_v42 = vadd.f32 %v525_v41, %v517_v40 }
 0x623   :  { %v537_v49 = vadd.f32 %v535_v48, %v527_v42 }
 0x624   :  { %v545_v50 = vpop.permute.xlu1 %544 }
 0x625   :  { %v3607_v52 = vadd.f32 %v545_v50, %v537_v49 }
 0x627   :  { %554 = vrot.lane.b32.xlu0 %v3607_v52, %s3300_s0 }
 0x62b   :  { %764 = vperm.xlu0 %3102, %v3597_v37  }
 0x62f   :  { %3107 = vset.pattern.permute.xlu0 %v3297_v8 }
 0x699   :  { %v555_v58 = vpop.permute.xlu0 %554 }
 0x69a   :  { %v3623_v59 = vadd.f32 %v555_v58, %v552_v57  ;;  %v3667_v58 = vpop.permute.xlu1 %754 }
 0x69c   :  { %v558_v60 = vpack.c.bf16 %v3623_v59, %v3623_v59 }
 0x69e   :  { %2831 = vmatmul.mubr.msk.bf16.vlgmr.msra.gmra.mrb[8].mxu0 %vm276_vm4, %v558_v60 }
 0x69f   :  { %2847 = vmatpush3.bf16.msra.mxu0 %v3521_v0  ;;  %2854 = vmatprep.mubr.msk.bf16.mxu0 %vm3294_vm1, %v3293_v2 }
 0x6a0   :  { %2848 = vmatprep.subr.bf16.mxu0 %v3293_v2 }
 0x6a3   :  { %2849 = vmatpush3.bf16.msra.mxu0 %v3528_v1 }
 0x6a4   :  { %2850 = vmatprep.subr.bf16.mxu0 %v3293_v2 }
 0x6a7   :  { %2851 = vmatpush3.bf16.msra.mxu0 %v3535_v3 }
 0x6a8   :  { %2852 = vmatprep.subr.bf16.mxu0 %v3293_v2 }
 0x6aa   :  { %v3673_v61 = vpop.permute.xlu0 %764 }
 0x6ab   :  { %2853 = vmatpush3.bf16.msra.mxu0 %v3542_v4 }
 0x6ac   :  { %2864 = vmatprep.subr.bf16.mxu0 %v3293_v2 }
 0x771   :  { %v598_v63 = vpop.f32.mrb[8].mxu0 }
 0x772   :  { %v599_v5 = vadd.f32 %v598_v63, %v560_v62  ;;  %v2832_v11 = vpop.f32.mrb[9].mxu0  ;;  %v3679_v62 = vpop.permute.xlu1 %774 }
 0x773   :  { %v601_v12 = vpop.f32.mrb[10].mxu0 }
 0x774   :  { %v604_v13 = vadd.f32 %v599_v5, %v3512_v51  ;;  %v2833_v14 = vpop.f32.mrb[11].mxu0 }
 0x776   :  { %v2587_v15 = vmul.f32 -1.442695, %v604_v13  ;;  %v605_v18 = vmul.f32 0.909, %v604_v13 }
 0x778   :  { %3165 = vpow2.f32 %v2587_v15 }
 0x782   :  { %v3166_v16 = vpop.eup %3165 }
 0x783   :  { %v609_v17 = vadd.f32 1.0, %v3166_v16 }
 0x785   :  { %3167 = vrcp.f32 %v609_v17 }
 0x78f   :  { %v3168_v19 = vpop.eup %3167 }
 0x790   :  { %v612_v20 = vmul.f32 %v3168_v19, %v605_v18 }
 0x792   :  { %v613_v21 = vpack.c.bf16 %v612_v20, %v612_v20 }
 0x794   :  { %2843 = vmatmul.mubr.msk.bf16.vlgmr.msra.gmra.mrb[16].mxu1 %vm387_vm5, %v613_v21 }
 0x795   :  { %2859 = vmatpush3.bf16.msra.mxu1 %v3446_v22  ;;  %2860 = vmatprep.mubr.msk.bf16.mxu1 %vm3294_vm1, %v3293_v2 }
 0x796   :  { %2876 = vmatprep.subr.bf16.mxu1 %v3293_v2 }
 0x867   :  { %v651_v23 = vpop.f32.mrb[16].mxu1 }
 0x868   :  { %v652_v25 = vadd.f32 %v651_v23, %v3557_v10  ;;  %v2844_v26 = vpop.f32.mrb[17].mxu1 }
 0x869   :  { %v654_v27 = vpop.f32.mrb[18].mxu1  ;;  %v712_v26 = vstv %s711_s28 }
 0x86a   :  { %v2589_v28 = vmul.f32 -1.442695, %v652_v25  ;;  %v2845_v29 = vpop.f32.mrb[19].mxu1  ;;  %v657_v36 = vmul.f32 0.909, %v652_v25 }
 0x86c   :  { %3169 = vpow2.f32 %v2589_v28 }
 0x876   :  { %v3170_v33 = vpop.eup %3169 }
 0x877   :  { %v661_v34 = vadd.f32 1.0, %v3170_v33 }
 0x879   :  { %3171 = vrcp.f32 %v661_v34 }
 0x883   :  { %v3172_v40 = vpop.eup %3171 }
 0x884   :  { %v664_v41 = vmul.f32 %v3172_v40, %v657_v36  ;;  %v785_v36 = vstv %s3711_s22 }
 0x886   :  { %v665_v42 = vpack.c.bf16 %v664_v41, %v664_v41 }
 0x888   :  { %2855 = vmatmul.mubr.msk.bf16.vlgmr.msra.gmra.mrb[12].mxu0 %vm387_vm5, %v665_v42 }
 0x889   :  { %2865 = vmatpush3.bf16.msra.mxu0 %v3475_v43  ;;  %2872 = vmatprep.mubr.msk.bf16.mxu0 %vm3294_vm1, %v3293_v2 }
 0x88a   :  { %2866 = vmatprep.subr.bf16.mxu0 %v3293_v2 }
 0x88d   :  { %2867 = vmatpush3.bf16.msra.mxu0 %v3482_v44 }
 0x88e   :  { %2868 = vmatprep.subr.bf16.mxu0 %v3293_v2 }
 0x891   :  { %2869 = vmatpush3.bf16.msra.mxu0 %v3489_v45 }
 0x892   :  { %2870 = vmatprep.subr.bf16.mxu0 %v3293_v2 }
 0x895   :  { %2871 = vmatpush3.bf16.msra.mxu0 %v3496_v46 }
 0x896   :  { %2888 = vmatprep.subr.bf16.mxu0 %v3293_v2 }
 0x95b   :  { %v703_v48 = vpop.f32.mrb[12].mxu0 }
 0x95c   :  { %v704_v49 = vadd.f32 %v703_v48, %v3574_v24  ;;  %v2856_v50 = vpop.f32.mrb[13].mxu0 }
 0x95d   :  { %v706_v53 = vpop.f32.mrb[14].mxu0 }
 0x95e   :  { %3173 = vtanh.f32 %v704_v49  ;;  %v2857_v54 = vpop.f32.mrb[15].mxu0 }
 0x968   :  { %v3659_v55 = vpop.eup %3173 }
 0x969   :  { %v722_v56 = vmul.f32 %v3659_v55, %v3579_v31  ;;  %v716_v57 = vmul.f32 %v3659_v55, %v3577_v30  ;;  %v728_v60 = vmul.f32 %v3659_v55, %v3589_v35  ;;  %v757_v31 = vmul.f32 %v3659_v55, %v3667_v58 }
 0x96a   :  { %v767_v30 = vmul.f32 %v3659_v55, %v3673_v61  ;;  %v777_v35 = vmul.f32 %v3659_v55, %v3679_v62  ;;  %v786_v40 = vmul.f32 %v3659_v55, %v785_v36 }
 0x96b   :  { %724 = vrot.lane.b32.xlu1 %v722_v56, %s3299_s29  ;;  %718 = vrot.lane.b32.xlu0 %v716_v57, %s3300_s0 }
 0x96f   :  { %730 = vrot.lane.b32.xlu1 %v728_v60, %s3301_s4  ;;  %749 = vperm.xlu0 %3107, %v3597_v37   ;;  %v715_v37 = vmul.f32 %v3659_v55, %v3603_v39 }
 0x973   :  { %759 = vrot.lane.b32.xlu1 %v757_v31, %s3300_s0  ;;  %769 = vrot.lane.b32.xlu0 %v767_v30, %s3299_s29 }
 0x974   :  { %3108 = vset.pattern.permute.xlu0 %v3296_v7 }
 0x977   :  { %779 = vrot.lane.b32.xlu1 %v777_v35, %s3301_s4 }
 0x9dd   :  { %v725_v63 = vpop.permute.xlu1 %724  ;;  %v719_v5 = vpop.permute.xlu0 %718 }
 0x9de   :  { %v721_v11 = vadd.f32 %v719_v5, %v715_v37 }
 0x9e0   :  { %v727_v12 = vadd.f32 %v725_v63, %v721_v11 }
 0x9e1   :  { %v731_v13 = vpop.permute.xlu1 %730 }
 0x9e2   :  { %v733_v14 = vadd.f32 %v731_v13, %v727_v12  ;;  %v2601_v12 = vld [vmem:[%s4511_s24 + $0x10] sm:$0xff] }
 0x9e4   :  { %v734_v15 = vadd.f32 %v733_v14, %v3607_v52  ;;  %v710_v52 = vadd.f32 %v3659_v55, %v3581_v32 }
 0x9e5   :  { %v760_v17 = vpop.permute.xlu1 %759 }
 0x9e6   :  { %v735_v16 = vmul.f32 0.5, %v734_v15  ;;  %v713_v27 = vmul.f32 %v712_v26, %v710_v52 }
 0x9e8   :  { %737 = vrot.lane.b32.xlu0 %v735_v16, %s3300_s0  ;;  %v714_v28 = vadd.f32 %v713_v27, %v3461_v38 }
 0x9e9   :  { %v780_v23 = vpop.permute.xlu1 %779 }
 0x9ec   :  { %993 = vperm.xlu0 %3108, %v2601_v12  }
 0x9ee   :  { %v3691_v18 = vpop.permute.xlu0 %749 }
 0x9ef   :  { %v752_v19 = vmul.f32 %v3659_v55, %v3691_v18 }
 0x9f0   :  { %3111 = vset.pattern.permute.xlu0 %v3297_v8 }
 0x9f1   :  { %v762_v39 = vadd.f32 %v760_v17, %v752_v19 }
 0x9f2   :  { %v770_v20 = vpop.permute.xlu0 %769 }
 0x9f3   :  { %v772_v21 = vadd.f32 %v770_v20, %v762_v39 }
 0x9f5   :  { %v3695_v25 = vadd.f32 %v780_v23, %v772_v21 }
 0x9f7   :  { %789 = vrot.lane.b32.xlu1 %v3695_v25, %s3300_s0 }
 0x9fb   :  { %1003 = vperm.xlu1 %3109, %v2601_v12  }
 0x9ff   :  { %3110 = vset.pattern.permute.xlu1 %v3295_v6 }
 0xa00   :  { %1013 = vperm.xlu1 %3110, %v2601_v12  }
 0xa04   :  { %3113 = vset.pattern.permute.xlu1 %v3298_v9 }
 0xa5a   :  { %v738_v29 = vpop.permute.xlu0 %737 }
 0xa5b   :  { %v3705_v33 = vadd.f32 %v738_v29, %v714_v28 }
 0xa5d   :  { %741 = vst.msk [vmem:[#allocation2 + $0x8] sm:$0xff] %vm276_vm4, %v3705_v33  ;;  %v783_v34 = vmul.f32 2.0, %v3705_v33 }
 0xa5f   :  { %v784_v32 = vsub.f32 %v783_v34, %v3623_v59  ;;  %v795_v59 = vstv %s3702_s1 }
 0xa60   :  { %v796_v49 = vmul.f32 %v795_v59, %v3505_v47 }
 0xa61   :  { %v787_v41 = vadd.f32 %v786_v40, %v784_v32 }
 0xa69   :  { %v790_v42 = vpop.permute.xlu1 %789 }
 0xa6a   :  { %v3717_v38 = vadd.f32 %v790_v42, %v787_v41 }
 0xa6b   :  { %v3771_v59 = vpop.permute.xlu0 %993 }
 0xa6c   :  { %v793_v48 = vpack.c.bf16 %v3717_v38, %v3717_v38 }
 0xa6e   :  { %2861 = vmatmul.mubr.msk.bf16.vlgmr.msra.gmra.mrb[20].mxu1 %vm276_vm4, %v793_v48 }
 0xa6f   :  { %2877 = vmatpush3.bf16.msra.mxu1 %v3521_v0  ;;  %2884 = vmatprep.mubr.msk.bf16.mxu1 %vm3294_vm1, %v3293_v2 }
 0xa70   :  { %2878 = vmatprep.subr.bf16.mxu1 %v3293_v2 }
 0xa73   :  { %2879 = vmatpush3.bf16.msra.mxu1 %v3528_v1 }
 0xa74   :  { %2880 = vmatprep.subr.bf16.mxu1 %v3293_v2 }
 0xa77   :  { %2881 = vmatpush3.bf16.msra.mxu1 %v3535_v3 }
 0xa78   :  { %2882 = vmatprep.subr.bf16.mxu1 %v3293_v2 }
 0xa7a   :  { %v3766_v42 = vpop.permute.xlu1 %1003 }
 0xa7b   :  { %2883 = vmatpush3.bf16.msra.mxu1 %v3542_v4 }
 0xa7c   :  { %2894 = vmatprep.subr.bf16.mxu1 %v3293_v2 }
 0xb41   :  { %v834_v50 = vpop.f32.mrb[20].mxu1 }
 0xb42   :  { %v835_v53 = vadd.f32 %v834_v50, %v796_v49  ;;  %v2862_v54 = vpop.f32.mrb[21].mxu1  ;;  %v3778_v49 = vpop.permute.xlu1 %1013 }
 0xb43   :  { %v837_v56 = vpop.f32.mrb[22].mxu1 }
 0xb44   :  { %v841_v57 = vadd.f32 %v835_v53, %v3512_v51  ;;  %v2863_v60 = vpop.f32.mrb[23].mxu1 }
 0xb46   :  { %v2595_v31 = vmul.f32 -1.442695, %v841_v57  ;;  %v842_v37 = vmul.f32 0.909, %v841_v57 }
 0xb48   :  { %3175 = vpow2.f32 %v2595_v31 }
 0xb52   :  { %v3176_v30 = vpop.eup %3175 }
 0xb53   :  { %v846_v35 = vadd.f32 1.0, %v3176_v30 }
 0xb55   :  { %3177 = vrcp.f32 %v846_v35 }
 0xb5f   :  { %v3178_v63 = vpop.eup %3177 }
 0xb60   :  { %v849_v5 = vmul.f32 %v3178_v63, %v842_v37 }
 0xb62   :  { %v850_v11 = vpack.c.bf16 %v849_v5, %v849_v5 }
 0xb64   :  { %2873 = vmatmul.mubr.msk.bf16.vlgmr.msra.gmra.mrb[16].mxu0 %vm387_vm5, %v850_v11 }
 0xb65   :  { %2889 = vmatpush3.bf16.msra.mxu0 %v3446_v22  ;;  %2890 = vmatprep.mubr.msk.bf16.mxu0 %vm3294_vm1, %v3293_v2 }
 0xb66   :  { %2906 = vmatprep.subr.bf16.mxu0 %v3293_v2 }
 0xc37   :  { %v889_v13 = vpop.f32.mrb[16].mxu0 }
 0xc38   :  { %v890_v14 = vadd.f32 %v889_v13, %v3557_v10  ;;  %v2874_v15 = vpop.f32.mrb[17].mxu0 }
 0xc39   :  { %v892_v16 = vpop.f32.mrb[18].mxu0  ;;  %v951_v15 = vstv %s950_s7 }
 0xc3a   :  { %v2597_v17 = vmul.f32 -1.442695, %v890_v14  ;;  %v2875_v19 = vpop.f32.mrb[19].mxu0  ;;  %v895_v21 = vmul.f32 0.909, %v890_v14 }
 0xc3c   :  { %3179 = vpow2.f32 %v2597_v17 }
 0xc46   :  { %v3180_v39 = vpop.eup %3179 }
 0xc47   :  { %v899_v20 = vadd.f32 1.0, %v3180_v39 }
 0xc49   :  { %3181 = vrcp.f32 %v899_v20 }
 0xc53   :  { %v3182_v23 = vpop.eup %3181 }
 0xc54   :  { %v902_v52 = vmul.f32 %v3182_v23, %v895_v21  ;;  %v1024_v21 = vstv %s3810_s23  ;;  %s4163_s23 = sld [smem:[#allocation4 + $0x6]] }
 0xc56   :  { %v903_v26 = vpack.c.bf16 %v902_v52, %v902_v52 }
 0xc58   :  { %2885 = vmatmul.mubr.msk.bf16.vlgmr.msra.gmra.mrb[24].mxu1 %vm387_vm5, %v903_v26 }
 0xc59   :  { %2895 = vmatpush3.bf16.msra.mxu1 %v3475_v43  ;;  %2902 = vmatprep.mubr.msk.bf16.mxu1 %vm3294_vm1, %v3293_v2 }
 0xc5a   :  { %2896 = vmatprep.subr.bf16.mxu1 %v3293_v2 }
 0xc5d   :  { %2897 = vmatpush3.bf16.msra.mxu1 %v3482_v44 }
 0xc5e   :  { %2898 = vmatprep.subr.bf16.mxu1 %v3293_v2 }
 0xc61   :  { %2899 = vmatpush3.bf16.msra.mxu1 %v3489_v45 }
 0xc62   :  { %2900 = vmatprep.subr.bf16.mxu1 %v3293_v2 }
 0xc65   :  { %2901 = vmatpush3.bf16.msra.mxu1 %v3496_v46 }
 0xc66   :  { %2918 = vmatprep.subr.bf16.mxu1 %v3293_v2 }
 0xd2b   :  { %v942_v27 = vpop.f32.mrb[24].mxu1 }
 0xd2c   :  { %v943_v28 = vadd.f32 %v942_v27, %v3574_v24  ;;  %v2886_v29 = vpop.f32.mrb[25].mxu1 }
 0xd2d   :  { %v945_v34 = vpop.f32.mrb[26].mxu1 }
 0xd2e   :  { %3183 = vtanh.f32 %v943_v28  ;;  %v2887_v36 = vpop.f32.mrb[27].mxu1 }
 0xd38   :  { %v3759_v32 = vpop.eup %3183 }
 0xd39   :  { %v961_v40 = vmul.f32 %v3759_v32, %v3673_v61  ;;  %v955_v41 = vmul.f32 %v3759_v32, %v3667_v58  ;;  %v967_v48 = vmul.f32 %v3759_v32, %v3679_v62  ;;  %v996_v61 = vmul.f32 %v3759_v32, %v3771_v59 }
 0xd3a   :  { %v1006_v58 = vmul.f32 %v3759_v32, %v3766_v42  ;;  %v1016_v62 = vmul.f32 %v3759_v32, %v3778_v49  ;;  %v954_v53 = vmul.f32 %v3759_v32, %v3691_v18  ;;  %v1025_v23 = vmul.f32 %v3759_v32, %v1024_v21 }
 0xd3b   :  { %963 = vrot.lane.b32.xlu1 %v961_v40, %s3299_s29  ;;  %957 = vrot.lane.b32.xlu0 %v955_v41, %s3300_s0 }
 0xd3f   :  { %969 = vrot.lane.b32.xlu1 %v967_v48, %s3301_s4  ;;  %988 = vperm.xlu0 %3111, %v2601_v12  }
 0xd43   :  { %998 = vrot.lane.b32.xlu1 %v996_v61, %s3300_s0  ;;  %1008 = vrot.lane.b32.xlu0 %v1006_v58, %s3299_s29 }
 0xd44   :  { %3112 = vset.pattern.permute.xlu0 %v3296_v7 }
 0xd47   :  { %1018 = vrot.lane.b32.xlu1 %v1016_v62, %s3301_s4 }
 0xdad   :  { %v964_v50 = vpop.permute.xlu1 %963  ;;  %v958_v54 = vpop.permute.xlu0 %957 }
 0xdae   :  { %v960_v56 = vadd.f32 %v958_v54, %v954_v53 }
 0xdb0   :  { %v966_v60 = vadd.f32 %v964_v50, %v960_v56 }
 0xdb1   :  { %v970_v57 = vpop.permute.xlu1 %969 }
 0xdb2   :  { %v972_v31 = vadd.f32 %v970_v57, %v966_v60  ;;  %v2609_v57 = vld [vmem:[%s4511_s24 + $0x18] sm:$0xff] }
 0xdb4   :  { %v973_v30 = vadd.f32 %v972_v31, %v3695_v25  ;;  %v949_v25 = vadd.f32 %v3759_v32, %v3659_v55 }
 0xdb5   :  { %v999_v37 = vpop.permute.xlu1 %998 }
 0xdb6   :  { %v974_v35 = vmul.f32 0.5, %v973_v30  ;;  %v952_v16 = vmul.f32 %v951_v15, %v949_v25 }
 0xdb8   :  { %976 = vrot.lane.b32.xlu0 %v974_v35, %s3300_s0  ;;  %v953_v17 = vadd.f32 %v952_v16, %v3705_v33 }
 0xdb9   :  { %v1019_v13 = vpop.permute.xlu1 %1018 }
 0xdbc   :  { %1232 = vperm.xlu0 %3112, %v2609_v57  }
 0xdbe   :  { %v3790_v63 = vpop.permute.xlu0 %988 }
 0xdbf   :  { %v991_v5 = vmul.f32 %v3759_v32, %v3790_v63 }
 0xdc0   :  { %3115 = vset.pattern.permute.xlu0 %v3297_v8 }
 0xdc1   :  { %v1001_v11 = vadd.f32 %v999_v37, %v991_v5 }
 0xdc2   :  { %v1009_v18 = vpop.permute.xlu0 %1008 }
 0xdc3   :  { %v1011_v12 = vadd.f32 %v1009_v18, %v1001_v11 }
 0xdc5   :  { %v3794_v14 = vadd.f32 %v1019_v13, %v1011_v12 }
 0xdc7   :  { %1028 = vrot.lane.b32.xlu1 %v3794_v14, %s3300_s0 }
 0xdcb   :  { %1242 = vperm.xlu1 %3113, %v2609_v57  }
 0xdcf   :  { %3114 = vset.pattern.permute.xlu1 %v3295_v6 }
 0xdd0   :  { %1252 = vperm.xlu1 %3114, %v2609_v57  }
 0xdd4   :  { %3117 = vset.pattern.permute.xlu1 %v3298_v9 }
 0xe2a   :  { %v977_v19 = vpop.permute.xlu0 %976 }
 0xe2b   :  { %v3804_v39 = vadd.f32 %v977_v19, %v953_v17 }
 0xe2d   :  { %980 = vst.msk [vmem:[#allocation2 + $0x10] sm:$0xff] %vm276_vm4, %v3804_v39  ;;  %v1022_v20 = vmul.f32 2.0, %v3804_v39 }
 0xe2f   :  { %v1023_v55 = vsub.f32 %v1022_v20, %v3717_v38  ;;  %v1034_v38 = vstv %s3801_s8 }
 0xe30   :  { %v1035_v28 = vmul.f32 %v1034_v38, %v3505_v47 }
 0xe31   :  { %v1026_v52 = vadd.f32 %v1025_v23, %v1023_v55 }
 0xe39   :  { %v1029_v26 = vpop.permute.xlu1 %1028 }
 0xe3a   :  { %v3816_v33 = vadd.f32 %v1029_v26, %v1026_v52 }
 0xe3b   :  { %v3870_v55 = vpop.permute.xlu0 %1232 }
 0xe3c   :  { %v1032_v27 = vpack.c.bf16 %v3816_v33, %v3816_v33 }
 0xe3e   :  { %2891 = vmatmul.mubr.msk.bf16.vlgmr.msra.gmra.mrb[20].mxu0 %vm276_vm4, %v1032_v27 }
 0xe3f   :  { %2907 = vmatpush3.bf16.msra.mxu0 %v3521_v0  ;;  %2914 = vmatprep.mubr.msk.bf16.mxu0 %vm3294_vm1, %v3293_v2 }
 0xe40   :  { %2908 = vmatprep.subr.bf16.mxu0 %v3293_v2 }
 0xe43   :  { %2909 = vmatpush3.bf16.msra.mxu0 %v3528_v1 }
 0xe44   :  { %2910 = vmatprep.subr.bf16.mxu0 %v3293_v2 }
 0xe47   :  { %2911 = vmatpush3.bf16.msra.mxu0 %v3535_v3 }
 0xe48   :  { %2912 = vmatprep.subr.bf16.mxu0 %v3293_v2 }
 0xe4b   :  { %2913 = vmatpush3.bf16.msra.mxu0 %v3542_v4 }
 0xe4c   :  { %2924 = vmatprep.subr.bf16.mxu0 %v3293_v2 }
 0xf11   :  { %v1073_v29 = vpop.f32.mrb[20].mxu0 }
 0xf12   :  { %v1074_v34 = vadd.f32 %v1073_v29, %v1035_v28  ;;  %v2892_v36 = vpop.f32.mrb[21].mxu0 }
 0xf13   :  { %v1076_v40 = vpop.f32.mrb[22].mxu0 }
 0xf14   :  { %v1080_v41 = vadd.f32 %v1074_v34, %v3512_v51  ;;  %v2893_v48 = vpop.f32.mrb[23].mxu0 }
 0xf16   :  { %v2603_v61 = vmul.f32 -1.442695, %v1080_v41  ;;  %v1081_v50 = vmul.f32 0.909, %v1080_v41 }
 0xf18   :  { %3185 = vpow2.f32 %v2603_v61 }
 0xf22   :  { %v3186_v58 = vpop.eup %3185 }
 0xf23   :  { %v1085_v62 = vadd.f32 1.0, %v3186_v58 }
 0xf25   :  { %3187 = vrcp.f32 %v1085_v62 }
 0xf2f   :  { %v3188_v53 = vpop.eup %3187 }
 0xf30   :  { %v1088_v54 = vmul.f32 %v3188_v53, %v1081_v50 }
 0xf32   :  { %v1089_v56 = vpack.c.bf16 %v1088_v54, %v1088_v54  ;;  %v1190_v54 = vstv %s1189_s26 }
 0xf34   :  { %2903 = vmatmul.mubr.msk.bf16.vlgmr.msra.gmra.mrb[28].mxu1 %vm387_vm5, %v1089_v56 }
 0xf35   :  { %2919 = vmatpush3.bf16.msra.mxu1 %v3446_v22  ;;  %2920 = vmatprep.mubr.msk.bf16.mxu1 %vm3294_vm1, %v3293_v2 }
 0xf36   :  { %2936 = vmatprep.subr.bf16.mxu1 %v3293_v2 }
0x1007   :  { %v1128_v60 = vpop.f32.mrb[28].mxu1 }
0x1008   :  { %v1129_v22 = vadd.f32 %v1128_v60, %v3557_v10  ;;  %v2904_v31 = vpop.f32.mrb[29].mxu1 }
0x1009   :  { %v1131_v30 = vpop.f32.mrb[30].mxu1 }
0x100a   :  { %v2605_v35 = vmul.f32 -1.442695, %v1129_v22  ;;  %v2905_v37 = vpop.f32.mrb[31].mxu1  ;;  %v1134_v18 = vmul.f32 0.909, %v1129_v22  ;;  %v1263_v30 = vstv %s3909_s5 }
0x100c   :  { %3189 = vpow2.f32 %v2605_v35 }
0x1016   :  { %v3190_v5 = vpop.eup %3189 }
0x1017   :  { %v1138_v11 = vadd.f32 1.0, %v3190_v5 }
0x1019   :  { %3191 = vrcp.f32 %v1138_v11 }
0x1023   :  { %v3192_v12 = vpop.eup %3191 }
0x1024   :  { %v1141_v13 = vmul.f32 %v3192_v12, %v1134_v18 }
0x1026   :  { %v1142_v25 = vpack.c.bf16 %v1141_v13, %v1141_v13 }
0x1028   :  { %2915 = vmatmul.mubr.msk.bf16.vlgmr.msra.gmra.mrb[24].mxu0 %vm387_vm5, %v1142_v25 }
0x1029   :  { %2925 = vmatpush3.bf16.msra.mxu0 %v3475_v43  ;;  %2932 = vmatprep.mubr.msk.bf16.mxu0 %vm3294_vm1, %v3293_v2 }
0x102a   :  { %2926 = vmatprep.subr.bf16.mxu0 %v3293_v2 }
0x102d   :  { %2927 = vmatpush3.bf16.msra.mxu0 %v3482_v44 }
0x102e   :  { %2928 = vmatprep.subr.bf16.mxu0 %v3293_v2 }
0x1031   :  { %2929 = vmatpush3.bf16.msra.mxu0 %v3489_v45 }
0x1032   :  { %2930 = vmatprep.subr.bf16.mxu0 %v3293_v2 }
0x1035   :  { %2931 = vmatpush3.bf16.msra.mxu0 %v3496_v46  ;;  %v3865_v46 = vpop.permute.xlu1 %1242 }
0x1036   :  { %2948 = vmatprep.subr.bf16.mxu0 %v3293_v2 }
0x1039   :  { %v3877_v23 = vpop.permute.xlu1 %1252 }
0x10fb   :  { %v1181_v15 = vpop.f32.mrb[24].mxu0 }
0x10fc   :  { %v1182_v43 = vadd.f32 %v1181_v15, %v3574_v24  ;;  %v2916_v16 = vpop.f32.mrb[25].mxu0 }
0x10fd   :  { %v1184_v17 = vpop.f32.mrb[26].mxu0 }
0x10fe   :  { %3193 = vtanh.f32 %v1182_v43  ;;  %v2917_v19 = vpop.f32.mrb[27].mxu0 }
0x1108   :  { %v3858_v20 = vpop.eup %3193 }
0x1109   :  { %v1200_v44 = vmul.f32 %v3858_v20, %v3766_v42  ;;  %v1194_v45 = vmul.f32 %v3858_v20, %v3771_v59  ;;  %v1206_v21 = vmul.f32 %v3858_v20, %v3778_v49  ;;  %v1235_v42 = vmul.f32 %v3858_v20, %v3870_v55 }
0x110a   :  { %v1245_v59 = vmul.f32 %v3858_v20, %v3865_v46  ;;  %v1255_v49 = vmul.f32 %v3858_v20, %v3877_v23  ;;  %v1193_v26 = vmul.f32 %v3858_v20, %v3790_v63  ;;  %v1264_v35 = vmul.f32 %v3858_v20, %v1263_v30 }
0x110b   :  { %1202 = vrot.lane.b32.xlu1 %v1200_v44, %s3299_s29  ;;  %1196 = vrot.lane.b32.xlu0 %v1194_v45, %s3300_s0 }
0x110f   :  { %1208 = vrot.lane.b32.xlu1 %v1206_v21, %s3301_s4  ;;  %1227 = vperm.xlu0 %3115, %v2609_v57  }
0x1113   :  { %1237 = vrot.lane.b32.xlu1 %v1235_v42, %s3300_s0  ;;  %1247 = vrot.lane.b32.xlu0 %v1245_v59, %s3299_s29 }
0x1114   :  { %3116 = vset.pattern.permute.xlu0 %v3296_v7 }
0x1117   :  { %1257 = vrot.lane.b32.xlu1 %v1255_v49, %s3301_s4 }
0x117d   :  { %v1203_v52 = vpop.permute.xlu1 %1202  ;;  %v1197_v27 = vpop.permute.xlu0 %1196 }
0x117e   :  { %v1199_v38 = vadd.f32 %v1197_v27, %v1193_v26 }
0x1180   :  { %v1205_v29 = vadd.f32 %v1203_v52, %v1199_v38 }
0x1181   :  { %v1209_v28 = vpop.permute.xlu1 %1208 }
0x1182   :  { %v1211_v34 = vadd.f32 %v1209_v28, %v1205_v29 }
0x1184   :  { %v1212_v36 = vadd.f32 %v1211_v34, %v3794_v14  ;;  %v1188_v14 = vadd.f32 %v3858_v20, %v3759_v32 }
0x1185   :  { %v1238_v41 = vpop.permute.xlu1 %1237 }
0x1186   :  { %v1213_v40 = vmul.f32 0.5, %v1212_v36  ;;  %v1191_v56 = vmul.f32 %v1190_v54, %v1188_v14  ;;  %v3954_v36 = vld [vmem:[%s4493_s12] sm:$0xff]  }
0x1188   :  { %1215 = vrot.lane.b32.xlu0 %v1213_v40, %s3300_s0  ;;  %v1192_v57 = vadd.f32 %v1191_v56, %v3804_v39  ;;  %v3970_v40 = vld [vmem:[%s4493_s12 + $0x10] sm:$0xff]  }
0x1189   :  { %v1258_v50 = vpop.permute.xlu1 %1257 }
0x118e   :  { %v3889_v48 = vpop.permute.xlu0 %1227 }
0x118f   :  { %v1230_v61 = vmul.f32 %v3858_v20, %v3889_v48 }
0x1191   :  { %v1240_v58 = vadd.f32 %v1238_v41, %v1230_v61  ;;  %v3977_v41 = vld [vmem:[%s4493_s12 + $0x18] sm:$0xff]  }
0x1192   :  { %v1248_v63 = vpop.permute.xlu0 %1247 }
0x1193   :  { %v1250_v62 = vadd.f32 %v1248_v63, %v1240_v58 }
0x1195   :  { %v3893_v53 = vadd.f32 %v1258_v50, %v1250_v62 }
0x1197   :  { %1267 = vrot.lane.b32.xlu1 %v3893_v53, %s3300_s0 }
0x11fa   :  { %v1216_v60 = vpop.permute.xlu0 %1215 }
0x11fb   :  { %v3903_v22 = vadd.f32 %v1216_v60, %v1192_v57 }
0x11fd   :  { %1219 = vst.msk [vmem:[#allocation2 + $0x18] sm:$0xff] %vm276_vm4, %v3903_v22  ;;  %v1261_v31 = vmul.f32 2.0, %v3903_v22 }
0x11ff   :  { %v1262_v32 = vsub.f32 %v1261_v31, %v3816_v33  ;;  %v1273_v33 = vstv %s3900_s27  ;;  %s4262_s27 = sld [smem:[#allocation4 + $0x7]] }
0x1201   :  { %v1265_v37 = vadd.f32 %v1264_v35, %v1262_v32 }
0x1205   :  { %s4366_s28 = ssub.f32 %s2640_s21, %s4262_s27 }
0x1209   :  { %v1268_v5 = vpop.permute.xlu1 %1267 }
0x120a   :  { %v3915_v39 = vadd.f32 %v1268_v5, %v1265_v37 }
0x120c   :  { %v1271_v11 = vpack.c.bf16 %v3915_v39, %v3915_v39 }
0x120e   :  { %2921 = vmatmul.mubr.msk.bf16.vlgmr.msra.gmra.mrb[32].mxu1 %vm276_vm4, %v1271_v11 }
0x120f   :  { %2937 = vmatpush3.bf16.msra.mxu1 %v3521_v0  ;;  %2944 = vmatprep.mubr.msk.bf16.mxu1 %vm3294_vm1, %v3293_v2  ;;  %v1274_v0 = vmul.f32 %v1273_v33, %v3505_v47  ;;  %v3937_v47 = vld [vmem:[%s4491_s10] sm:$0xff]  }
0x1210   :  { %2938 = vmatprep.subr.bf16.mxu1 %v3293_v2 }
0x1213   :  { %2939 = vmatpush3.bf16.msra.mxu1 %v3528_v1 }
0x1214   :  { %2940 = vmatprep.subr.bf16.mxu1 %v3293_v2 }
0x1217   :  { %2941 = vmatpush3.bf16.msra.mxu1 %v3535_v3 }
0x1218   :  { %2942 = vmatprep.subr.bf16.mxu1 %v3293_v2 }
0x121b   :  { %2943 = vmatpush3.bf16.msra.mxu1 %v3542_v4 }
0x121c   :  { %2954 = vmatprep.subr.bf16.mxu1 %v3293_v2 }
0x12e1   :  { %v1312_v18 = vpop.f32.mrb[32].mxu1 }
0x12e2   :  { %v1313_v12 = vadd.f32 %v1312_v18, %v1274_v0  ;;  %v2922_v13 = vpop.f32.mrb[33].mxu1 }
0x12e3   :  { %v1315_v25 = vpop.f32.mrb[34].mxu1 }
0x12e4   :  { %v1319_v15 = vadd.f32 %v1313_v12, %v3512_v51  ;;  %v2923_v1 = vpop.f32.mrb[35].mxu1  ;;  %v2617_v51 = vld [vmem:[%s4511_s24 + $0x20] sm:$0xff] }
0x12e5   :  { %1481 = vperm.xlu1 %3117, %v2617_v51   ;;  %1471 = vperm.xlu0 %3116, %v2617_v51  }
0x12e6   :  { %v2611_v43 = vmul.f32 -1.442695, %v1319_v15  ;;  %v1320_v17 = vmul.f32 0.909, %v1319_v15 }
0x12e8   :  { %3195 = vpow2.f32 %v2611_v43 }
0x12e9   :  { %3118 = vset.pattern.permute.xlu1 %v3295_v6  ;;  %3119 = vset.pattern.permute.xlu0 %v3297_v8 }
0x12ea   :  { %1491 = vperm.xlu1 %3118, %v2617_v51  }
0x12ee   :  { %3121 = vset.pattern.permute.xlu1 %v3298_v9 }
0x12f2   :  { %v3196_v16 = vpop.eup %3195 }
0x12f3   :  { %v1324_v3 = vadd.f32 1.0, %v3196_v16 }
0x12f5   :  { %3197 = vrcp.f32 %v1324_v3 }
0x12ff   :  { %v3198_v19 = vpop.eup %3197 }
0x1300   :  { %v1327_v4 = vmul.f32 %v3198_v19, %v1320_v17 }
0x1302   :  { %v1328_v44 = vpack.c.bf16 %v1327_v4, %v1327_v4 }
0x1304   :  { %2933 = vmatmul.mubr.msk.bf16.vlgmr.msra.gmra.mrb[28].mxu0 %vm387_vm5, %v1328_v44 }
0x1305   :  { %2949 = vmatpush3.bf16.msra.mxu0 %v3937_v47  ;;  %2950 = vmatprep.mubr.msk.bf16.mxu0 %vm3294_vm1, %v3293_v2 }
0x1306   :  { %2966 = vmatprep.subr.bf16.mxu0 %v3293_v2 }
0x1364   :  { %v3989_v57 = vpop.permute.xlu1 %1481  ;;  %v3994_v60 = vpop.permute.xlu0 %1471 }
0x1369   :  { %v4001_v31 = vpop.permute.xlu1 %1491 }
0x13d7   :  { %v1367_v45 = vpop.f32.mrb[28].mxu0 }
0x13d8   :  { %v1368_v21 = vadd.f32 %v1367_v45, %v3557_v10  ;;  %v2934_v42 = vpop.f32.mrb[29].mxu0  ;;  %v3963_v10 = vld [vmem:[%s4493_s12 + $0x8] sm:$0xff]   ;;  %s1428_s12 = smul.f32 0.5, %s3909_s5  ;;  %v1502_v45 = vstv %s4033_s3  ;;  %s4271_s5 = ssub.f32 %s4262_s27, %s4163_s23 }
0x13d9   :  { %v1370_v59 = vpop.f32.mrb[30].mxu0 }
0x13da   :  { %v2613_v49 = vmul.f32 -1.442695, %v1368_v21  ;;  %v2935_v52 = vpop.f32.mrb[31].mxu0  ;;  %v1373_v38 = vmul.f32 0.909, %v1368_v21  ;;  %v1429_v3 = vstv %s1428_s12  ;;  %s4172_s12 = ssub.f32 %s4163_s23, %s4024_s25 }
0x13db   :  { %v4047_v52 = vld [vmem:[%s4495_s14] sm:$0xff]  }
0x13dc   :  { %3199 = vpow2.f32 %v2613_v49  ;;  %s1906_s26 = smul.f32 0.5, %s4172_s12 }
0x13e6   :  { %v3200_v26 = vpop.eup %3199 }
0x13e7   :  { %v1377_v27 = vadd.f32 1.0, %v3200_v26  ;;  %v4063_v26 = vld [vmem:[%s4495_s14 + $0x10] sm:$0xff]  }
0x13e9   :  { %3201 = vrcp.f32 %v1377_v27  ;;  %v4070_v27 = vld [vmem:[%s4495_s14 + $0x18] sm:$0xff]  }
0x13f3   :  { %v3202_v28 = vpop.eup %3201 }
0x13f4   :  { %v1380_v29 = vmul.f32 %v3202_v28, %v1373_v38  ;;  %v4077_v38 = vld [vmem:[%s4490_s9] sm:$0xff]  ;;  %v1512_v28 = vstv %s4024_s25 }
0x13f6   :  { %v1381_v34 = vpack.c.bf16 %v1380_v29, %v1380_v29  ;;  %v1513_v29 = vmul.f32 %v1512_v28, %v4077_v38 }
0x13f8   :  { %2945 = vmatmul.mubr.msk.bf16.vlgmr.msra.gmra.mrb[36].mxu1 %vm387_vm5, %v1381_v34 }
0x13f9   :  { %2955 = vmatpush3.bf16.msra.mxu1 %v3954_v36  ;;  %2962 = vmatprep.mubr.msk.bf16.mxu1 %vm3294_vm1, %v3293_v2 }
0x13fa   :  { %2956 = vmatprep.subr.bf16.mxu1 %v3293_v2 }
0x13fd   :  { %2957 = vmatpush3.bf16.msra.mxu1 %v3963_v10 }
0x13fe   :  { %2958 = vmatprep.subr.bf16.mxu1 %v3293_v2 }
0x1401   :  { %2959 = vmatpush3.bf16.msra.mxu1 %v3970_v40 }
0x1402   :  { %2960 = vmatprep.subr.bf16.mxu1 %v3293_v2 }
0x1405   :  { %2961 = vmatpush3.bf16.msra.mxu1 %v3977_v41 }
0x1406   :  { %2978 = vmatprep.subr.bf16.mxu1 %v3293_v2 }
0x14cb   :  { %v1420_v61 = vpop.f32.mrb[36].mxu1 }
0x14cc   :  { %v1421_v58 = vadd.f32 %v1420_v61, %v3574_v24  ;;  %v2946_v63 = vpop.f32.mrb[37].mxu1  ;;  %v4084_v61 = vld [vmem:[%s4492_s11] sm:$0xff] }
0x14cd   :  { %v1423_v62 = vpop.f32.mrb[38].mxu1 }
0x14ce   :  { %3203 = vtanh.f32 %v1421_v58  ;;  %v2947_v50 = vpop.f32.mrb[39].mxu1 }
0x14d8   :  { %v3982_v14 = vpop.eup %3203 }
0x14d9   :  { %v1439_v54 = vmul.f32 %v3982_v14, %v3865_v46  ;;  %v1433_v56 = vmul.f32 %v3982_v14, %v3870_v55  ;;  %v1445_v24 = vmul.f32 %v3982_v14, %v3877_v23  ;;  %v1474_v46 = vmul.f32 %v3982_v14, %v3994_v60 }
0x14da   :  { %v1484_v55 = vmul.f32 %v3982_v14, %v3989_v57  ;;  %v1494_v23 = vmul.f32 %v3982_v14, %v4001_v31  ;;  %v1432_v32 = vmul.f32 %v3982_v14, %v3889_v48  ;;  %v1503_v21 = vmul.f32 %v3982_v14, %v1502_v45 }
0x14db   :  { %1441 = vrot.lane.b32.xlu1 %v1439_v54, %s3299_s29  ;;  %1435 = vrot.lane.b32.xlu0 %v1433_v56, %s3300_s0 }
0x14df   :  { %1447 = vrot.lane.b32.xlu1 %v1445_v24, %s3301_s4  ;;  %1466 = vperm.xlu0 %3119, %v2617_v51  }
0x14e3   :  { %1476 = vrot.lane.b32.xlu1 %v1474_v46, %s3300_s0  ;;  %1486 = vrot.lane.b32.xlu0 %v1484_v55, %s3299_s29 }
0x14e4   :  { %3120 = vset.pattern.permute.xlu0 %v3296_v7 }
0x14e7   :  { %1496 = vrot.lane.b32.xlu1 %v1494_v23, %s3301_s4 }
0x154d   :  { %v1442_v30 = vpop.permute.xlu1 %1441  ;;  %v1436_v35 = vpop.permute.xlu0 %1435 }
0x154e   :  { %v1438_v37 = vadd.f32 %v1436_v35, %v1432_v32  ;;  %v2625_v35 = vld [vmem:[%s4511_s24 + $0x28] sm:$0xff] }
0x1550   :  { %v1444_v11 = vadd.f32 %v1442_v30, %v1438_v37  ;;  %v4101_v37 = vld [vmem:[%s4512_s13] sm:$0xff] }
0x1551   :  { %v1448_v5 = vpop.permute.xlu1 %1447 }
0x1552   :  { %v1450_v33 = vadd.f32 %v1448_v5, %v1444_v11 }
0x1554   :  { %v1451_v0 = vadd.f32 %v1450_v33, %v3893_v53  ;;  %v1427_v53 = vadd.f32 %v3982_v14, %v3858_v20 }
0x1555   :  { %v1477_v12 = vpop.permute.xlu1 %1476 }
0x1556   :  { %v1452_v18 = vmul.f32 0.5, %v1451_v0  ;;  %v1430_v17 = vmul.f32 %v1429_v3, %v1427_v53  ;;  %v4118_v3 = vld [vmem:[%s4496_s15] sm:$0xff]  ;;  %s1667_s15 = smul.f32 0.5, %s4033_s3 }
0x1558   :  { %1454 = vrot.lane.b32.xlu0 %v1452_v18, %s3300_s0  ;;  %v1431_v19 = vadd.f32 %v1430_v17, %v3903_v22 }
0x1559   :  { %v1497_v43 = vpop.permute.xlu1 %1496 }
0x155c   :  { %1710 = vperm.xlu0 %3120, %v2625_v35  }
0x155e   :  { %v4013_v13 = vpop.permute.xlu0 %1466 }
0x155f   :  { %v1469_v25 = vmul.f32 %v3982_v14, %v4013_v13 }
0x1560   :  { %3123 = vset.pattern.permute.xlu0 %v3297_v8 }
0x1561   :  { %v1479_v15 = vadd.f32 %v1477_v12, %v1469_v25 }
0x1562   :  { %v1487_v48 = vpop.permute.xlu0 %1486 }
0x1563   :  { %v1489_v1 = vadd.f32 %v1487_v48, %v1479_v15 }
0x1565   :  { %v4017_v16 = vadd.f32 %v1497_v43, %v1489_v1 }
0x1567   :  { %1506 = vrot.lane.b32.xlu1 %v4017_v16, %s3300_s0 }
0x156b   :  { %1720 = vperm.xlu1 %3121, %v2625_v35  }
0x156f   :  { %3122 = vset.pattern.permute.xlu1 %v3295_v6 }
0x1570   :  { %1730 = vperm.xlu1 %3122, %v2625_v35  }
0x1574   :  { %3125 = vset.pattern.permute.xlu1 %v3298_v9 }
0x15ca   :  { %v1455_v4 = vpop.permute.xlu0 %1454 }
0x15cb   :  { %v4027_v44 = vadd.f32 %v1455_v4, %v1431_v19 }
0x15cd   :  { %1458 = vst.msk [vmem:[#allocation2 + $0x20] sm:$0xff] %vm276_vm4, %v4027_v44  ;;  %v1500_v51 = vmul.f32 2.0, %v4027_v44 }
0x15cf   :  { %v1501_v20 = vsub.f32 %v1500_v51, %v3915_v39  ;;  %v4056_v39 = vld [vmem:[%s4495_s14 + $0x8] sm:$0xff]  }
0x15d1   :  { %v1504_v42 = vadd.f32 %v1503_v21, %v1501_v20 }
0x15d9   :  { %v1507_v59 = vpop.permute.xlu1 %1506 }
0x15da   :  { %v4039_v49 = vadd.f32 %v1507_v59, %v1504_v42 }
0x15db   :  { %v4133_v28 = vpop.permute.xlu0 %1710 }
0x15dc   :  { %v1510_v22 = vpack.c.bf16 %v4039_v49, %v4039_v49 }
0x15de   :  { %2951 = vmatmul.mubr.msk.bf16.vlgmr.msra.gmra.mrb[32].mxu0 %vm276_vm4, %v1510_v22 }
0x15df   :  { %2967 = vmatpush3.bf16.msra.mxu0 %v4047_v52  ;;  %2974 = vmatprep.mubr.msk.bf16.mxu0 %vm3294_vm1, %v3293_v2 }
0x15e0   :  { %2968 = vmatprep.subr.bf16.mxu0 %v3293_v2 }
0x15e3   :  { %2969 = vmatpush3.bf16.msra.mxu0 %v4056_v39 }
0x15e4   :  { %2970 = vmatprep.subr.bf16.mxu0 %v3293_v2 }
0x15e7   :  { %2971 = vmatpush3.bf16.msra.mxu0 %v4063_v26 }
0x15e8   :  { %2972 = vmatprep.subr.bf16.mxu0 %v3293_v2 }
0x15ea   :  { %v4128_v59 = vpop.permute.xlu1 %1720 }
0x15eb   :  { %2973 = vmatpush3.bf16.msra.mxu0 %v4070_v27 }
0x15ec   :  { %2984 = vmatprep.subr.bf16.mxu0 %v3293_v2 }
0x16b1   :  { %v1551_v34 = vpop.f32.mrb[32].mxu0 }
0x16b2   :  { %v1552_v58 = vadd.f32 %v1551_v34, %v1513_v29  ;;  %v2952_v63 = vpop.f32.mrb[33].mxu0  ;;  %v4140_v29 = vpop.permute.xlu1 %1730 }
0x16b3   :  { %v1554_v62 = vpop.f32.mrb[34].mxu0 }
0x16b4   :  { %v1558_v50 = vadd.f32 %v4084_v61, %v1552_v58  ;;  %v2953_v54 = vpop.f32.mrb[35].mxu0 }
0x16b6   :  { %v2619_v56 = vmul.f32 -1.442695, %v1558_v50  ;;  %v1559_v55 = vmul.f32 0.909, %v1558_v50 }
0x16b8   :  { %3205 = vpow2.f32 %v2619_v56 }
0x16c2   :  { %v3206_v24 = vpop.eup %3205 }
0x16c3   :  { %v1563_v46 = vadd.f32 1.0, %v3206_v24 }
0x16c5   :  { %3207 = vrcp.f32 %v1563_v46 }
0x16cf   :  { %v3208_v23 = vpop.eup %3207 }
0x16d0   :  { %v1566_v30 = vmul.f32 %v3208_v23, %v1559_v55 }
0x16d2   :  { %v1567_v32 = vpack.c.bf16 %v1566_v30, %v1566_v30 }
0x16d4   :  { %2963 = vmatmul.mubr.msk.bf16.vlgmr.msra.gmra.mrb[40].mxu1 %vm387_vm5, %v1567_v32 }
0x16d5   :  { %2979 = vmatpush3.bf16.msra.mxu1 %v3937_v47  ;;  %2980 = vmatprep.mubr.msk.bf16.mxu1 %vm3294_vm1, %v3293_v2 }
0x16d6   :  { %2996 = vmatprep.subr.bf16.mxu1 %v3293_v2 }
0x17a7   :  { %v1606_v5 = vpop.f32.mrb[40].mxu1 }
0x17a8   :  { %v1607_v11 = vadd.f32 %v1606_v5, %v4101_v37  ;;  %v2964_v33 = vpop.f32.mrb[41].mxu1 }
0x17a9   :  { %v1609_v0 = vpop.f32.mrb[42].mxu1  ;;  %v1668_v33 = vstv %s1667_s15 }
0x17aa   :  { %v2621_v18 = vmul.f32 -1.442695, %v1607_v11  ;;  %v2965_v12 = vpop.f32.mrb[43].mxu1  ;;  %v1612_v48 = vmul.f32 0.909, %v1607_v11 }
0x17ac   :  { %3209 = vpow2.f32 %v2621_v18 }
0x17b6   :  { %v3210_v25 = vpop.eup %3209 }
0x17b7   :  { %v1616_v15 = vadd.f32 1.0, %v3210_v25 }
0x17b9   :  { %3211 = vrcp.f32 %v1616_v15 }
0x17c3   :  { %v3212_v1 = vpop.eup %3211 }
0x17c4   :  { %v1619_v43 = vmul.f32 %v3212_v1, %v1612_v48  ;;  %v1741_v48 = vstv %s4172_s12 }
0x17c6   :  { %v1620_v53 = vpack.c.bf16 %v1619_v43, %v1619_v43 }
0x17c8   :  { %2975 = vmatmul.mubr.msk.bf16.vlgmr.msra.gmra.mrb[36].mxu0 %vm387_vm5, %v1620_v53 }
0x17c9   :  { %2985 = vmatpush3.bf16.msra.mxu0 %v3954_v36  ;;  %2992 = vmatprep.mubr.msk.bf16.mxu0 %vm3294_vm1, %v3293_v2 }
0x17ca   :  { %2986 = vmatprep.subr.bf16.mxu0 %v3293_v2 }
0x17cd   :  { %2987 = vmatpush3.bf16.msra.mxu0 %v3963_v10 }
0x17ce   :  { %2988 = vmatprep.subr.bf16.mxu0 %v3293_v2 }
0x17d1   :  { %2989 = vmatpush3.bf16.msra.mxu0 %v3970_v40 }
0x17d2   :  { %2990 = vmatprep.subr.bf16.mxu0 %v3293_v2 }
0x17d5   :  { %2991 = vmatpush3.bf16.msra.mxu0 %v3977_v41 }
0x17d6   :  { %3008 = vmatprep.subr.bf16.mxu0 %v3293_v2 }
0x189b   :  { %v1659_v17 = vpop.f32.mrb[36].mxu0 }
0x189c   :  { %v1660_v19 = vadd.f32 %v1659_v17, %v4118_v3  ;;  %v2976_v4 = vpop.f32.mrb[37].mxu0 }
0x189d   :  { %v1662_v51 = vpop.f32.mrb[38].mxu0 }
0x189e   :  { %3213 = vtanh.f32 %v1660_v19  ;;  %v2977_v45 = vpop.f32.mrb[39].mxu0 }
0x18a8   :  { %v4121_v20 = vpop.eup %3213 }
0x18a9   :  { %v1678_v21 = vmul.f32 %v4121_v20, %v3989_v57  ;;  %v1672_v42 = vmul.f32 %v4121_v20, %v3994_v60  ;;  %v1684_v22 = vmul.f32 %v4121_v20, %v4001_v31  ;;  %v1713_v57 = vmul.f32 %v4121_v20, %v4133_v28 }
0x18aa   :  { %v1723_v60 = vmul.f32 %v4121_v20, %v4128_v59  ;;  %v1733_v31 = vmul.f32 %v4121_v20, %v4140_v29  ;;  %v1671_v58 = vmul.f32 %v4121_v20, %v4013_v13  ;;  %v1742_v1 = vmul.f32 %v4121_v20, %v1741_v48 }
0x18ab   :  { %1680 = vrot.lane.b32.xlu1 %v1678_v21, %s3299_s29  ;;  %1674 = vrot.lane.b32.xlu0 %v1672_v42, %s3300_s0 }
0x18af   :  { %1686 = vrot.lane.b32.xlu1 %v1684_v22, %s3301_s4  ;;  %1705 = vperm.xlu0 %3123, %v2625_v35  }
0x18b3   :  { %1715 = vrot.lane.b32.xlu1 %v1713_v57, %s3300_s0  ;;  %1725 = vrot.lane.b32.xlu0 %v1723_v60, %s3299_s29 }
0x18b4   :  { %3124 = vset.pattern.permute.xlu0 %v3296_v7 }
0x18b7   :  { %1735 = vrot.lane.b32.xlu1 %v1733_v31, %s3301_s4 }
0x191d   :  { %v1681_v34 = vpop.permute.xlu1 %1680  ;;  %v1675_v63 = vpop.permute.xlu0 %1674 }
0x191e   :  { %v1677_v62 = vadd.f32 %v1675_v63, %v1671_v58 }
0x1920   :  { %v1683_v54 = vadd.f32 %v1681_v34, %v1677_v62 }
0x1921   :  { %v1687_v50 = vpop.permute.xlu1 %1686 }
0x1922   :  { %v1689_v56 = vadd.f32 %v1687_v50, %v1683_v54  ;;  %v2633_v50 = vld [vmem:[%s4511_s24 + $0x30] sm:$0xff] }
0x1924   :  { %v1690_v24 = vadd.f32 %v1689_v56, %v4017_v16  ;;  %v1666_v16 = vadd.f32 %v4121_v20, %v3982_v14 }
0x1925   :  { %v1716_v55 = vpop.permute.xlu1 %1715 }
0x1926   :  { %v1691_v46 = vmul.f32 0.5, %v1690_v24  ;;  %v1669_v0 = vmul.f32 %v1668_v33, %v1666_v16 }
0x1928   :  { %1693 = vrot.lane.b32.xlu0 %v1691_v46, %s3300_s0  ;;  %v1670_v18 = vadd.f32 %v1669_v0, %v4027_v44 }
0x1929   :  { %v1736_v5 = vpop.permute.xlu1 %1735 }
0x192c   :  { %1949 = vperm.xlu0 %3124, %v2633_v50  }
0x192e   :  { %v4152_v23 = vpop.permute.xlu0 %1705 }
0x192f   :  { %v1708_v30 = vmul.f32 %v4121_v20, %v4152_v23 }
0x1930   :  { %3127 = vset.pattern.permute.xlu0 %v3297_v8 }
0x1931   :  { %v1718_v32 = vadd.f32 %v1716_v55, %v1708_v30 }
0x1932   :  { %v1726_v13 = vpop.permute.xlu0 %1725 }
0x1933   :  { %v1728_v35 = vadd.f32 %v1726_v13, %v1718_v32 }
0x1935   :  { %v4156_v11 = vadd.f32 %v1736_v5, %v1728_v35 }
0x1937   :  { %1745 = vrot.lane.b32.xlu1 %v4156_v11, %s3300_s0 }
0x193b   :  { %1959 = vperm.xlu1 %3125, %v2633_v50  }
0x193f   :  { %3126 = vset.pattern.permute.xlu1 %v3295_v6 }
0x1940   :  { %1969 = vperm.xlu1 %3126, %v2633_v50  }
0x1944   :  { %3129 = vset.pattern.permute.xlu1 %v3298_v9 }
0x199a   :  { %v1694_v12 = vpop.permute.xlu0 %1693 }
0x199b   :  { %v4166_v25 = vadd.f32 %v1694_v12, %v1670_v18 }
0x199d   :  { %1697 = vst.msk [vmem:[#allocation2 + $0x28] sm:$0xff] %vm276_vm4, %v4166_v25  ;;  %v1739_v15 = vmul.f32 2.0, %v4166_v25 }
0x199f   :  { %v1740_v14 = vsub.f32 %v1739_v15, %v4039_v49  ;;  %v1751_v49 = vstv %s4163_s23 }
0x19a0   :  { %v1752_v19 = vmul.f32 %v1751_v49, %v4077_v38 }
0x19a1   :  { %v1743_v43 = vadd.f32 %v1742_v1, %v1740_v14 }
0x19a9   :  { %v1746_v53 = vpop.permute.xlu1 %1745 }
0x19aa   :  { %v4178_v44 = vadd.f32 %v1746_v53, %v1743_v43 }
0x19ac   :  { %v1749_v17 = vpack.c.bf16 %v4178_v44, %v4178_v44 }
0x19ae   :  { %2981 = vmatmul.mubr.msk.bf16.vlgmr.msra.gmra.mrb[44].mxu1 %vm276_vm4, %v1749_v17  ;;  %v4232_v17 = vpop.permute.xlu0 %1949 }
0x19af   :  { %2997 = vmatpush3.bf16.msra.mxu1 %v4047_v52  ;;  %3004 = vmatprep.mubr.msk.bf16.mxu1 %vm3294_vm1, %v3293_v2 }
0x19b0   :  { %2998 = vmatprep.subr.bf16.mxu1 %v3293_v2 }
0x19b3   :  { %2999 = vmatpush3.bf16.msra.mxu1 %v4056_v39 }
0x19b4   :  { %3000 = vmatprep.subr.bf16.mxu1 %v3293_v2 }
0x19b7   :  { %3001 = vmatpush3.bf16.msra.mxu1 %v4063_v26 }
0x19b8   :  { %3002 = vmatprep.subr.bf16.mxu1 %v3293_v2 }
0x19ba   :  { %v4227_v43 = vpop.permute.xlu1 %1959 }
0x19bb   :  { %3003 = vmatpush3.bf16.msra.mxu1 %v4070_v27 }
0x19bc   :  { %3014 = vmatprep.subr.bf16.mxu1 %v3293_v2 }
0x19bf   :  { %v4239_v49 = vpop.permute.xlu1 %1969 }
0x1a81   :  { %v1790_v4 = vpop.f32.mrb[44].mxu1 }
0x1a82   :  { %v1791_v51 = vadd.f32 %v1790_v4, %v1752_v19  ;;  %v2982_v45 = vpop.f32.mrb[45].mxu1 }
0x1a83   :  { %v1793_v21 = vpop.f32.mrb[46].mxu1 }
0x1a84   :  { %v1797_v42 = vadd.f32 %v1791_v51, %v4084_v61  ;;  %v2983_v22 = vpop.f32.mrb[47].mxu1 }
0x1a86   :  { %v2627_v57 = vmul.f32 -1.442695, %v1797_v42  ;;  %v1798_v34 = vmul.f32 0.909, %v1797_v42 }
0x1a88   :  { %3215 = vpow2.f32 %v2627_v57 }
0x1a92   :  { %v3216_v60 = vpop.eup %3215 }
0x1a93   :  { %v1802_v31 = vadd.f32 1.0, %v3216_v60 }
0x1a95   :  { %3217 = vrcp.f32 %v1802_v31 }
0x1a9f   :  { %v3218_v58 = vpop.eup %3217 }
0x1aa0   :  { %v1805_v63 = vmul.f32 %v3218_v58, %v1798_v34 }
0x1aa2   :  { %v1806_v62 = vpack.c.bf16 %v1805_v63, %v1805_v63 }
0x1aa4   :  { %2993 = vmatmul.mubr.msk.bf16.vlgmr.msra.gmra.mrb[40].mxu0 %vm387_vm5, %v1806_v62 }
0x1aa5   :  { %3009 = vmatpush3.bf16.msra.mxu0 %v3937_v47  ;;  %3010 = vmatprep.mubr.msk.bf16.mxu0 %vm3294_vm1, %v3293_v2 }
0x1aa6   :  { %3026 = vmatprep.subr.bf16.mxu0 %v3293_v2 }
0x1b77   :  { %v1845_v54 = vpop.f32.mrb[40].mxu0 }
0x1b78   :  { %v1846_v56 = vadd.f32 %v1845_v54, %v4101_v37  ;;  %v2994_v24 = vpop.f32.mrb[41].mxu0  ;;  %v1907_v54 = vstv %s1906_s26 }
0x1b79   :  { %v1848_v46 = vpop.f32.mrb[42].mxu0 }
0x1b7a   :  { %v2629_v55 = vmul.f32 -1.442695, %v1846_v56  ;;  %v2995_v30 = vpop.f32.mrb[43].mxu0  ;;  %v1851_v35 = vmul.f32 0.909, %v1846_v56 }
0x1b7c   :  { %3219 = vpow2.f32 %v2629_v55 }
0x1b86   :  { %v3220_v32 = vpop.eup %3219 }
0x1b87   :  { %v1855_v13 = vadd.f32 1.0, %v3220_v32  ;;  %v1980_v32 = vstv %s4271_s5 }
0x1b89   :  { %3221 = vrcp.f32 %v1855_v13 }
0x1b93   :  { %v3222_v5 = vpop.eup %3221 }
0x1b94   :  { %v1858_v16 = vmul.f32 %v3222_v5, %v1851_v35 }
0x1b96   :  { %v1859_v33 = vpack.c.bf16 %v1858_v16, %v1858_v16 }
0x1b98   :  { %3005 = vmatmul.mubr.msk.bf16.vlgmr.msra.gmra.mrb[48].mxu1 %vm387_vm5, %v1859_v33 }
0x1b99   :  { %3015 = vmatpush3.bf16.msra.mxu1 %v3954_v36  ;;  %3022 = vmatprep.mubr.msk.bf16.mxu1 %vm3294_vm1, %v3293_v2 }
0x1b9a   :  { %3016 = vmatprep.subr.bf16.mxu1 %v3293_v2 }
0x1b9d   :  { %3017 = vmatpush3.bf16.msra.mxu1 %v3963_v10 }
0x1b9e   :  { %3018 = vmatprep.subr.bf16.mxu1 %v3293_v2 }
0x1ba1   :  { %3019 = vmatpush3.bf16.msra.mxu1 %v3970_v40 }
0x1ba2   :  { %3020 = vmatprep.subr.bf16.mxu1 %v3293_v2 }
0x1ba5   :  { %3021 = vmatpush3.bf16.msra.mxu1 %v3977_v41 }
0x1ba6   :  { %3038 = vmatprep.subr.bf16.mxu1 %v3293_v2 }
0x1c6b   :  { %v1898_v9 = vpop.f32.mrb[48].mxu1 }
0x1c6c   :  { %v1899_v0 = vadd.f32 %v1898_v9, %v4118_v3  ;;  %v3006_v18 = vpop.f32.mrb[49].mxu1 }
0x1c6d   :  { %v1901_v12 = vpop.f32.mrb[50].mxu1 }
0x1c6e   :  { %3223 = vtanh.f32 %v1899_v0  ;;  %v3007_v15 = vpop.f32.mrb[51].mxu1 }
0x1c78   :  { %v4220_v48 = vpop.eup %3223 }
0x1c79   :  { %v1917_v14 = vmul.f32 %v4220_v48, %v4128_v59  ;;  %v1911_v1 = vmul.f32 %v4220_v48, %v4133_v28  ;;  %v1923_v53 = vmul.f32 %v4220_v48, %v4140_v29  ;;  %v1952_v59 = vmul.f32 %v4220_v48, %v4232_v17 }
0x1c7a   :  { %v1962_v28 = vmul.f32 %v4220_v48, %v4227_v43  ;;  %v1972_v29 = vmul.f32 %v4220_v48, %v4239_v49  ;;  %v1910_v4 = vmul.f32 %v4220_v48, %v4152_v23  ;;  %v1981_v13 = vmul.f32 %v4220_v48, %v1980_v32 }
0x1c7b   :  { %1919 = vrot.lane.b32.xlu1 %v1917_v14, %s3299_s29  ;;  %1913 = vrot.lane.b32.xlu0 %v1911_v1, %s3300_s0 }
0x1c7f   :  { %1925 = vrot.lane.b32.xlu1 %v1923_v53, %s3301_s4  ;;  %1944 = vperm.xlu0 %3127, %v2633_v50  }
0x1c83   :  { %1954 = vrot.lane.b32.xlu1 %v1952_v59, %s3300_s0  ;;  %1964 = vrot.lane.b32.xlu0 %v1962_v28, %s3299_s29 }
0x1c84   :  { %3128 = vset.pattern.permute.xlu0 %v3296_v7 }
0x1c87   :  { %1974 = vrot.lane.b32.xlu1 %v1972_v29, %s3301_s4 }
0x1ced   :  { %v1920_v19 = vpop.permute.xlu1 %1919  ;;  %v1914_v51 = vpop.permute.xlu0 %1913 }
0x1cee   :  { %v1916_v45 = vadd.f32 %v1914_v51, %v1910_v4  ;;  %v2641_v51 = vld [vmem:[%s4511_s24 + $0x38] sm:$0xff]  ;;  %s2145_s24 = smul.f32 0.5, %s4271_s5 }
0x1cf0   :  { %v1922_v42 = vadd.f32 %v1920_v19, %v1916_v45 }
0x1cf1   :  { %v1926_v21 = vpop.permute.xlu1 %1925 }
0x1cf2   :  { %v1928_v22 = vadd.f32 %v1926_v21, %v1922_v42 }
0x1cf4   :  { %v1929_v57 = vadd.f32 %v1928_v22, %v4156_v11  ;;  %v1905_v11 = vadd.f32 %v4220_v48, %v4121_v20 }
0x1cf5   :  { %v1955_v31 = vpop.permute.xlu1 %1954 }
0x1cf6   :  { %v1930_v60 = vmul.f32 0.5, %v1929_v57  ;;  %v1908_v56 = vmul.f32 %v1907_v54, %v1905_v11 }
0x1cf8   :  { %1932 = vrot.lane.b32.xlu0 %v1930_v60, %s3300_s0  ;;  %v1909_v24 = vadd.f32 %v1908_v56, %v4166_v25 }
0x1cf9   :  { %v1975_v62 = vpop.permute.xlu1 %1974 }
0x1cfc   :  { %2188 = vperm.xlu0 %3128, %v2641_v51  }
0x1cfe   :  { %v4251_v34 = vpop.permute.xlu0 %1944 }
0x1cff   :  { %v1947_v7 = vmul.f32 %v4220_v48, %v4251_v34 }
0x1d00   :  { %3131 = vset.pattern.permute.xlu0 %v3297_v8 }
0x1d01   :  { %v1957_v58 = vadd.f32 %v1955_v31, %v1947_v7 }
0x1d02   :  { %v1965_v23 = vpop.permute.xlu0 %1964 }
0x1d03   :  { %v1967_v63 = vadd.f32 %v1965_v23, %v1957_v58 }
0x1d05   :  { %v4255_v50 = vadd.f32 %v1975_v62, %v1967_v63 }
0x1d07   :  { %1984 = vrot.lane.b32.xlu1 %v4255_v50, %s3300_s0 }
0x1d0b   :  { %2198 = vperm.xlu1 %3129, %v2641_v51  }
0x1d0f   :  { %3130 = vset.pattern.permute.xlu1 %v3295_v6 }
0x1d10   :  { %2208 = vperm.xlu1 %3130, %v2641_v51  }
0x1d6a   :  { %v1933_v46 = vpop.permute.xlu0 %1932 }
0x1d6b   :  { %v4265_v55 = vadd.f32 %v1933_v46, %v1909_v24 }
0x1d6d   :  { %1936 = vst.msk [vmem:[#allocation2 + $0x30] sm:$0xff] %vm276_vm4, %v4265_v55  ;;  %v1978_v30 = vmul.f32 2.0, %v4265_v55 }
0x1d6f   :  { %v1979_v20 = vsub.f32 %v1978_v30, %v4178_v44  ;;  %v1990_v44 = vstv %s4262_s27 }
0x1d70   :  { %v1991_v33 = vmul.f32 %v1990_v44, %v4077_v38 }
0x1d71   :  { %v1982_v35 = vadd.f32 %v1981_v13, %v1979_v20 }
0x1d79   :  { %v1985_v5 = vpop.permute.xlu1 %1984 }
0x1d7a   :  { %v4277_v25 = vadd.f32 %v1985_v5, %v1982_v35 }
0x1d7b   :  { %v4330_v46 = vpop.permute.xlu0 %2188 }
0x1d7c   :  { %v1988_v16 = vpack.c.bf16 %v4277_v25, %v4277_v25 }
0x1d7e   :  { %3011 = vmatmul.mubr.msk.bf16.vlgmr.msra.gmra.mrb[44].mxu0 %vm276_vm4, %v1988_v16 }
0x1d7f   :  { %3027 = vmatpush3.bf16.msra.mxu0 %v4047_v52  ;;  %3034 = vmatprep.mubr.msk.bf16.mxu0 %vm3294_vm1, %v3293_v2 }
0x1d80   :  { %3028 = vmatprep.subr.bf16.mxu0 %v3293_v2 }
0x1d83   :  { %3029 = vmatpush3.bf16.msra.mxu0 %v4056_v39 }
0x1d84   :  { %3030 = vmatprep.subr.bf16.mxu0 %v3293_v2 }
0x1d87   :  { %3031 = vmatpush3.bf16.msra.mxu0 %v4063_v26 }
0x1d88   :  { %3032 = vmatprep.subr.bf16.mxu0 %v3293_v2 }
0x1d8b   :  { %3033 = vmatpush3.bf16.msra.mxu0 %v4070_v27 }
0x1d8c   :  { %3044 = vmatprep.subr.bf16.mxu0 %v3293_v2 }
0x1e51   :  { %v2029_v9 = vpop.f32.mrb[44].mxu0 }
0x1e52   :  { %v2030_v0 = vadd.f32 %v2029_v9, %v1991_v33  ;;  %v3012_v18 = vpop.f32.mrb[45].mxu0 }
0x1e53   :  { %v2032_v12 = vpop.f32.mrb[46].mxu0 }
0x1e54   :  { %v2036_v15 = vadd.f32 %v2030_v0, %v4084_v61  ;;  %v3013_v14 = vpop.f32.mrb[47].mxu0 }
0x1e56   :  { %v2635_v1 = vmul.f32 -1.442695, %v2036_v15  ;;  %v2037_v28 = vmul.f32 0.909, %v2036_v15 }
0x1e58   :  { %3225 = vpow2.f32 %v2635_v1 }
0x1e62   :  { %v3226_v53 = vpop.eup %3225 }
0x1e63   :  { %v2041_v59 = vadd.f32 1.0, %v3226_v53  ;;  %v2146_v53 = vstv %s2145_s24 }
0x1e65   :  { %3227 = vrcp.f32 %v2041_v59 }
0x1e6f   :  { %v3228_v29 = vpop.eup %3227 }
0x1e70   :  { %v2044_v19 = vmul.f32 %v3228_v29, %v2037_v28 }
0x1e72   :  { %v2045_v4 = vpack.c.bf16 %v2044_v19, %v2044_v19 }
0x1e74   :  { %3023 = vmatmul.mubr.msk.bf16.vlgmr.msra.gmra.mrb[52].mxu1 %vm387_vm5, %v2045_v4 }
0x1e75   :  { %3039 = vmatpush3.bf16.msra.mxu1 %v3937_v47  ;;  %3040 = vmatprep.mubr.msk.bf16.mxu1 %vm3294_vm1, %v3293_v2 }
0x1e76   :  { %3056 = vmatprep.subr.bf16.mxu1 %v3293_v2 }
0x1f47   :  { %v2084_v45 = vpop.f32.mrb[52].mxu1 }
0x1f48   :  { %v2085_v21 = vadd.f32 %v2084_v45, %v4101_v37  ;;  %v3024_v47 = vpop.f32.mrb[53].mxu1 }
0x1f49   :  { %v2087_v42 = vpop.f32.mrb[54].mxu1 }
0x1f4a   :  { %v2637_v22 = vmul.f32 -1.442695, %v2085_v21  ;;  %v3025_v57 = vpop.f32.mrb[55].mxu1  ;;  %v2090_v7 = vmul.f32 0.909, %v2085_v21 }
0x1f4c   :  { %3229 = vpow2.f32 %v2637_v22 }
0x1f56   :  { %v3230_v60 = vpop.eup %3229 }
0x1f57   :  { %v2094_v31 = vadd.f32 1.0, %v3230_v60 }
0x1f59   :  { %3231 = vrcp.f32 %v2094_v31 }
0x1f63   :  { %v3232_v58 = vpop.eup %3231 }
0x1f64   :  { %v2097_v23 = vmul.f32 %v3232_v58, %v2090_v7 }
0x1f66   :  { %v2098_v63 = vpack.c.bf16 %v2097_v23, %v2097_v23 }
0x1f68   :  { %3035 = vmatmul.mubr.msk.bf16.vlgmr.msra.gmra.mrb[48].mxu0 %vm387_vm5, %v2098_v63 }
0x1f69   :  { %3045 = vmatpush3.bf16.msra.mxu0 %v3954_v36  ;;  %3052 = vmatprep.mubr.msk.bf16.mxu0 %vm3294_vm1, %v3293_v2 }
0x1f6a   :  { %3046 = vmatprep.subr.bf16.mxu0 %v3293_v2 }
0x1f6d   :  { %3047 = vmatpush3.bf16.msra.mxu0 %v3963_v10 }
0x1f6e   :  { %3048 = vmatprep.subr.bf16.mxu0 %v3293_v2 }
0x1f71   :  { %3049 = vmatpush3.bf16.msra.mxu0 %v3970_v40 }
0x1f72   :  { %3050 = vmatprep.subr.bf16.mxu0 %v3293_v2 }
0x1f75   :  { %3051 = vmatpush3.bf16.msra.mxu0 %v3977_v41  ;;  %v4325_v41 = vpop.permute.xlu1 %2198 }
0x1f76   :  { %3068 = vmatprep.subr.bf16.mxu0 %v3293_v2 }
0x1f79   :  { %v4337_v30 = vpop.permute.xlu1 %2208 }
0x203b   :  { %v2137_v8 = vpop.f32.mrb[48].mxu0 }
0x203c   :  { %v2138_v36 = vadd.f32 %v2137_v8, %v4118_v3  ;;  %v3036_v62 = vpop.f32.mrb[49].mxu0 }
0x203d   :  { %v2140_v11 = vpop.f32.mrb[50].mxu0  ;;  %v2415_v62 = vld [vmem:[#allocation2] sm:$0xff] }
0x203e   :  { %3233 = vtanh.f32 %v2138_v36  ;;  %v3037_v54 = vpop.f32.mrb[51].mxu0 }
0x203f   :  { %v2418_v54 = vld [vmem:[#allocation2 + $0x18] sm:$0xff] }
0x2048   :  { %v4318_v56 = vpop.eup %3233 }
0x2049   :  { %v2156_v10 = vmul.f32 %v4318_v56, %v4227_v43  ;;  %v2150_v40 = vmul.f32 %v4318_v56, %v4232_v17  ;;  %v2162_v24 = vmul.f32 %v4318_v56, %v4239_v49  ;;  %v2191_v43 = vmul.f32 %v4318_v56, %v4330_v46 }
0x204a   :  { %v2201_v17 = vmul.f32 %v4318_v56, %v4325_v41  ;;  %v2211_v49 = vmul.f32 %v4318_v56, %v4337_v30  ;;  %v2149_v20 = vmul.f32 %v4318_v56, %v4251_v34 }
0x204b   :  { %2158 = vrot.lane.b32.xlu1 %v2156_v10, %s3299_s29  ;;  %2152 = vrot.lane.b32.xlu0 %v2150_v40, %s3300_s0  ;;  %v2417_v10 = vld [vmem:[#allocation2 + $0x10] sm:$0xff] }
0x204c   :  { %v2425_v40 = vpack.c.bf16 %v2418_v54, %v2417_v10 }
0x204f   :  { %2164 = vrot.lane.b32.xlu1 %v2162_v24, %s3301_s4  ;;  %2183 = vperm.xlu0 %3131, %v2641_v51   ;;  %v2219_v51 = vstv %s4366_s28  ;;  %v2420_v24 = vld [vmem:[#allocation2 + $0x28] sm:$0xff] }
0x2053   :  { %2193 = vrot.lane.b32.xlu1 %v2191_v43, %s3300_s0  ;;  %2203 = vrot.lane.b32.xlu0 %v2201_v17, %s3299_s29  ;;  %v2419_v43 = vld [vmem:[#allocation2 + $0x20] sm:$0xff] }
0x2054   :  { %3132 = vset.pattern.permute.xlu0 %v3295_v6  ;;  %v2426_v17 = vpack.c.bf16 %v2420_v24, %v2419_v43 }
0x2057   :  { %2213 = vrot.lane.b32.xlu1 %v2211_v49, %s3301_s4 }
0x20bd   :  { %v2159_v32 = vpop.permute.xlu1 %2158  ;;  %v2153_v13 = vpop.permute.xlu0 %2152 }
0x20be   :  { %v2155_v35 = vadd.f32 %v2153_v13, %v2149_v20 }
0x20c0   :  { %v2161_v16 = vadd.f32 %v2159_v32, %v2155_v35  ;;  %v2421_v32 = vld [vmem:[#allocation2 + $0x30] sm:$0xff] }
0x20c1   :  { %v2165_v5 = vpop.permute.xlu1 %2164 }
0x20c2   :  { %v2167_v44 = vadd.f32 %v2165_v5, %v2161_v16 }
0x20c4   :  { %v2168_v33 = vadd.f32 %v2167_v44, %v4255_v50  ;;  %v2144_v50 = vadd.f32 %v4318_v56, %v4220_v48  ;;  %v2220_v48 = vmul.f32 %v4318_v56, %v2219_v51 }
0x20c5   :  { %v2194_v0 = vpop.permute.xlu1 %2193 }
0x20c6   :  { %v2169_v9 = vmul.f32 0.5, %v2168_v33  ;;  %v2147_v59 = vmul.f32 %v2146_v53, %v2144_v50 }
0x20c8   :  { %2171 = vrot.lane.b32.xlu0 %v2169_v9, %s3300_s0  ;;  %v2148_v28 = vadd.f32 %v2147_v59, %v4265_v55  ;;  %v4406_v9 = vld [vmem:[%s4498_s17] ss:$0 sm:$0xff] }
0x20c9   :  { %v2214_v14 = vpop.permute.xlu1 %2213 }
0x20ce   :  { %v4349_v18 = vpop.permute.xlu0 %2183 }
0x20cf   :  { %v2186_v6 = vmul.f32 %v4318_v56, %v4349_v18 }
0x20d1   :  { %v2196_v12 = vadd.f32 %v2194_v0, %v2186_v6 }
0x20d2   :  { %v2204_v34 = vpop.permute.xlu0 %2203 }
0x20d3   :  { %v2206_v15 = vadd.f32 %v2204_v34, %v2196_v12 }
0x20d5   :  { %v4353_v1 = vadd.f32 %v2214_v14, %v2206_v15 }
0x20d7   :  { %2223 = vrot.lane.b32.xlu1 %v4353_v1, %s3300_s0 }
0x213a   :  { %v2172_v29 = vpop.permute.xlu0 %2171 }
0x213b   :  { %v4361_v19 = vadd.f32 %v2172_v29, %v2148_v28 }
0x213d   :  { %2175 = vst.msk [vmem:[#allocation2 + $0x38] sm:$0xff] %vm276_vm4, %v4361_v19  ;;  %v2217_v4 = vmul.f32 2.0, %v4361_v19 }
0x213f   :  { %v2218_v45 = vsub.f32 %v2217_v4, %v4277_v25  ;;  %v2229_v25 = vstv %s2640_s21 }
0x2140   :  { %v2230_v22 = vmul.f32 %v2229_v25, %v4077_v38 }
0x2141   :  { %v2221_v21 = vadd.f32 %v2220_v48, %v2218_v45 }
0x2144   :  { %v2422_v49 = vld [vmem:[#allocation2 + $0x38] sm:$0xff] }
0x2145   :  { %v2427_v20 = vpack.c.bf16 %v2422_v49, %v2421_v32 }
0x2149   :  { %v2224_v47 = vpop.permute.xlu1 %2223 }
0x214a   :  { %v2226_v42 = vadd.f32 %v2224_v47, %v2221_v21 }
0x214c   :  { %v2227_v55 = vpack.c.bf16 %v2226_v42, %v2226_v42 }
0x214e   :  { %3041 = vmatmul.mubr.msk.bf16.vlgmr.msra.gmra.mrb[56].mxu1 %vm276_vm4, %v2227_v55 }
0x214f   :  { %3057 = vmatpush3.bf16.msra.mxu1 %v4047_v52  ;;  %3064 = vmatprep.mubr.msk.bf16.mxu1 %vm3294_vm1, %v3293_v2 }
0x2150   :  { %3058 = vmatprep.subr.bf16.mxu1 %v3293_v2 }
0x2153   :  { %3059 = vmatpush3.bf16.msra.mxu1 %v4056_v39 }
0x2154   :  { %3060 = vmatprep.subr.bf16.mxu1 %v3293_v2 }
0x2157   :  { %3061 = vmatpush3.bf16.msra.mxu1 %v4063_v26 }
0x2158   :  { %3062 = vmatprep.subr.bf16.mxu1 %v3293_v2 }
0x215b   :  { %3063 = vmatpush3.bf16.msra.mxu1 %v4070_v27  ;;  %v3146_v27 = vld [vmem:[%s4497_s16] sm:$0xff]  }
0x2221   :  { %v2268_v57 = vpop.f32.mrb[56].mxu1 }
0x2222   :  { %v2269_v52 = vadd.f32 %v2268_v57, %v2230_v22  ;;  %v3042_v60 = vpop.f32.mrb[57].mxu1 }
0x2223   :  { %v2271_v31 = vpop.f32.mrb[58].mxu1 }
0x2224   :  { %v2275_v7 = vadd.f32 %v2269_v52, %v4084_v61  ;;  %v3043_v58 = vpop.f32.mrb[59].mxu1  ;;  %v2416_v61 = vld [vmem:[#allocation2 + $0x8] sm:$0xff] }
0x2225   :  { %v2424_v11 = vpack.c.bf16 %v2416_v61, %v2415_v62 }
0x2226   :  { %v2643_v23 = vmul.f32 -1.442695, %v2275_v7  ;;  %v2276_v26 = vmul.f32 0.909, %v2275_v7 }
0x2228   :  { %3235 = vpow2.f32 %v2643_v23 }
0x2232   :  { %v3236_v39 = vpop.eup %3235 }
0x2233   :  { %v2280_v63 = vadd.f32 1.0, %v3236_v39 }
0x2235   :  { %3237 = vrcp.f32 %v2280_v63 }
0x223f   :  { %v3238_v8 = vpop.eup %3237 }
0x2240   :  { %v2283_v36 = vmul.f32 %v3238_v8, %v2276_v26 }
0x2242   :  { %v2284_v38 = vpack.c.bf16 %v2283_v36, %v2283_v36 }
0x2244   :  { %3053 = vmatmul.mubr.msk.bf16.vlgmr.msra.gmra.mrb[52].mxu0 %vm387_vm5, %v2284_v38 }
0x2245   :  { %3069 = vmatpush3.bf16.msra.mxu0 %v3146_v27  ;;  %3070 = vmatprep.mubr.msk.bf16.mxu0 %vm3294_vm1, %v3293_v2 }
0x224c   :  { %3071 = vmatmul.mubr.msk.bf16.vlgmr.msra.gmra.mrb[56].mxu0 %vm276_vm4, %v2424_v11 }
0x224d   :  { %3074 = vmatprep.mubr.msk.bf16.mxu0 %vm3294_vm1, %v3293_v2 }
0x2254   :  { %3075 = vmatmul.mubr.msk.bf16.gmra.mrb[60].mxu0 %vm276_vm4, %v2425_v40 }
0x2255   :  { %3078 = vmatprep.mubr.msk.bf16.mxu0 %vm3294_vm1, %v3293_v2 }
0x225c   :  { %3079 = vmatmul.mubr.msk.bf16.gmra.mrb[64].mxu0 %vm276_vm4, %v2426_v17 }
0x225d   :  { %3082 = vmatprep.mubr.msk.bf16.mxu0 %vm3294_vm1, %v3293_v2 }
0x2264   :  { %3083 = vmatmul.mubr.msk.bf16.gmra.mrb[68].mxu0 %vm276_vm4, %v2427_v20 }
0x2265   :  { %3086 = vmatprep.mubr.msk.bf16.mxu0 %vm3294_vm1, %v3293_v2 }
0x2317   :  { %v2323_v13 = vpop.f32.mrb[52].mxu0 }
0x2318   :  { %v2324_v35 = vadd.f32 %v2323_v13, %v4101_v37  ;;  %v3054_v5 = vpop.f32.mrb[53].mxu0 }
0x2319   :  { %v2326_v16 = vpop.f32.mrb[54].mxu0 }
0x231a   :  { %v2645_v44 = vmul.f32 -1.442695, %v2324_v35  ;;  %v3055_v33 = vpop.f32.mrb[55].mxu0  ;;  %v2329_v47 = vmul.f32 0.909, %v2324_v35 }
0x231c   :  { %3239 = vpow2.f32 %v2645_v44 }
0x231f   :  { %v2493_v0 = vpop.f32.mrb[56].mxu0 }
0x2320   :  { %v2494_v6 = vadd.f32 %v4406_v9, %v2493_v0  ;;  %v3072_v12 = vpop.f32.mrb[57].mxu0 }
0x2321   :  { %v2496_v34 = vpop.f32.mrb[58].mxu0 }
0x2322   :  { %2532 = vst.msk [vmem:[%s4499_s18] sm:$0xff] %vm2531_vm6, %v2494_v6  ;;  %v2497_v2 = vadd.f32 %v4406_v9, %v2496_v34  ;;  %v3073_v37 = vpop.f32.mrb[59].mxu0 }
0x2324   :  { %2533 = vst.msk [vmem:[%s4499_s18 + $0x8] sm:$0xff] %vm2531_vm6, %v2497_v2 }
0x2326   :  { %v3240_v15 = vpop.eup %3239 }
0x2327   :  { %v2333_v14 = vadd.f32 1.0, %v3240_v15  ;;  %v2501_v50 = vpop.f32.mrb[60].mxu0 }
0x2328   :  { %v2502_v53 = vadd.f32 %v4406_v9, %v2501_v50  ;;  %v3076_v59 = vpop.f32.mrb[61].mxu0 }
0x2329   :  { %3241 = vrcp.f32 %v2333_v14  ;;  %v2504_v28 = vpop.f32.mrb[62].mxu0 }
0x232a   :  { %2534 = vst.msk [vmem:[%s4499_s18 + $0x10] sm:$0xff] %vm2531_vm6, %v2502_v53  ;;  %v2505_v29 = vadd.f32 %v4406_v9, %v2504_v28  ;;  %v3077_v4 = vpop.f32.mrb[63].mxu0 }
0x232c   :  { %2535 = vst.msk [vmem:[%s4499_s18 + $0x18] sm:$0xff] %vm2531_vm6, %v2505_v29 }
0x232f   :  { %v2509_v51 = vpop.f32.mrb[64].mxu0 }
0x2330   :  { %v2510_v45 = vadd.f32 %v4406_v9, %v2509_v51  ;;  %v3080_v48 = vpop.f32.mrb[65].mxu0 }
0x2331   :  { %v2512_v21 = vpop.f32.mrb[66].mxu0 }
0x2332   :  { %2536 = vst.msk [vmem:[%s4499_s18 + $0x20] sm:$0xff] %vm2531_vm6, %v2510_v45  ;;  %v2513_v42 = vadd.f32 %v4406_v9, %v2512_v21  ;;  %v3081_v55 = vpop.f32.mrb[67].mxu0 }
0x2333   :  { %v3242_v25 = vpop.eup %3241 }
0x2334   :  { %v2336_v22 = vmul.f32 %v3242_v25, %v2329_v47  ;;  %2537 = vst.msk [vmem:[%s4499_s18 + $0x28] sm:$0xff] %vm2531_vm6, %v2513_v42 }
0x2336   :  { %v2337_v57 = vpack.c.bf16 %v2336_v22, %v2336_v22 }
0x2337   :  { %v2517_v52 = vpop.f32.mrb[68].mxu0 }
0x2338   :  { %v2518_v60 = vadd.f32 %v4406_v9, %v2517_v52  ;;  %3065 = vmatmul.mubr.msk.bf16.vlgmr.msra.gmra.mrb[60].mxu1 %vm387_vm5, %v2337_v57  ;;  %v3084_v31 = vpop.f32.mrb[69].mxu0 }
0x2339   :  { %v2520_v7 = vpop.f32.mrb[70].mxu0 }
0x233a   :  { %2538 = vst.msk [vmem:[%s4499_s18 + $0x30] sm:$0xff] %vm2531_vm6, %v2518_v60  ;;  %v2521_v58 = vadd.f32 %v4406_v9, %v2520_v7  ;;  %v3085_v23 = vpop.f32.mrb[71].mxu0 }
0x233c   :  { %2539 = vst.msk [vmem:[%s4499_s18 + $0x38] sm:$0xff] %vm2531_vm6, %v2521_v58 }
0x240b   :  { %v2376_v39 = vpop.f32.mrb[60].mxu1 }
0x240c   :  { %v2377_v63 = vadd.f32 %v2376_v39, %v4118_v3  ;;  %v3066_v26 = vpop.f32.mrb[61].mxu1 }
0x240d   :  { %v2379_v8 = vpop.f32.mrb[62].mxu1 }
0x240e   :  { %3243 = vtanh.f32 %v2377_v63  ;;  %v3067_v36 = vpop.f32.mrb[63].mxu1 }
0x2418   :  { %v3244_v27 = vpop.eup %3243 }
0x2419   :  { %v2395_v38 = vmul.f32 %v3244_v27, %v4325_v41  ;;  %v2389_v61 = vmul.f32 %v3244_v27, %v4330_v46  ;;  %v2401_v62 = vmul.f32 %v3244_v27, %v4337_v30  ;;  %v2388_v3 = vmul.f32 %v3244_v27, %v4349_v18 }
0x241a   :  { %v2383_v46 = vadd.f32 %v3244_v27, %v4318_v56 }
0x241b   :  { %2397 = vrot.lane.b32.xlu1 %v2395_v38, %s3299_s29  ;;  %2391 = vrot.lane.b32.xlu0 %v2389_v61, %s3300_s0  ;;  %s2384_s29 = smul.f32 0.5, %s4366_s28 }
0x241d   :  { %v2385_v49 = vstv %s2384_s29 }
0x241e   :  { %v2386_v30 = vmul.f32 %v2385_v49, %v2383_v46 }
0x241f   :  { %2403 = vrot.lane.b32.xlu0 %v2401_v62, %s3301_s4  ;;  %s3302_s4 = smov [#allocation5]  }
0x2420   :  { %v2387_v32 = vadd.f32 %v2386_v30, %v4361_v19  ;;  %s2549_s5 = sshll.u32 %s3302_s4, 4  ;;  %s2550_s5 = int_to_ptr.vmem [resolvable:$true] %s2549_s5 }
0x2421   :  { %s3266_s30 = scalar_lea.vmem %s2550_s5, 128  ;;  %p3271_p6 = scmp.lt.s32.totalorder %s2550_s5, %s2550_s5 }
0x2422   :  { %p3267_p5 = scmp.ne.s32.totalorder %s2550_s5, %s3266_s30  ;;  %p3272_p7 = scmp.lt.s32.totalorder %s3266_s30, %s3266_s30 }
0x2424   :  { %p3273_p8 = por %p3272_p7, %p3271_p6 }
0x2426   :  { %p3274_p9 = pnand %p3273_p8, %p3267_p5 }
0x248d   :  { %v2392_v11 = vpop.permute.xlu0 %2391  ;;  %v2398_v10 = vpop.permute.xlu1 %2397 }
0x248e   :  { %v2394_v54 = vadd.f32 %v2392_v11, %v2388_v3 }
0x2490   :  { %v2400_v40 = vadd.f32 %v2398_v10, %v2394_v54 }
0x2491   :  { %v2404_v24 = vpop.permute.xlu0 %2403 }
0x2492   :  { %v2406_v43 = vadd.f32 %v2404_v24, %v2400_v40 }
0x2494   :  { %v2407_v41 = vadd.f32 %v2406_v43, %v4353_v1 }
0x2496   :  { %v2408_v17 = vmul.f32 0.5, %v2407_v41 }
0x2498   :  { %2410 = vrot.lane.b32.xlu1 %v2408_v17, %s3300_s0 }
0x250a   :  { %v2411_v20 = vpop.permute.xlu1 %2410 }
0x250b   :  { %v2413_v18 = vadd.f32 %v2411_v20, %v2387_v32 }
0x250d   :  { %2414 = vst.msk [vmem:[#allocation2 + $0x40] sm:$0xff] %vm276_vm4, %v2413_v18 }
0x2514   :  { %v2423_v13 = vld [vmem:[#allocation2 + $0x40] sm:$0xff] }
0x2515   :  { %v2428_v35 = vpack.c.bf16 %v2423_v13, %v2423_v13 }
0x2517   :  { %3087 = vmatmul.mubr.msk.bf16.gmra.mrb[72].mxu0 %vm276_vm4, %v2428_v35 }
0x2518   :  { %3277 = shalt.err (!%p3274_p9)
}
0x2519   :  { %s3278_s24 = scalar_lea.hbm %s4500_s19, 128 }
0x251a   :  { %p3279_p10 = scmp.ne.s32.totalorder %s4500_s19, %s3278_s24  ;;  %p3282_p11 = scmp.lt.u32.totalorder %s3278_s24, %s4500_s19 }
0x251c   :  { %p3284_p12 = pnand %p3282_p11, %p3279_p10 }
0x251e   :  { %3287 = shalt.err (!%p3284_p12)
}
0x251f   :  { %2552 = dma.vmem_to_hbm [thread:$0]  %s2550_s5, 128, %s4500_s19, [#allocation6]  }
0x25ea   :  { %v2525_v56 = vpop.f32.mrb[72].mxu0 }
0x25eb   :  { %v2526_v1 = vadd.f32 %v4406_v9, %v2525_v56  ;;  %v3088_v19 = vpop.f32.mrb[73].mxu0 }
0x25ec   :  { %v2528_v5 = vpop.f32.mrb[74].mxu0 }
0x25ed   :  { %2540 = vst.msk [vmem:[%s4499_s18 + $0x40] sm:$0xff] %vm2531_vm6, %v2526_v1  ;;  %v3089_v16 = vpop.f32.mrb[75].mxu0 }
0x25ee   :  { %3290 = dma.done.wait [#allocation6], 128  }
0x25ef   :  { %3291 = vsyncadd [#allocation6], 4294967168 }
0x25f0   :  { %2558 = vsyncpa [#allocation6], 1 }

</bundles_post_ra>
